<compile_context>
chip_gen: v7x
topology: tpu7x:2x2x1
jax: 0.10.0
libtpu: 0.0.40
codegen_flags: <defaults>
</compile_context>

<pallas_src>
import numpy as np

import jax
import jax.numpy as jnp
from jax.experimental import pallas as pl
from jax.experimental.pallas import tpu as pltpu


_VMEM_SPEC = pl.BlockSpec(memory_space=pltpu.MemorySpace.VMEM)
_TAPS = 9          # 3x3 kernel taps
_COUT = 64


# ----------------------------------------------------------------------------
# Fused Pallas kernel: conv1 + conv2 + 3 ResBlocks, all VMEM-resident.
# ----------------------------------------------------------------------------
def _tinynet_fused_kernel(a1_ref, w1_ref, s2_ref, w2_ref, msel_ref, wres_ref,
                          b_ref, o_ref):
    f32, bf16 = jnp.float32, jnp.bfloat16
    m2, cout = o_ref.shape                       # (N*3*3, 64)

    def bias(idx):                               # [1, cout] f32, broadcasts
        return b_ref[pl.ds(idx, 1), :]

    def conv3x3(x_bf, sel_ref, w_ref, w_row0, bias_idx):
        """3x3 conv + bias + ReLU.

        One MXU matmul gathers all nine taps' input patches at once (the
        stacked 0/1 selection matrix puts tap t's patch at the 8-aligned
        sublane offset t*stride), followed by nine per-tap weight matmuls
        accumulated in f32.
        """
        cin = x_bf.shape[1]
        sel_stride = sel_ref.shape[0] // _TAPS   # per-tap row stride (8-aligned)
        # [9*stride, cin]: rows [t*stride, t*stride + m2) are tap t's patch.
        p_all = jnp.dot(sel_ref[...], x_bf,
                        preferred_element_type=f32).astype(bf16)
        acc = jnp.zeros((m2, cout), f32)
        for t in range(_TAPS):
            patch = p_all[t * sel_stride:t * sel_stride + m2, :]     # [m2, cin]
            w_t = w_ref[pl.ds(w_row0 + t * cin, cin), :]             # [cin, cout]
            acc = acc + jnp.dot(patch, w_t, preferred_element_type=f32)
        return jnp.maximum(acc + bias(bias_idx), 0.0)

    # conv1: im2col matmul (A1 prebuilt from the HBM input), bias, ReLU.
    h1 = jnp.dot(a1_ref[...], w1_ref[...], preferred_element_type=f32)
    h1 = jnp.maximum(h1 + bias(0), 0.0)                              # [N*49, 64]

    # conv2 (stride 2): strided im2col expressed via the stacked selection.
    h = conv3x3(h1.astype(bf16), s2_ref, w2_ref, 0, 1)               # [N*9, 64]

    # 3 ResBlocks: h = relu(h + relu(conv_b(relu(conv_a(h))) + b_b)).
    for rb in range(3):
        mid = conv3x3(h.astype(bf16), msel_ref, wres_ref,
                      (2 * rb) * _TAPS * cout, 2 + 2 * rb)
        out = conv3x3(mid.astype(bf16), msel_ref, wres_ref,
                      (2 * rb + 1) * _TAPS * cout, 3 + 2 * rb)
        h = jnp.maximum(h + out, 0.0)

    # cout=64 (< 128 lanes) => masked store; negligible at this output size.
    o_ref[...] = h


# ----------------------------------------------------------------------------
# One-time parameter / constant preparation (hoisted out of the forward pass).
# ----------------------------------------------------------------------------
def _round_up8(x):
    return (x + 7) // 8 * 8


def _build_conv2_select(n):
    """0/1 matrices gathering conv1-output rows into conv2 3x3/stride-2 patches."""
    m1, m2 = n * 7 * 7, n * 3 * 3
    stride = _round_up8(m2)
    s = np.zeros((_TAPS * stride, m1), np.float32)
    for t in range(_TAPS):
        i, j = t // 3, t % 3
        for b in range(n):
            for oh in range(3):
                for ow in range(3):
                    r2 = b * 9 + oh * 3 + ow
                    r1 = b * 49 + (2 * oh + i) * 7 + (2 * ow + j)
                    s[t * stride + r2, r1] = 1.0
    return s


def _build_res_select(n):
    """0/1 shift+mask matrices for a 3x3 / stride-1 / pad-1 conv on a 3x3 grid."""
    m2 = n * 3 * 3
    stride = _round_up8(m2)
    s = np.zeros((_TAPS * stride, m2), np.float32)
    for t in range(_TAPS):
        di, dj = t // 3 - 1, t % 3 - 1
        for b in range(n):
            for oh in range(3):
                for ow in range(3):
                    ih, iw = oh + di, ow + dj
                    if 0 <= ih < 3 and 0 <= iw < 3:
                        s[t * stride + b * 9 + oh * 3 + ow,
                          b * 9 + ih * 3 + iw] = 1.0
    return s


def _weight_to_matrix(w_oihw):
    # PyTorch conv weight [Cout, Cin, 3, 3] -> [9*Cin, Cout], row = (i*3+j)*Cin + cin.
    cout = w_oihw.shape[0]
    return jnp.transpose(w_oihw, (2, 3, 1, 0)).reshape(-1, cout)


def prepare_kernel_params(params, batch):
    """Convert PyTorch-layout params into kernel-ready arrays, once."""
    w1, b1 = params["c1"]
    w2, b2 = params["c2"]
    wres, biases = [], [b1, b2]
    for (wa, ba), (wb, bb) in params["res"]:
        wres += [_weight_to_matrix(wa), _weight_to_matrix(wb)]
        biases += [ba, bb]
    return {
        "w1": _weight_to_matrix(w1).astype(jnp.bfloat16),        # [27, 64]
        "w2": _weight_to_matrix(w2).astype(jnp.bfloat16),        # [576, 64]
        "wres": jnp.concatenate(wres, 0).astype(jnp.bfloat16),   # [6*576, 64]
        "b": jnp.stack(biases, 0).astype(jnp.float32),           # [8, 64]
        "sel2": jnp.asarray(_build_conv2_select(batch), jnp.bfloat16),
        "msel": jnp.asarray(_build_res_select(batch), jnp.bfloat16),
    }


# ----------------------------------------------------------------------------
# Forward pass.
# ----------------------------------------------------------------------------
def _im2col_conv1(x_nhwc):
    """3x3 / stride-2 / no-pad im2col of the network input (pure indexing)."""
    n, h, w, c = x_nhwc.shape
    ho, wo = (h - 3) // 2 + 1, (w - 3) // 2 + 1
    cols = [x_nhwc[:, i:i + 2 * ho:2, j:j + 2 * wo:2, :]
            for i in range(3) for j in range(3)]
    col = jnp.stack(cols, axis=3)                         # [N, Ho, Wo, 9, C]
    return col.reshape(n * ho * wo, 9 * c)                # row = n*49 + oh*7 + ow


@jax.jit
def tinynet_forward(kparams, x_nchw):
    n = x_nchw.shape[0]
    x = jnp.transpose(x_nchw, (0, 2, 3, 1))               # NCHW -> NHWC
    a1 = _im2col_conv1(x).astype(jnp.bfloat16)            # [N*49, 27]
    out2d = pl.pallas_call(
        _tinynet_fused_kernel,
        out_shape=jax.ShapeDtypeStruct((n * 9, _COUT), jnp.float32),
        in_specs=[_VMEM_SPEC] * 7,
        out_specs=_VMEM_SPEC,
    )(a1, kparams["w1"], kparams["sel2"], kparams["w2"],
      kparams["msel"], kparams["wres"], kparams["b"])
    out = out2d.reshape(n, 3, 3, _COUT)                   # rows are (n, oh, ow)
    return jnp.transpose(out, (0, 3, 1, 2))               # NHWC -> NCHW


# ----------------------------------------------------------------------------
# Parameter init + pure-JAX f32 reference (sanity check).
# ----------------------------------------------------------------------------
def _init_params(key):
    def conv_init(k, cout, cin):
        k_w, k_b = jax.random.split(k)
        std = 1.0 / jnp.sqrt(cin * 9)
        w = jax.random.normal(k_w, (cout, cin, 3, 3), jnp.float32) * std
        b = jax.random.normal(k_b, (cout,), jnp.float32) * std
        return w, b

    keys = jax.random.split(key, 8)
    return {
        "c1": conv_init(keys[0], 64, 3),
        "c2": conv_init(keys[1], 64, 64),
        "res": [
            (conv_init(keys[2 + 2 * r], 64, 64), conv_init(keys[3 + 2 * r], 64, 64))
            for r in range(3)
        ],
    }


def _ref_conv_relu(x_nchw, w, b, stride, padding):
    y = jax.lax.conv_general_dilated(
        x_nchw, w, window_strides=(stride, stride),
        padding=[(padding, padding), (padding, padding)],
        dimension_numbers=("NCHW", "OIHW", "NCHW"))
    return jnp.maximum(y + b[None, :, None, None], 0.0)


def _ref_forward(params, x_nchw):
    w1, b1 = params["c1"]
    c1 = _ref_conv_relu(x_nchw, w1, b1, 2, 0)
    w2, b2 = params["c2"]
    h = _ref_conv_relu(c1, w2, b2, 2, 0)
    for (wa, ba), (wb, bb) in params["res"]:
        mid = _ref_conv_relu(h, wa, ba, 1, 1)
        out = _ref_conv_relu(mid, wb, bb, 1, 1)
        h = jnp.maximum(h + out, 0.0)
    return h


if __name__ == "__main__":
    key = jax.random.PRNGKey(0)
    k_params, k_x = jax.random.split(key)
    params = _init_params(k_params)
    x = jax.random.normal(k_x, (2, 3, 16, 16), jnp.float32)   # NCHW, like PyTorch

    kparams = prepare_kernel_params(params, batch=2)          # one-time prep
    out = jax.block_until_ready(tinynet_forward(kparams, x))
    assert out.shape == (2, 64, 3, 3), out.shape

    ref = jax.block_until_ready(_ref_forward(params, x))
    max_err = float(jnp.max(jnp.abs(out - ref)))
    # bf16 MXU inputs => slightly looser tolerance than pure f32.
    assert jnp.allclose(out, ref, atol=2e-2, rtol=2e-2), \
        f"mismatch vs reference (max abs err {max_err})"

    print("KERNEL_OK")
</pallas_src>

<mosaic_0001>
module attributes {stable_mosaic.version = 11 : i64} {
  func.func @_tinynet_fused_kernel(%arg0: memref<98x27xbf16, #tpu.memory_space<vmem>>, %arg1: memref<27x64xbf16, #tpu.memory_space<vmem>>, %arg2: memref<216x98xbf16, #tpu.memory_space<vmem>>, %arg3: memref<576x64xbf16, #tpu.memory_space<vmem>>, %arg4: memref<216x18xbf16, #tpu.memory_space<vmem>>, %arg5: memref<3456x64xbf16, #tpu.memory_space<vmem>>, %arg6: memref<8x64xf32, #tpu.memory_space<vmem>>, %arg7: memref<18x64xf32, #tpu.memory_space<vmem>>) attributes {dimension_semantics = [], scalar_prefetch = 0 : i64, scratch_operands = 0 : i64, tpu.core_type = #tpu.core_type<tc>} {
    %c0 = arith.constant 0 : index
    %c0_0 = arith.constant 0 : index
    %0 = vector.load %arg0[%c0, %c0_0] : memref<98x27xbf16, #tpu.memory_space<vmem>>, vector<98x27xbf16>
    %c0_1 = arith.constant 0 : index
    %c0_2 = arith.constant 0 : index
    %1 = vector.load %arg1[%c0_1, %c0_2] : memref<27x64xbf16, #tpu.memory_space<vmem>>, vector<27x64xbf16>
    %cst = arith.constant dense<0.000000e+00> : vector<98x64xf32>
    %2 = tpu.matmul %0, %1, %cst {dimension_numbers = #tpu.dot_dimension_numbers<[1], [0], [0], [1], [0, 0, 1, 1], [], []>} : vector<98x27xbf16>, vector<27x64xbf16>, vector<98x64xf32> -> vector<98x64xf32>
    %c0_3 = arith.constant 0 : index
    %c0_4 = arith.constant 0 : index
    %3 = vector.load %arg6[%c0_3, %c0_4] : memref<8x64xf32, #tpu.memory_space<vmem>>, vector<1x64xf32>
    %4 = vector.broadcast %3 : vector<1x64xf32> to vector<98x64xf32>
    %5 = arith.addf %2, %4 : vector<98x64xf32>
    %cst_5 = arith.constant 0.000000e+00 : f32
    %6 = vector.broadcast %cst_5 : f32 to vector<98x64xf32>
    %7 = arith.maximumf %5, %6 : vector<98x64xf32>
    %8 = arith.truncf %7 : vector<98x64xf32> to vector<98x64xbf16>
    %c0_6 = arith.constant 0 : index
    %c0_7 = arith.constant 0 : index
    %9 = vector.load %arg2[%c0_6, %c0_7] : memref<216x98xbf16, #tpu.memory_space<vmem>>, vector<216x98xbf16>
    %cst_8 = arith.constant dense<0.000000e+00> : vector<216x64xf32>
    %10 = tpu.matmul %9, %8, %cst_8 {dimension_numbers = #tpu.dot_dimension_numbers<[1], [0], [0], [1], [0, 0, 1, 1], [], []>} : vector<216x98xbf16>, vector<98x64xbf16>, vector<216x64xf32> -> vector<216x64xf32>
    %11 = arith.truncf %10 : vector<216x64xf32> to vector<216x64xbf16>
    %cst_9 = arith.constant 0.000000e+00 : f32
    %12 = vector.broadcast %cst_9 : f32 to vector<18x64xf32>
    %13 = vector.extract_strided_slice %11 {offsets = [0, 0], sizes = [18, 64], strides = [1, 1]} : vector<216x64xbf16> to vector<18x64xbf16>
    %c0_10 = arith.constant 0 : index
    %c0_11 = arith.constant 0 : index
    %14 = vector.load %arg3[%c0_10, %c0_11] : memref<576x64xbf16, #tpu.memory_space<vmem>>, vector<64x64xbf16>
    %cst_12 = arith.constant dense<0.000000e+00> : vector<18x64xf32>
    %15 = tpu.matmul %13, %14, %cst_12 {dimension_numbers = #tpu.dot_dimension_numbers<[1], [0], [0], [1], [0, 0, 1, 1], [], []>} : vector<18x64xbf16>, vector<64x64xbf16>, vector<18x64xf32> -> vector<18x64xf32>
    %16 = arith.addf %12, %15 : vector<18x64xf32>
    %17 = vector.extract_strided_slice %11 {offsets = [24, 0], sizes = [18, 64], strides = [1, 1]} : vector<216x64xbf16> to vector<18x64xbf16>
    %c64 = arith.constant 64 : index
    %c0_13 = arith.constant 0 : index
    %18 = vector.load %arg3[%c64, %c0_13] : memref<576x64xbf16, #tpu.memory_space<vmem>>, vector<64x64xbf16>
    %cst_14 = arith.constant dense<0.000000e+00> : vector<18x64xf32>
    %19 = tpu.matmul %17, %18, %cst_14 {dimension_numbers = #tpu.dot_dimension_numbers<[1], [0], [0], [1], [0, 0, 1, 1], [], []>} : vector<18x64xbf16>, vector<64x64xbf16>, vector<18x64xf32> -> vector<18x64xf32>
    %20 = arith.addf %16, %19 : vector<18x64xf32>
    %21 = vector.extract_strided_slice %11 {offsets = [48, 0], sizes = [18, 64], strides = [1, 1]} : vector<216x64xbf16> to vector<18x64xbf16>
    %c128 = arith.constant 128 : index
    %c0_15 = arith.constant 0 : index
    %22 = vector.load %arg3[%c128, %c0_15] : memref<576x64xbf16, #tpu.memory_space<vmem>>, vector<64x64xbf16>
    %cst_16 = arith.constant dense<0.000000e+00> : vector<18x64xf32>
    %23 = tpu.matmul %21, %22, %cst_16 {dimension_numbers = #tpu.dot_dimension_numbers<[1], [0], [0], [1], [0, 0, 1, 1], [], []>} : vector<18x64xbf16>, vector<64x64xbf16>, vector<18x64xf32> -> vector<18x64xf32>
    %24 = arith.addf %20, %23 : vector<18x64xf32>
    %25 = vector.extract_strided_slice %11 {offsets = [72, 0], sizes = [18, 64], strides = [1, 1]} : vector<216x64xbf16> to vector<18x64xbf16>
    %c192 = arith.constant 192 : index
    %c0_17 = arith.constant 0 : index
    %26 = vector.load %arg3[%c192, %c0_17] : memref<576x64xbf16, #tpu.memory_space<vmem>>, vector<64x64xbf16>
    %cst_18 = arith.constant dense<0.000000e+00> : vector<18x64xf32>
    %27 = tpu.matmul %25, %26, %cst_18 {dimension_numbers = #tpu.dot_dimension_numbers<[1], [0], [0], [1], [0, 0, 1, 1], [], []>} : vector<18x64xbf16>, vector<64x64xbf16>, vector<18x64xf32> -> vector<18x64xf32>
    %28 = arith.addf %24, %27 : vector<18x64xf32>
    %29 = vector.extract_strided_slice %11 {offsets = [96, 0], sizes = [18, 64], strides = [1, 1]} : vector<216x64xbf16> to vector<18x64xbf16>
    %c256 = arith.constant 256 : index
    %c0_19 = arith.constant 0 : index
    %30 = vector.load %arg3[%c256, %c0_19] : memref<576x64xbf16, #tpu.memory_space<vmem>>, vector<64x64xbf16>
    %cst_20 = arith.constant dense<0.000000e+00> : vector<18x64xf32>
    %31 = tpu.matmul %29, %30, %cst_20 {dimension_numbers = #tpu.dot_dimension_numbers<[1], [0], [0], [1], [0, 0, 1, 1], [], []>} : vector<18x64xbf16>, vector<64x64xbf16>, vector<18x64xf32> -> vector<18x64xf32>
    %32 = arith.addf %28, %31 : vector<18x64xf32>
    %33 = vector.extract_strided_slice %11 {offsets = [120, 0], sizes = [18, 64], strides = [1, 1]} : vector<216x64xbf16> to vector<18x64xbf16>
    %c320 = arith.constant 320 : index
    %c0_21 = arith.constant 0 : index
    %34 = vector.load %arg3[%c320, %c0_21] : memref<576x64xbf16, #tpu.memory_space<vmem>>, vector<64x64xbf16>
    %cst_22 = arith.constant dense<0.000000e+00> : vector<18x64xf32>
    %35 = tpu.matmul %33, %34, %cst_22 {dimension_numbers = #tpu.dot_dimension_numbers<[1], [0], [0], [1], [0, 0, 1, 1], [], []>} : vector<18x64xbf16>, vector<64x64xbf16>, vector<18x64xf32> -> vector<18x64xf32>
    %36 = arith.addf %32, %35 : vector<18x64xf32>
    %37 = vector.extract_strided_slice %11 {offsets = [144, 0], sizes = [18, 64], strides = [1, 1]} : vector<216x64xbf16> to vector<18x64xbf16>
    %c384 = arith.constant 384 : index
    %c0_23 = arith.constant 0 : index
    %38 = vector.load %arg3[%c384, %c0_23] : memref<576x64xbf16, #tpu.memory_space<vmem>>, vector<64x64xbf16>
    %cst_24 = arith.constant dense<0.000000e+00> : vector<18x64xf32>
    %39 = tpu.matmul %37, %38, %cst_24 {dimension_numbers = #tpu.dot_dimension_numbers<[1], [0], [0], [1], [0, 0, 1, 1], [], []>} : vector<18x64xbf16>, vector<64x64xbf16>, vector<18x64xf32> -> vector<18x64xf32>
    %40 = arith.addf %36, %39 : vector<18x64xf32>
    %41 = vector.extract_strided_slice %11 {offsets = [168, 0], sizes = [18, 64], strides = [1, 1]} : vector<216x64xbf16> to vector<18x64xbf16>
    %c448 = arith.constant 448 : index
    %c0_25 = arith.constant 0 : index
    %42 = vector.load %arg3[%c448, %c0_25] : memref<576x64xbf16, #tpu.memory_space<vmem>>, vector<64x64xbf16>
    %cst_26 = arith.constant dense<0.000000e+00> : vector<18x64xf32>
    %43 = tpu.matmul %41, %42, %cst_26 {dimension_numbers = #tpu.dot_dimension_numbers<[1], [0], [0], [1], [0, 0, 1, 1], [], []>} : vector<18x64xbf16>, vector<64x64xbf16>, vector<18x64xf32> -> vector<18x64xf32>
    %44 = arith.addf %40, %43 : vector<18x64xf32>
    %45 = vector.extract_strided_slice %11 {offsets = [192, 0], sizes = [18, 64], strides = [1, 1]} : vector<216x64xbf16> to vector<18x64xbf16>
    %c512 = arith.constant 512 : index
    %c0_27 = arith.constant 0 : index
    %46 = vector.load %arg3[%c512, %c0_27] : memref<576x64xbf16, #tpu.memory_space<vmem>>, vector<64x64xbf16>
    %cst_28 = arith.constant dense<0.000000e+00> : vector<18x64xf32>
    %47 = tpu.matmul %45, %46, %cst_28 {dimension_numbers = #tpu.dot_dimension_numbers<[1], [0], [0], [1], [0, 0, 1, 1], [], []>} : vector<18x64xbf16>, vector<64x64xbf16>, vector<18x64xf32> -> vector<18x64xf32>
    %48 = arith.addf %44, %47 : vector<18x64xf32>
    %c1 = arith.constant 1 : index
    %c0_29 = arith.constant 0 : index
    %49 = vector.load %arg6[%c1, %c0_29] : memref<8x64xf32, #tpu.memory_space<vmem>>, vector<1x64xf32>
    %50 = vector.broadcast %49 : vector<1x64xf32> to vector<18x64xf32>
    %51 = arith.addf %48, %50 : vector<18x64xf32>
    %cst_30 = arith.constant 0.000000e+00 : f32
    %52 = vector.broadcast %cst_30 : f32 to vector<18x64xf32>
    %53 = arith.maximumf %51, %52 : vector<18x64xf32>
    %54 = arith.truncf %53 : vector<18x64xf32> to vector<18x64xbf16>
    %c0_31 = arith.constant 0 : index
    %c0_32 = arith.constant 0 : index
    %55 = vector.load %arg4[%c0_31, %c0_32] : memref<216x18xbf16, #tpu.memory_space<vmem>>, vector<216x18xbf16>
    %cst_33 = arith.constant dense<0.000000e+00> : vector<216x64xf32>
    %56 = tpu.matmul %55, %54, %cst_33 {dimension_numbers = #tpu.dot_dimension_numbers<[1], [0], [0], [1], [0, 0, 1, 1], [], []>} : vector<216x18xbf16>, vector<18x64xbf16>, vector<216x64xf32> -> vector<216x64xf32>
    %57 = arith.truncf %56 : vector<216x64xf32> to vector<216x64xbf16>
    %cst_34 = arith.constant 0.000000e+00 : f32
    %58 = vector.broadcast %cst_34 : f32 to vector<18x64xf32>
    %59 = vector.extract_strided_slice %57 {offsets = [0, 0], sizes = [18, 64], strides = [1, 1]} : vector<216x64xbf16> to vector<18x64xbf16>
    %c0_35 = arith.constant 0 : index
    %c0_36 = arith.constant 0 : index
    %60 = vector.load %arg5[%c0_35, %c0_36] : memref<3456x64xbf16, #tpu.memory_space<vmem>>, vector<64x64xbf16>
    %cst_37 = arith.constant dense<0.000000e+00> : vector<18x64xf32>
    %61 = tpu.matmul %59, %60, %cst_37 {dimension_numbers = #tpu.dot_dimension_numbers<[1], [0], [0], [1], [0, 0, 1, 1], [], []>} : vector<18x64xbf16>, vector<64x64xbf16>, vector<18x64xf32> -> vector<18x64xf32>
    %62 = arith.addf %58, %61 : vector<18x64xf32>
    %63 = vector.extract_strided_slice %57 {offsets = [24, 0], sizes = [18, 64], strides = [1, 1]} : vector<216x64xbf16> to vector<18x64xbf16>
    %c64_38 = arith.constant 64 : index
    %c0_39 = arith.constant 0 : index
    %64 = vector.load %arg5[%c64_38, %c0_39] : memref<3456x64xbf16, #tpu.memory_space<vmem>>, vector<64x64xbf16>
    %cst_40 = arith.constant dense<0.000000e+00> : vector<18x64xf32>
    %65 = tpu.matmul %63, %64, %cst_40 {dimension_numbers = #tpu.dot_dimension_numbers<[1], [0], [0], [1], [0, 0, 1, 1], [], []>} : vector<18x64xbf16>, vector<64x64xbf16>, vector<18x64xf32> -> vector<18x64xf32>
    %66 = arith.addf %62, %65 : vector<18x64xf32>
    %67 = vector.extract_strided_slice %57 {offsets = [48, 0], sizes = [18, 64], strides = [1, 1]} : vector<216x64xbf16> to vector<18x64xbf16>
    %c128_41 = arith.constant 128 : index
    %c0_42 = arith.constant 0 : index
    %68 = vector.load %arg5[%c128_41, %c0_42] : memref<3456x64xbf16, #tpu.memory_space<vmem>>, vector<64x64xbf16>
    %cst_43 = arith.constant dense<0.000000e+00> : vector<18x64xf32>
    %69 = tpu.matmul %67, %68, %cst_43 {dimension_numbers = #tpu.dot_dimension_numbers<[1], [0], [0], [1], [0, 0, 1, 1], [], []>} : vector<18x64xbf16>, vector<64x64xbf16>, vector<18x64xf32> -> vector<18x64xf32>
    %70 = arith.addf %66, %69 : vector<18x64xf32>
    %71 = vector.extract_strided_slice %57 {offsets = [72, 0], sizes = [18, 64], strides = [1, 1]} : vector<216x64xbf16> to vector<18x64xbf16>
    %c192_44 = arith.constant 192 : index
    %c0_45 = arith.constant 0 : index
    %72 = vector.load %arg5[%c192_44, %c0_45] : memref<3456x64xbf16, #tpu.memory_space<vmem>>, vector<64x64xbf16>
    %cst_46 = arith.constant dense<0.000000e+00> : vector<18x64xf32>
    %73 = tpu.matmul %71, %72, %cst_46 {dimension_numbers = #tpu.dot_dimension_numbers<[1], [0], [0], [1], [0, 0, 1, 1], [], []>} : vector<18x64xbf16>, vector<64x64xbf16>, vector<18x64xf32> -> vector<18x64xf32>
    %74 = arith.addf %70, %73 : vector<18x64xf32>
    %75 = vector.extract_strided_slice %57 {offsets = [96, 0], sizes = [18, 64], strides = [1, 1]} : vector<216x64xbf16> to vector<18x64xbf16>
    %c256_47 = arith.constant 256 : index
    %c0_48 = arith.constant 0 : index
    %76 = vector.load %arg5[%c256_47, %c0_48] : memref<3456x64xbf16, #tpu.memory_space<vmem>>, vector<64x64xbf16>
    %cst_49 = arith.constant dense<0.000000e+00> : vector<18x64xf32>
    %77 = tpu.matmul %75, %76, %cst_49 {dimension_numbers = #tpu.dot_dimension_numbers<[1], [0], [0], [1], [0, 0, 1, 1], [], []>} : vector<18x64xbf16>, vector<64x64xbf16>, vector<18x64xf32> -> vector<18x64xf32>
    %78 = arith.addf %74, %77 : vector<18x64xf32>
    %79 = vector.extract_strided_slice %57 {offsets = [120, 0], sizes = [18, 64], strides = [1, 1]} : vector<216x64xbf16> to vector<18x64xbf16>
    %c320_50 = arith.constant 320 : index
    %c0_51 = arith.constant 0 : index
    %80 = vector.load %arg5[%c320_50, %c0_51] : memref<3456x64xbf16, #tpu.memory_space<vmem>>, vector<64x64xbf16>
    %cst_52 = arith.constant dense<0.000000e+00> : vector<18x64xf32>
    %81 = tpu.matmul %79, %80, %cst_52 {dimension_numbers = #tpu.dot_dimension_numbers<[1], [0], [0], [1], [0, 0, 1, 1], [], []>} : vector<18x64xbf16>, vector<64x64xbf16>, vector<18x64xf32> -> vector<18x64xf32>
    %82 = arith.addf %78, %81 : vector<18x64xf32>
    %83 = vector.extract_strided_slice %57 {offsets = [144, 0], sizes = [18, 64], strides = [1, 1]} : vector<216x64xbf16> to vector<18x64xbf16>
    %c384_53 = arith.constant 384 : index
    %c0_54 = arith.constant 0 : index
    %84 = vector.load %arg5[%c384_53, %c0_54] : memref<3456x64xbf16, #tpu.memory_space<vmem>>, vector<64x64xbf16>
    %cst_55 = arith.constant dense<0.000000e+00> : vector<18x64xf32>
    %85 = tpu.matmul %83, %84, %cst_55 {dimension_numbers = #tpu.dot_dimension_numbers<[1], [0], [0], [1], [0, 0, 1, 1], [], []>} : vector<18x64xbf16>, vector<64x64xbf16>, vector<18x64xf32> -> vector<18x64xf32>
    %86 = arith.addf %82, %85 : vector<18x64xf32>
    %87 = vector.extract_strided_slice %57 {offsets = [168, 0], sizes = [18, 64], strides = [1, 1]} : vector<216x64xbf16> to vector<18x64xbf16>
    %c448_56 = arith.constant 448 : index
    %c0_57 = arith.constant 0 : index
    %88 = vector.load %arg5[%c448_56, %c0_57] : memref<3456x64xbf16, #tpu.memory_space<vmem>>, vector<64x64xbf16>
    %cst_58 = arith.constant dense<0.000000e+00> : vector<18x64xf32>
    %89 = tpu.matmul %87, %88, %cst_58 {dimension_numbers = #tpu.dot_dimension_numbers<[1], [0], [0], [1], [0, 0, 1, 1], [], []>} : vector<18x64xbf16>, vector<64x64xbf16>, vector<18x64xf32> -> vector<18x64xf32>
    %90 = arith.addf %86, %89 : vector<18x64xf32>
    %91 = vector.extract_strided_slice %57 {offsets = [192, 0], sizes = [18, 64], strides = [1, 1]} : vector<216x64xbf16> to vector<18x64xbf16>
    %c512_59 = arith.constant 512 : index
    %c0_60 = arith.constant 0 : index
    %92 = vector.load %arg5[%c512_59, %c0_60] : memref<3456x64xbf16, #tpu.memory_space<vmem>>, vector<64x64xbf16>
    %cst_61 = arith.constant dense<0.000000e+00> : vector<18x64xf32>
    %93 = tpu.matmul %91, %92, %cst_61 {dimension_numbers = #tpu.dot_dimension_numbers<[1], [0], [0], [1], [0, 0, 1, 1], [], []>} : vector<18x64xbf16>, vector<64x64xbf16>, vector<18x64xf32> -> vector<18x64xf32>
    %94 = arith.addf %90, %93 : vector<18x64xf32>
    %c2 = arith.constant 2 : index
    %c0_62 = arith.constant 0 : index
    %95 = vector.load %arg6[%c2, %c0_62] : memref<8x64xf32, #tpu.memory_space<vmem>>, vector<1x64xf32>
    %96 = vector.broadcast %95 : vector<1x64xf32> to vector<18x64xf32>
    %97 = arith.addf %94, %96 : vector<18x64xf32>
    %cst_63 = arith.constant 0.000000e+00 : f32
    %98 = vector.broadcast %cst_63 : f32 to vector<18x64xf32>
    %99 = arith.maximumf %97, %98 : vector<18x64xf32>
    %100 = arith.truncf %99 : vector<18x64xf32> to vector<18x64xbf16>
    %c0_64 = arith.constant 0 : index
    %c0_65 = arith.constant 0 : index
    %101 = vector.load %arg4[%c0_64, %c0_65] : memref<216x18xbf16, #tpu.memory_space<vmem>>, vector<216x18xbf16>
    %cst_66 = arith.constant dense<0.000000e+00> : vector<216x64xf32>
    %102 = tpu.matmul %101, %100, %cst_66 {dimension_numbers = #tpu.dot_dimension_numbers<[1], [0], [0], [1], [0, 0, 1, 1], [], []>} : vector<216x18xbf16>, vector<18x64xbf16>, vector<216x64xf32> -> vector<216x64xf32>
    %103 = arith.truncf %102 : vector<216x64xf32> to vector<216x64xbf16>
    %cst_67 = arith.constant 0.000000e+00 : f32
    %104 = vector.broadcast %cst_67 : f32 to vector<18x64xf32>
    %105 = vector.extract_strided_slice %103 {offsets = [0, 0], sizes = [18, 64], strides = [1, 1]} : vector<216x64xbf16> to vector<18x64xbf16>
    %c576 = arith.constant 576 : index
    %c0_68 = arith.constant 0 : index
    %106 = vector.load %arg5[%c576, %c0_68] : memref<3456x64xbf16, #tpu.memory_space<vmem>>, vector<64x64xbf16>
    %cst_69 = arith.constant dense<0.000000e+00> : vector<18x64xf32>
    %107 = tpu.matmul %105, %106, %cst_69 {dimension_numbers = #tpu.dot_dimension_numbers<[1], [0], [0], [1], [0, 0, 1, 1], [], []>} : vector<18x64xbf16>, vector<64x64xbf16>, vector<18x64xf32> -> vector<18x64xf32>
    %108 = arith.addf %104, %107 : vector<18x64xf32>
    %109 = vector.extract_strided_slice %103 {offsets = [24, 0], sizes = [18, 64], strides = [1, 1]} : vector<216x64xbf16> to vector<18x64xbf16>
    %c640 = arith.constant 640 : index
    %c0_70 = arith.constant 0 : index
    %110 = vector.load %arg5[%c640, %c0_70] : memref<3456x64xbf16, #tpu.memory_space<vmem>>, vector<64x64xbf16>
    %cst_71 = arith.constant dense<0.000000e+00> : vector<18x64xf32>
    %111 = tpu.matmul %109, %110, %cst_71 {dimension_numbers = #tpu.dot_dimension_numbers<[1], [0], [0], [1], [0, 0, 1, 1], [], []>} : vector<18x64xbf16>, vector<64x64xbf16>, vector<18x64xf32> -> vector<18x64xf32>
    %112 = arith.addf %108, %111 : vector<18x64xf32>
    %113 = vector.extract_strided_slice %103 {offsets = [48, 0], sizes = [18, 64], strides = [1, 1]} : vector<216x64xbf16> to vector<18x64xbf16>
    %c704 = arith.constant 704 : index
    %c0_72 = arith.constant 0 : index
    %114 = vector.load %arg5[%c704, %c0_72] : memref<3456x64xbf16, #tpu.memory_space<vmem>>, vector<64x64xbf16>
    %cst_73 = arith.constant dense<0.000000e+00> : vector<18x64xf32>
    %115 = tpu.matmul %113, %114, %cst_73 {dimension_numbers = #tpu.dot_dimension_numbers<[1], [0], [0], [1], [0, 0, 1, 1], [], []>} : vector<18x64xbf16>, vector<64x64xbf16>, vector<18x64xf32> -> vector<18x64xf32>
    %116 = arith.addf %112, %115 : vector<18x64xf32>
    %117 = vector.extract_strided_slice %103 {offsets = [72, 0], sizes = [18, 64], strides = [1, 1]} : vector<216x64xbf16> to vector<18x64xbf16>
    %c768 = arith.constant 768 : index
    %c0_74 = arith.constant 0 : index
    %118 = vector.load %arg5[%c768, %c0_74] : memref<3456x64xbf16, #tpu.memory_space<vmem>>, vector<64x64xbf16>
    %cst_75 = arith.constant dense<0.000000e+00> : vector<18x64xf32>
    %119 = tpu.matmul %117, %118, %cst_75 {dimension_numbers = #tpu.dot_dimension_numbers<[1], [0], [0], [1], [0, 0, 1, 1], [], []>} : vector<18x64xbf16>, vector<64x64xbf16>, vector<18x64xf32> -> vector<18x64xf32>
    %120 = arith.addf %116, %119 : vector<18x64xf32>
    %121 = vector.extract_strided_slice %103 {offsets = [96, 0], sizes = [18, 64], strides = [1, 1]} : vector<216x64xbf16> to vector<18x64xbf16>
    %c832 = arith.constant 832 : index
    %c0_76 = arith.constant 0 : index
    %122 = vector.load %arg5[%c832, %c0_76] : memref<3456x64xbf16, #tpu.memory_space<vmem>>, vector<64x64xbf16>
    %cst_77 = arith.constant dense<0.000000e+00> : vector<18x64xf32>
    %123 = tpu.matmul %121, %122, %cst_77 {dimension_numbers = #tpu.dot_dimension_numbers<[1], [0], [0], [1], [0, 0, 1, 1], [], []>} : vector<18x64xbf16>, vector<64x64xbf16>, vector<18x64xf32> -> vector<18x64xf32>
    %124 = arith.addf %120, %123 : vector<18x64xf32>
    %125 = vector.extract_strided_slice %103 {offsets = [120, 0], sizes = [18, 64], strides = [1, 1]} : vector<216x64xbf16> to vector<18x64xbf16>
    %c896 = arith.constant 896 : index
    %c0_78 = arith.constant 0 : index
    %126 = vector.load %arg5[%c896, %c0_78] : memref<3456x64xbf16, #tpu.memory_space<vmem>>, vector<64x64xbf16>
    %cst_79 = arith.constant dense<0.000000e+00> : vector<18x64xf32>
    %127 = tpu.matmul %125, %126, %cst_79 {dimension_numbers = #tpu.dot_dimension_numbers<[1], [0], [0], [1], [0, 0, 1, 1], [], []>} : vector<18x64xbf16>, vector<64x64xbf16>, vector<18x64xf32> -> vector<18x64xf32>
    %128 = arith.addf %124, %127 : vector<18x64xf32>
    %129 = vector.extract_strided_slice %103 {offsets = [144, 0], sizes = [18, 64], strides = [1, 1]} : vector<216x64xbf16> to vector<18x64xbf16>
    %c960 = arith.constant 960 : index
    %c0_80 = arith.constant 0 : index
    %130 = vector.load %arg5[%c960, %c0_80] : memref<3456x64xbf16, #tpu.memory_space<vmem>>, vector<64x64xbf16>
    %cst_81 = arith.constant dense<0.000000e+00> : vector<18x64xf32>
    %131 = tpu.matmul %129, %130, %cst_81 {dimension_numbers = #tpu.dot_dimension_numbers<[1], [0], [0], [1], [0, 0, 1, 1], [], []>} : vector<18x64xbf16>, vector<64x64xbf16>, vector<18x64xf32> -> vector<18x64xf32>
    %132 = arith.addf %128, %131 : vector<18x64xf32>
    %133 = vector.extract_strided_slice %103 {offsets = [168, 0], sizes = [18, 64], strides = [1, 1]} : vector<216x64xbf16> to vector<18x64xbf16>
    %c1024 = arith.constant 1024 : index
    %c0_82 = arith.constant 0 : index
    %134 = vector.load %arg5[%c1024, %c0_82] : memref<3456x64xbf16, #tpu.memory_space<vmem>>, vector<64x64xbf16>
    %cst_83 = arith.constant dense<0.000000e+00> : vector<18x64xf32>
    %135 = tpu.matmul %133, %134, %cst_83 {dimension_numbers = #tpu.dot_dimension_numbers<[1], [0], [0], [1], [0, 0, 1, 1], [], []>} : vector<18x64xbf16>, vector<64x64xbf16>, vector<18x64xf32> -> vector<18x64xf32>
    %136 = arith.addf %132, %135 : vector<18x64xf32>
    %137 = vector.extract_strided_slice %103 {offsets = [192, 0], sizes = [18, 64], strides = [1, 1]} : vector<216x64xbf16> to vector<18x64xbf16>
    %c1088 = arith.constant 1088 : index
    %c0_84 = arith.constant 0 : index
    %138 = vector.load %arg5[%c1088, %c0_84] : memref<3456x64xbf16, #tpu.memory_space<vmem>>, vector<64x64xbf16>
    %cst_85 = arith.constant dense<0.000000e+00> : vector<18x64xf32>
    %139 = tpu.matmul %137, %138, %cst_85 {dimension_numbers = #tpu.dot_dimension_numbers<[1], [0], [0], [1], [0, 0, 1, 1], [], []>} : vector<18x64xbf16>, vector<64x64xbf16>, vector<18x64xf32> -> vector<18x64xf32>
    %140 = arith.addf %136, %139 : vector<18x64xf32>
    %c3 = arith.constant 3 : index
    %c0_86 = arith.constant 0 : index
    %141 = vector.load %arg6[%c3, %c0_86] : memref<8x64xf32, #tpu.memory_space<vmem>>, vector<1x64xf32>
    %142 = vector.broadcast %141 : vector<1x64xf32> to vector<18x64xf32>
    %143 = arith.addf %140, %142 : vector<18x64xf32>
    %cst_87 = arith.constant 0.000000e+00 : f32
    %144 = vector.broadcast %cst_87 : f32 to vector<18x64xf32>
    %145 = arith.maximumf %143, %144 : vector<18x64xf32>
    %146 = arith.addf %53, %145 : vector<18x64xf32>
    %cst_88 = arith.constant 0.000000e+00 : f32
    %147 = vector.broadcast %cst_88 : f32 to vector<18x64xf32>
    %148 = arith.maximumf %146, %147 : vector<18x64xf32>
    %149 = arith.truncf %148 : vector<18x64xf32> to vector<18x64xbf16>
    %c0_89 = arith.constant 0 : index
    %c0_90 = arith.constant 0 : index
    %150 = vector.load %arg4[%c0_89, %c0_90] : memref<216x18xbf16, #tpu.memory_space<vmem>>, vector<216x18xbf16>
    %cst_91 = arith.constant dense<0.000000e+00> : vector<216x64xf32>
    %151 = tpu.matmul %150, %149, %cst_91 {dimension_numbers = #tpu.dot_dimension_numbers<[1], [0], [0], [1], [0, 0, 1, 1], [], []>} : vector<216x18xbf16>, vector<18x64xbf16>, vector<216x64xf32> -> vector<216x64xf32>
    %152 = arith.truncf %151 : vector<216x64xf32> to vector<216x64xbf16>
    %cst_92 = arith.constant 0.000000e+00 : f32
    %153 = vector.broadcast %cst_92 : f32 to vector<18x64xf32>
    %154 = vector.extract_strided_slice %152 {offsets = [0, 0], sizes = [18, 64], strides = [1, 1]} : vector<216x64xbf16> to vector<18x64xbf16>
    %c1152 = arith.constant 1152 : index
    %c0_93 = arith.constant 0 : index
    %155 = vector.load %arg5[%c1152, %c0_93] : memref<3456x64xbf16, #tpu.memory_space<vmem>>, vector<64x64xbf16>
    %cst_94 = arith.constant dense<0.000000e+00> : vector<18x64xf32>
    %156 = tpu.matmul %154, %155, %cst_94 {dimension_numbers = #tpu.dot_dimension_numbers<[1], [0], [0], [1], [0, 0, 1, 1], [], []>} : vector<18x64xbf16>, vector<64x64xbf16>, vector<18x64xf32> -> vector<18x64xf32>
    %157 = arith.addf %153, %156 : vector<18x64xf32>
    %158 = vector.extract_strided_slice %152 {offsets = [24, 0], sizes = [18, 64], strides = [1, 1]} : vector<216x64xbf16> to vector<18x64xbf16>
    %c1216 = arith.constant 1216 : index
    %c0_95 = arith.constant 0 : index
    %159 = vector.load %arg5[%c1216, %c0_95] : memref<3456x64xbf16, #tpu.memory_space<vmem>>, vector<64x64xbf16>
    %cst_96 = arith.constant dense<0.000000e+00> : vector<18x64xf32>
    %160 = tpu.matmul %158, %159, %cst_96 {dimension_numbers = #tpu.dot_dimension_numbers<[1], [0], [0], [1], [0, 0, 1, 1], [], []>} : vector<18x64xbf16>, vector<64x64xbf16>, vector<18x64xf32> -> vector<18x64xf32>
    %161 = arith.addf %157, %160 : vector<18x64xf32>
    %162 = vector.extract_strided_slice %152 {offsets = [48, 0], sizes = [18, 64], strides = [1, 1]} : vector<216x64xbf16> to vector<18x64xbf16>
    %c1280 = arith.constant 1280 : index
    %c0_97 = arith.constant 0 : index
    %163 = vector.load %arg5[%c1280, %c0_97] : memref<3456x64xbf16, #tpu.memory_space<vmem>>, vector<64x64xbf16>
    %cst_98 = arith.constant dense<0.000000e+00> : vector<18x64xf32>
    %164 = tpu.matmul %162, %163, %cst_98 {dimension_numbers = #tpu.dot_dimension_numbers<[1], [0], [0], [1], [0, 0, 1, 1], [], []>} : vector<18x64xbf16>, vector<64x64xbf16>, vector<18x64xf32> -> vector<18x64xf32>
    %165 = arith.addf %161, %164 : vector<18x64xf32>
    %166 = vector.extract_strided_slice %152 {offsets = [72, 0], sizes = [18, 64], strides = [1, 1]} : vector<216x64xbf16> to vector<18x64xbf16>
    %c1344 = arith.constant 1344 : index
    %c0_99 = arith.constant 0 : index
    %167 = vector.load %arg5[%c1344, %c0_99] : memref<3456x64xbf16, #tpu.memory_space<vmem>>, vector<64x64xbf16>
    %cst_100 = arith.constant dense<0.000000e+00> : vector<18x64xf32>
    %168 = tpu.matmul %166, %167, %cst_100 {dimension_numbers = #tpu.dot_dimension_numbers<[1], [0], [0], [1], [0, 0, 1, 1], [], []>} : vector<18x64xbf16>, vector<64x64xbf16>, vector<18x64xf32> -> vector<18x64xf32>
    %169 = arith.addf %165, %168 : vector<18x64xf32>
    %170 = vector.extract_strided_slice %152 {offsets = [96, 0], sizes = [18, 64], strides = [1, 1]} : vector<216x64xbf16> to vector<18x64xbf16>
    %c1408 = arith.constant 1408 : index
    %c0_101 = arith.constant 0 : index
    %171 = vector.load %arg5[%c1408, %c0_101] : memref<3456x64xbf16, #tpu.memory_space<vmem>>, vector<64x64xbf16>
    %cst_102 = arith.constant dense<0.000000e+00> : vector<18x64xf32>
    %172 = tpu.matmul %170, %171, %cst_102 {dimension_numbers = #tpu.dot_dimension_numbers<[1], [0], [0], [1], [0, 0, 1, 1], [], []>} : vector<18x64xbf16>, vector<64x64xbf16>, vector<18x64xf32> -> vector<18x64xf32>
    %173 = arith.addf %169, %172 : vector<18x64xf32>
    %174 = vector.extract_strided_slice %152 {offsets = [120, 0], sizes = [18, 64], strides = [1, 1]} : vector<216x64xbf16> to vector<18x64xbf16>
    %c1472 = arith.constant 1472 : index
    %c0_103 = arith.constant 0 : index
    %175 = vector.load %arg5[%c1472, %c0_103] : memref<3456x64xbf16, #tpu.memory_space<vmem>>, vector<64x64xbf16>
    %cst_104 = arith.constant dense<0.000000e+00> : vector<18x64xf32>
    %176 = tpu.matmul %174, %175, %cst_104 {dimension_numbers = #tpu.dot_dimension_numbers<[1], [0], [0], [1], [0, 0, 1, 1], [], []>} : vector<18x64xbf16>, vector<64x64xbf16>, vector<18x64xf32> -> vector<18x64xf32>
    %177 = arith.addf %173, %176 : vector<18x64xf32>
    %178 = vector.extract_strided_slice %152 {offsets = [144, 0], sizes = [18, 64], strides = [1, 1]} : vector<216x64xbf16> to vector<18x64xbf16>
    %c1536 = arith.constant 1536 : index
    %c0_105 = arith.constant 0 : index
    %179 = vector.load %arg5[%c1536, %c0_105] : memref<3456x64xbf16, #tpu.memory_space<vmem>>, vector<64x64xbf16>
    %cst_106 = arith.constant dense<0.000000e+00> : vector<18x64xf32>
    %180 = tpu.matmul %178, %179, %cst_106 {dimension_numbers = #tpu.dot_dimension_numbers<[1], [0], [0], [1], [0, 0, 1, 1], [], []>} : vector<18x64xbf16>, vector<64x64xbf16>, vector<18x64xf32> -> vector<18x64xf32>
    %181 = arith.addf %177, %180 : vector<18x64xf32>
    %182 = vector.extract_strided_slice %152 {offsets = [168, 0], sizes = [18, 64], strides = [1, 1]} : vector<216x64xbf16> to vector<18x64xbf16>
    %c1600 = arith.constant 1600 : index
    %c0_107 = arith.constant 0 : index
    %183 = vector.load %arg5[%c1600, %c0_107] : memref<3456x64xbf16, #tpu.memory_space<vmem>>, vector<64x64xbf16>
    %cst_108 = arith.constant dense<0.000000e+00> : vector<18x64xf32>
    %184 = tpu.matmul %182, %183, %cst_108 {dimension_numbers = #tpu.dot_dimension_numbers<[1], [0], [0], [1], [0, 0, 1, 1], [], []>} : vector<18x64xbf16>, vector<64x64xbf16>, vector<18x64xf32> -> vector<18x64xf32>
    %185 = arith.addf %181, %184 : vector<18x64xf32>
    %186 = vector.extract_strided_slice %152 {offsets = [192, 0], sizes = [18, 64], strides = [1, 1]} : vector<216x64xbf16> to vector<18x64xbf16>
    %c1664 = arith.constant 1664 : index
    %c0_109 = arith.constant 0 : index
    %187 = vector.load %arg5[%c1664, %c0_109] : memref<3456x64xbf16, #tpu.memory_space<vmem>>, vector<64x64xbf16>
    %cst_110 = arith.constant dense<0.000000e+00> : vector<18x64xf32>
    %188 = tpu.matmul %186, %187, %cst_110 {dimension_numbers = #tpu.dot_dimension_numbers<[1], [0], [0], [1], [0, 0, 1, 1], [], []>} : vector<18x64xbf16>, vector<64x64xbf16>, vector<18x64xf32> -> vector<18x64xf32>
    %189 = arith.addf %185, %188 : vector<18x64xf32>
    %c4 = arith.constant 4 : index
    %c0_111 = arith.constant 0 : index
    %190 = vector.load %arg6[%c4, %c0_111] : memref<8x64xf32, #tpu.memory_space<vmem>>, vector<1x64xf32>
    %191 = vector.broadcast %190 : vector<1x64xf32> to vector<18x64xf32>
    %192 = arith.addf %189, %191 : vector<18x64xf32>
    %cst_112 = arith.constant 0.000000e+00 : f32
    %193 = vector.broadcast %cst_112 : f32 to vector<18x64xf32>
    %194 = arith.maximumf %192, %193 : vector<18x64xf32>
    %195 = arith.truncf %194 : vector<18x64xf32> to vector<18x64xbf16>
    %c0_113 = arith.constant 0 : index
    %c0_114 = arith.constant 0 : index
    %196 = vector.load %arg4[%c0_113, %c0_114] : memref<216x18xbf16, #tpu.memory_space<vmem>>, vector<216x18xbf16>
    %cst_115 = arith.constant dense<0.000000e+00> : vector<216x64xf32>
    %197 = tpu.matmul %196, %195, %cst_115 {dimension_numbers = #tpu.dot_dimension_numbers<[1], [0], [0], [1], [0, 0, 1, 1], [], []>} : vector<216x18xbf16>, vector<18x64xbf16>, vector<216x64xf32> -> vector<216x64xf32>
    %198 = arith.truncf %197 : vector<216x64xf32> to vector<216x64xbf16>
    %cst_116 = arith.constant 0.000000e+00 : f32
    %199 = vector.broadcast %cst_116 : f32 to vector<18x64xf32>
    %200 = vector.extract_strided_slice %198 {offsets = [0, 0], sizes = [18, 64], strides = [1, 1]} : vector<216x64xbf16> to vector<18x64xbf16>
    %c1728 = arith.constant 1728 : index
    %c0_117 = arith.constant 0 : index
    %201 = vector.load %arg5[%c1728, %c0_117] : memref<3456x64xbf16, #tpu.memory_space<vmem>>, vector<64x64xbf16>
    %cst_118 = arith.constant dense<0.000000e+00> : vector<18x64xf32>
    %202 = tpu.matmul %200, %201, %cst_118 {dimension_numbers = #tpu.dot_dimension_numbers<[1], [0], [0], [1], [0, 0, 1, 1], [], []>} : vector<18x64xbf16>, vector<64x64xbf16>, vector<18x64xf32> -> vector<18x64xf32>
    %203 = arith.addf %199, %202 : vector<18x64xf32>
    %204 = vector.extract_strided_slice %198 {offsets = [24, 0], sizes = [18, 64], strides = [1, 1]} : vector<216x64xbf16> to vector<18x64xbf16>
    %c1792 = arith.constant 1792 : index
    %c0_119 = arith.constant 0 : index
    %205 = vector.load %arg5[%c1792, %c0_119] : memref<3456x64xbf16, #tpu.memory_space<vmem>>, vector<64x64xbf16>
    %cst_120 = arith.constant dense<0.000000e+00> : vector<18x64xf32>
    %206 = tpu.matmul %204, %205, %cst_120 {dimension_numbers = #tpu.dot_dimension_numbers<[1], [0], [0], [1], [0, 0, 1, 1], [], []>} : vector<18x64xbf16>, vector<64x64xbf16>, vector<18x64xf32> -> vector<18x64xf32>
    %207 = arith.addf %203, %206 : vector<18x64xf32>
    %208 = vector.extract_strided_slice %198 {offsets = [48, 0], sizes = [18, 64], strides = [1, 1]} : vector<216x64xbf16> to vector<18x64xbf16>
    %c1856 = arith.constant 1856 : index
    %c0_121 = arith.constant 0 : index
    %209 = vector.load %arg5[%c1856, %c0_121] : memref<3456x64xbf16, #tpu.memory_space<vmem>>, vector<64x64xbf16>
    %cst_122 = arith.constant dense<0.000000e+00> : vector<18x64xf32>
    %210 = tpu.matmul %208, %209, %cst_122 {dimension_numbers = #tpu.dot_dimension_numbers<[1], [0], [0], [1], [0, 0, 1, 1], [], []>} : vector<18x64xbf16>, vector<64x64xbf16>, vector<18x64xf32> -> vector<18x64xf32>
    %211 = arith.addf %207, %210 : vector<18x64xf32>
    %212 = vector.extract_strided_slice %198 {offsets = [72, 0], sizes = [18, 64], strides = [1, 1]} : vector<216x64xbf16> to vector<18x64xbf16>
    %c1920 = arith.constant 1920 : index
    %c0_123 = arith.constant 0 : index
    %213 = vector.load %arg5[%c1920, %c0_123] : memref<3456x64xbf16, #tpu.memory_space<vmem>>, vector<64x64xbf16>
    %cst_124 = arith.constant dense<0.000000e+00> : vector<18x64xf32>
    %214 = tpu.matmul %212, %213, %cst_124 {dimension_numbers = #tpu.dot_dimension_numbers<[1], [0], [0], [1], [0, 0, 1, 1], [], []>} : vector<18x64xbf16>, vector<64x64xbf16>, vector<18x64xf32> -> vector<18x64xf32>
    %215 = arith.addf %211, %214 : vector<18x64xf32>
    %216 = vector.extract_strided_slice %198 {offsets = [96, 0], sizes = [18, 64], strides = [1, 1]} : vector<216x64xbf16> to vector<18x64xbf16>
    %c1984 = arith.constant 1984 : index
    %c0_125 = arith.constant 0 : index
    %217 = vector.load %arg5[%c1984, %c0_125] : memref<3456x64xbf16, #tpu.memory_space<vmem>>, vector<64x64xbf16>
    %cst_126 = arith.constant dense<0.000000e+00> : vector<18x64xf32>
    %218 = tpu.matmul %216, %217, %cst_126 {dimension_numbers = #tpu.dot_dimension_numbers<[1], [0], [0], [1], [0, 0, 1, 1], [], []>} : vector<18x64xbf16>, vector<64x64xbf16>, vector<18x64xf32> -> vector<18x64xf32>
    %219 = arith.addf %215, %218 : vector<18x64xf32>
    %220 = vector.extract_strided_slice %198 {offsets = [120, 0], sizes = [18, 64], strides = [1, 1]} : vector<216x64xbf16> to vector<18x64xbf16>
    %c2048 = arith.constant 2048 : index
    %c0_127 = arith.constant 0 : index
    %221 = vector.load %arg5[%c2048, %c0_127] : memref<3456x64xbf16, #tpu.memory_space<vmem>>, vector<64x64xbf16>
    %cst_128 = arith.constant dense<0.000000e+00> : vector<18x64xf32>
    %222 = tpu.matmul %220, %221, %cst_128 {dimension_numbers = #tpu.dot_dimension_numbers<[1], [0], [0], [1], [0, 0, 1, 1], [], []>} : vector<18x64xbf16>, vector<64x64xbf16>, vector<18x64xf32> -> vector<18x64xf32>
    %223 = arith.addf %219, %222 : vector<18x64xf32>
    %224 = vector.extract_strided_slice %198 {offsets = [144, 0], sizes = [18, 64], strides = [1, 1]} : vector<216x64xbf16> to vector<18x64xbf16>
    %c2112 = arith.constant 2112 : index
    %c0_129 = arith.constant 0 : index
    %225 = vector.load %arg5[%c2112, %c0_129] : memref<3456x64xbf16, #tpu.memory_space<vmem>>, vector<64x64xbf16>
    %cst_130 = arith.constant dense<0.000000e+00> : vector<18x64xf32>
    %226 = tpu.matmul %224, %225, %cst_130 {dimension_numbers = #tpu.dot_dimension_numbers<[1], [0], [0], [1], [0, 0, 1, 1], [], []>} : vector<18x64xbf16>, vector<64x64xbf16>, vector<18x64xf32> -> vector<18x64xf32>
    %227 = arith.addf %223, %226 : vector<18x64xf32>
    %228 = vector.extract_strided_slice %198 {offsets = [168, 0], sizes = [18, 64], strides = [1, 1]} : vector<216x64xbf16> to vector<18x64xbf16>
    %c2176 = arith.constant 2176 : index
    %c0_131 = arith.constant 0 : index
    %229 = vector.load %arg5[%c2176, %c0_131] : memref<3456x64xbf16, #tpu.memory_space<vmem>>, vector<64x64xbf16>
    %cst_132 = arith.constant dense<0.000000e+00> : vector<18x64xf32>
    %230 = tpu.matmul %228, %229, %cst_132 {dimension_numbers = #tpu.dot_dimension_numbers<[1], [0], [0], [1], [0, 0, 1, 1], [], []>} : vector<18x64xbf16>, vector<64x64xbf16>, vector<18x64xf32> -> vector<18x64xf32>
    %231 = arith.addf %227, %230 : vector<18x64xf32>
    %232 = vector.extract_strided_slice %198 {offsets = [192, 0], sizes = [18, 64], strides = [1, 1]} : vector<216x64xbf16> to vector<18x64xbf16>
    %c2240 = arith.constant 2240 : index
    %c0_133 = arith.constant 0 : index
    %233 = vector.load %arg5[%c2240, %c0_133] : memref<3456x64xbf16, #tpu.memory_space<vmem>>, vector<64x64xbf16>
    %cst_134 = arith.constant dense<0.000000e+00> : vector<18x64xf32>
    %234 = tpu.matmul %232, %233, %cst_134 {dimension_numbers = #tpu.dot_dimension_numbers<[1], [0], [0], [1], [0, 0, 1, 1], [], []>} : vector<18x64xbf16>, vector<64x64xbf16>, vector<18x64xf32> -> vector<18x64xf32>
    %235 = arith.addf %231, %234 : vector<18x64xf32>
    %c5 = arith.constant 5 : index
    %c0_135 = arith.constant 0 : index
    %236 = vector.load %arg6[%c5, %c0_135] : memref<8x64xf32, #tpu.memory_space<vmem>>, vector<1x64xf32>
    %237 = vector.broadcast %236 : vector<1x64xf32> to vector<18x64xf32>
    %238 = arith.addf %235, %237 : vector<18x64xf32>
    %cst_136 = arith.constant 0.000000e+00 : f32
    %239 = vector.broadcast %cst_136 : f32 to vector<18x64xf32>
    %240 = arith.maximumf %238, %239 : vector<18x64xf32>
    %241 = arith.addf %148, %240 : vector<18x64xf32>
    %cst_137 = arith.constant 0.000000e+00 : f32
    %242 = vector.broadcast %cst_137 : f32 to vector<18x64xf32>
    %243 = arith.maximumf %241, %242 : vector<18x64xf32>
    %244 = arith.truncf %243 : vector<18x64xf32> to vector<18x64xbf16>
    %c0_138 = arith.constant 0 : index
    %c0_139 = arith.constant 0 : index
    %245 = vector.load %arg4[%c0_138, %c0_139] : memref<216x18xbf16, #tpu.memory_space<vmem>>, vector<216x18xbf16>
    %cst_140 = arith.constant dense<0.000000e+00> : vector<216x64xf32>
    %246 = tpu.matmul %245, %244, %cst_140 {dimension_numbers = #tpu.dot_dimension_numbers<[1], [0], [0], [1], [0, 0, 1, 1], [], []>} : vector<216x18xbf16>, vector<18x64xbf16>, vector<216x64xf32> -> vector<216x64xf32>
    %247 = arith.truncf %246 : vector<216x64xf32> to vector<216x64xbf16>
    %cst_141 = arith.constant 0.000000e+00 : f32
    %248 = vector.broadcast %cst_141 : f32 to vector<18x64xf32>
    %249 = vector.extract_strided_slice %247 {offsets = [0, 0], sizes = [18, 64], strides = [1, 1]} : vector<216x64xbf16> to vector<18x64xbf16>
    %c2304 = arith.constant 2304 : index
    %c0_142 = arith.constant 0 : index
    %250 = vector.load %arg5[%c2304, %c0_142] : memref<3456x64xbf16, #tpu.memory_space<vmem>>, vector<64x64xbf16>
    %cst_143 = arith.constant dense<0.000000e+00> : vector<18x64xf32>
    %251 = tpu.matmul %249, %250, %cst_143 {dimension_numbers = #tpu.dot_dimension_numbers<[1], [0], [0], [1], [0, 0, 1, 1], [], []>} : vector<18x64xbf16>, vector<64x64xbf16>, vector<18x64xf32> -> vector<18x64xf32>
    %252 = arith.addf %248, %251 : vector<18x64xf32>
    %253 = vector.extract_strided_slice %247 {offsets = [24, 0], sizes = [18, 64], strides = [1, 1]} : vector<216x64xbf16> to vector<18x64xbf16>
    %c2368 = arith.constant 2368 : index
    %c0_144 = arith.constant 0 : index
    %254 = vector.load %arg5[%c2368, %c0_144] : memref<3456x64xbf16, #tpu.memory_space<vmem>>, vector<64x64xbf16>
    %cst_145 = arith.constant dense<0.000000e+00> : vector<18x64xf32>
    %255 = tpu.matmul %253, %254, %cst_145 {dimension_numbers = #tpu.dot_dimension_numbers<[1], [0], [0], [1], [0, 0, 1, 1], [], []>} : vector<18x64xbf16>, vector<64x64xbf16>, vector<18x64xf32> -> vector<18x64xf32>
    %256 = arith.addf %252, %255 : vector<18x64xf32>
    %257 = vector.extract_strided_slice %247 {offsets = [48, 0], sizes = [18, 64], strides = [1, 1]} : vector<216x64xbf16> to vector<18x64xbf16>
    %c2432 = arith.constant 2432 : index
    %c0_146 = arith.constant 0 : index
    %258 = vector.load %arg5[%c2432, %c0_146] : memref<3456x64xbf16, #tpu.memory_space<vmem>>, vector<64x64xbf16>
    %cst_147 = arith.constant dense<0.000000e+00> : vector<18x64xf32>
    %259 = tpu.matmul %257, %258, %cst_147 {dimension_numbers = #tpu.dot_dimension_numbers<[1], [0], [0], [1], [0, 0, 1, 1], [], []>} : vector<18x64xbf16>, vector<64x64xbf16>, vector<18x64xf32> -> vector<18x64xf32>
    %260 = arith.addf %256, %259 : vector<18x64xf32>
    %261 = vector.extract_strided_slice %247 {offsets = [72, 0], sizes = [18, 64], strides = [1, 1]} : vector<216x64xbf16> to vector<18x64xbf16>
    %c2496 = arith.constant 2496 : index
    %c0_148 = arith.constant 0 : index
    %262 = vector.load %arg5[%c2496, %c0_148] : memref<3456x64xbf16, #tpu.memory_space<vmem>>, vector<64x64xbf16>
    %cst_149 = arith.constant dense<0.000000e+00> : vector<18x64xf32>
    %263 = tpu.matmul %261, %262, %cst_149 {dimension_numbers = #tpu.dot_dimension_numbers<[1], [0], [0], [1], [0, 0, 1, 1], [], []>} : vector<18x64xbf16>, vector<64x64xbf16>, vector<18x64xf32> -> vector<18x64xf32>
    %264 = arith.addf %260, %263 : vector<18x64xf32>
    %265 = vector.extract_strided_slice %247 {offsets = [96, 0], sizes = [18, 64], strides = [1, 1]} : vector<216x64xbf16> to vector<18x64xbf16>
    %c2560 = arith.constant 2560 : index
    %c0_150 = arith.constant 0 : index
    %266 = vector.load %arg5[%c2560, %c0_150] : memref<3456x64xbf16, #tpu.memory_space<vmem>>, vector<64x64xbf16>
    %cst_151 = arith.constant dense<0.000000e+00> : vector<18x64xf32>
    %267 = tpu.matmul %265, %266, %cst_151 {dimension_numbers = #tpu.dot_dimension_numbers<[1], [0], [0], [1], [0, 0, 1, 1], [], []>} : vector<18x64xbf16>, vector<64x64xbf16>, vector<18x64xf32> -> vector<18x64xf32>
    %268 = arith.addf %264, %267 : vector<18x64xf32>
    %269 = vector.extract_strided_slice %247 {offsets = [120, 0], sizes = [18, 64], strides = [1, 1]} : vector<216x64xbf16> to vector<18x64xbf16>
    %c2624 = arith.constant 2624 : index
    %c0_152 = arith.constant 0 : index
    %270 = vector.load %arg5[%c2624, %c0_152] : memref<3456x64xbf16, #tpu.memory_space<vmem>>, vector<64x64xbf16>
    %cst_153 = arith.constant dense<0.000000e+00> : vector<18x64xf32>
    %271 = tpu.matmul %269, %270, %cst_153 {dimension_numbers = #tpu.dot_dimension_numbers<[1], [0], [0], [1], [0, 0, 1, 1], [], []>} : vector<18x64xbf16>, vector<64x64xbf16>, vector<18x64xf32> -> vector<18x64xf32>
    %272 = arith.addf %268, %271 : vector<18x64xf32>
    %273 = vector.extract_strided_slice %247 {offsets = [144, 0], sizes = [18, 64], strides = [1, 1]} : vector<216x64xbf16> to vector<18x64xbf16>
    %c2688 = arith.constant 2688 : index
    %c0_154 = arith.constant 0 : index
    %274 = vector.load %arg5[%c2688, %c0_154] : memref<3456x64xbf16, #tpu.memory_space<vmem>>, vector<64x64xbf16>
    %cst_155 = arith.constant dense<0.000000e+00> : vector<18x64xf32>
    %275 = tpu.matmul %273, %274, %cst_155 {dimension_numbers = #tpu.dot_dimension_numbers<[1], [0], [0], [1], [0, 0, 1, 1], [], []>} : vector<18x64xbf16>, vector<64x64xbf16>, vector<18x64xf32> -> vector<18x64xf32>
    %276 = arith.addf %272, %275 : vector<18x64xf32>
    %277 = vector.extract_strided_slice %247 {offsets = [168, 0], sizes = [18, 64], strides = [1, 1]} : vector<216x64xbf16> to vector<18x64xbf16>
    %c2752 = arith.constant 2752 : index
    %c0_156 = arith.constant 0 : index
    %278 = vector.load %arg5[%c2752, %c0_156] : memref<3456x64xbf16, #tpu.memory_space<vmem>>, vector<64x64xbf16>
    %cst_157 = arith.constant dense<0.000000e+00> : vector<18x64xf32>
    %279 = tpu.matmul %277, %278, %cst_157 {dimension_numbers = #tpu.dot_dimension_numbers<[1], [0], [0], [1], [0, 0, 1, 1], [], []>} : vector<18x64xbf16>, vector<64x64xbf16>, vector<18x64xf32> -> vector<18x64xf32>
    %280 = arith.addf %276, %279 : vector<18x64xf32>
    %281 = vector.extract_strided_slice %247 {offsets = [192, 0], sizes = [18, 64], strides = [1, 1]} : vector<216x64xbf16> to vector<18x64xbf16>
    %c2816 = arith.constant 2816 : index
    %c0_158 = arith.constant 0 : index
    %282 = vector.load %arg5[%c2816, %c0_158] : memref<3456x64xbf16, #tpu.memory_space<vmem>>, vector<64x64xbf16>
    %cst_159 = arith.constant dense<0.000000e+00> : vector<18x64xf32>
    %283 = tpu.matmul %281, %282, %cst_159 {dimension_numbers = #tpu.dot_dimension_numbers<[1], [0], [0], [1], [0, 0, 1, 1], [], []>} : vector<18x64xbf16>, vector<64x64xbf16>, vector<18x64xf32> -> vector<18x64xf32>
    %284 = arith.addf %280, %283 : vector<18x64xf32>
    %c6 = arith.constant 6 : index
    %c0_160 = arith.constant 0 : index
    %285 = vector.load %arg6[%c6, %c0_160] : memref<8x64xf32, #tpu.memory_space<vmem>>, vector<1x64xf32>
    %286 = vector.broadcast %285 : vector<1x64xf32> to vector<18x64xf32>
    %287 = arith.addf %284, %286 : vector<18x64xf32>
    %cst_161 = arith.constant 0.000000e+00 : f32
    %288 = vector.broadcast %cst_161 : f32 to vector<18x64xf32>
    %289 = arith.maximumf %287, %288 : vector<18x64xf32>
    %290 = arith.truncf %289 : vector<18x64xf32> to vector<18x64xbf16>
    %c0_162 = arith.constant 0 : index
    %c0_163 = arith.constant 0 : index
    %291 = vector.load %arg4[%c0_162, %c0_163] : memref<216x18xbf16, #tpu.memory_space<vmem>>, vector<216x18xbf16>
    %cst_164 = arith.constant dense<0.000000e+00> : vector<216x64xf32>
    %292 = tpu.matmul %291, %290, %cst_164 {dimension_numbers = #tpu.dot_dimension_numbers<[1], [0], [0], [1], [0, 0, 1, 1], [], []>} : vector<216x18xbf16>, vector<18x64xbf16>, vector<216x64xf32> -> vector<216x64xf32>
    %293 = arith.truncf %292 : vector<216x64xf32> to vector<216x64xbf16>
    %cst_165 = arith.constant 0.000000e+00 : f32
    %294 = vector.broadcast %cst_165 : f32 to vector<18x64xf32>
    %295 = vector.extract_strided_slice %293 {offsets = [0, 0], sizes = [18, 64], strides = [1, 1]} : vector<216x64xbf16> to vector<18x64xbf16>
    %c2880 = arith.constant 2880 : index
    %c0_166 = arith.constant 0 : index
    %296 = vector.load %arg5[%c2880, %c0_166] : memref<3456x64xbf16, #tpu.memory_space<vmem>>, vector<64x64xbf16>
    %cst_167 = arith.constant dense<0.000000e+00> : vector<18x64xf32>
    %297 = tpu.matmul %295, %296, %cst_167 {dimension_numbers = #tpu.dot_dimension_numbers<[1], [0], [0], [1], [0, 0, 1, 1], [], []>} : vector<18x64xbf16>, vector<64x64xbf16>, vector<18x64xf32> -> vector<18x64xf32>
    %298 = arith.addf %294, %297 : vector<18x64xf32>
    %299 = vector.extract_strided_slice %293 {offsets = [24, 0], sizes = [18, 64], strides = [1, 1]} : vector<216x64xbf16> to vector<18x64xbf16>
    %c2944 = arith.constant 2944 : index
    %c0_168 = arith.constant 0 : index
    %300 = vector.load %arg5[%c2944, %c0_168] : memref<3456x64xbf16, #tpu.memory_space<vmem>>, vector<64x64xbf16>
    %cst_169 = arith.constant dense<0.000000e+00> : vector<18x64xf32>
    %301 = tpu.matmul %299, %300, %cst_169 {dimension_numbers = #tpu.dot_dimension_numbers<[1], [0], [0], [1], [0, 0, 1, 1], [], []>} : vector<18x64xbf16>, vector<64x64xbf16>, vector<18x64xf32> -> vector<18x64xf32>
    %302 = arith.addf %298, %301 : vector<18x64xf32>
    %303 = vector.extract_strided_slice %293 {offsets = [48, 0], sizes = [18, 64], strides = [1, 1]} : vector<216x64xbf16> to vector<18x64xbf16>
    %c3008 = arith.constant 3008 : index
    %c0_170 = arith.constant 0 : index
    %304 = vector.load %arg5[%c3008, %c0_170] : memref<3456x64xbf16, #tpu.memory_space<vmem>>, vector<64x64xbf16>
    %cst_171 = arith.constant dense<0.000000e+00> : vector<18x64xf32>
    %305 = tpu.matmul %303, %304, %cst_171 {dimension_numbers = #tpu.dot_dimension_numbers<[1], [0], [0], [1], [0, 0, 1, 1], [], []>} : vector<18x64xbf16>, vector<64x64xbf16>, vector<18x64xf32> -> vector<18x64xf32>
    %306 = arith.addf %302, %305 : vector<18x64xf32>
    %307 = vector.extract_strided_slice %293 {offsets = [72, 0], sizes = [18, 64], strides = [1, 1]} : vector<216x64xbf16> to vector<18x64xbf16>
    %c3072 = arith.constant 3072 : index
    %c0_172 = arith.constant 0 : index
    %308 = vector.load %arg5[%c3072, %c0_172] : memref<3456x64xbf16, #tpu.memory_space<vmem>>, vector<64x64xbf16>
    %cst_173 = arith.constant dense<0.000000e+00> : vector<18x64xf32>
    %309 = tpu.matmul %307, %308, %cst_173 {dimension_numbers = #tpu.dot_dimension_numbers<[1], [0], [0], [1], [0, 0, 1, 1], [], []>} : vector<18x64xbf16>, vector<64x64xbf16>, vector<18x64xf32> -> vector<18x64xf32>
    %310 = arith.addf %306, %309 : vector<18x64xf32>
    %311 = vector.extract_strided_slice %293 {offsets = [96, 0], sizes = [18, 64], strides = [1, 1]} : vector<216x64xbf16> to vector<18x64xbf16>
    %c3136 = arith.constant 3136 : index
    %c0_174 = arith.constant 0 : index
    %312 = vector.load %arg5[%c3136, %c0_174] : memref<3456x64xbf16, #tpu.memory_space<vmem>>, vector<64x64xbf16>
    %cst_175 = arith.constant dense<0.000000e+00> : vector<18x64xf32>
    %313 = tpu.matmul %311, %312, %cst_175 {dimension_numbers = #tpu.dot_dimension_numbers<[1], [0], [0], [1], [0, 0, 1, 1], [], []>} : vector<18x64xbf16>, vector<64x64xbf16>, vector<18x64xf32> -> vector<18x64xf32>
    %314 = arith.addf %310, %313 : vector<18x64xf32>
    %315 = vector.extract_strided_slice %293 {offsets = [120, 0], sizes = [18, 64], strides = [1, 1]} : vector<216x64xbf16> to vector<18x64xbf16>
    %c3200 = arith.constant 3200 : index
    %c0_176 = arith.constant 0 : index
    %316 = vector.load %arg5[%c3200, %c0_176] : memref<3456x64xbf16, #tpu.memory_space<vmem>>, vector<64x64xbf16>
    %cst_177 = arith.constant dense<0.000000e+00> : vector<18x64xf32>
    %317 = tpu.matmul %315, %316, %cst_177 {dimension_numbers = #tpu.dot_dimension_numbers<[1], [0], [0], [1], [0, 0, 1, 1], [], []>} : vector<18x64xbf16>, vector<64x64xbf16>, vector<18x64xf32> -> vector<18x64xf32>
    %318 = arith.addf %314, %317 : vector<18x64xf32>
    %319 = vector.extract_strided_slice %293 {offsets = [144, 0], sizes = [18, 64], strides = [1, 1]} : vector<216x64xbf16> to vector<18x64xbf16>
    %c3264 = arith.constant 3264 : index
    %c0_178 = arith.constant 0 : index
    %320 = vector.load %arg5[%c3264, %c0_178] : memref<3456x64xbf16, #tpu.memory_space<vmem>>, vector<64x64xbf16>
    %cst_179 = arith.constant dense<0.000000e+00> : vector<18x64xf32>
    %321 = tpu.matmul %319, %320, %cst_179 {dimension_numbers = #tpu.dot_dimension_numbers<[1], [0], [0], [1], [0, 0, 1, 1], [], []>} : vector<18x64xbf16>, vector<64x64xbf16>, vector<18x64xf32> -> vector<18x64xf32>
    %322 = arith.addf %318, %321 : vector<18x64xf32>
    %323 = vector.extract_strided_slice %293 {offsets = [168, 0], sizes = [18, 64], strides = [1, 1]} : vector<216x64xbf16> to vector<18x64xbf16>
    %c3328 = arith.constant 3328 : index
    %c0_180 = arith.constant 0 : index
    %324 = vector.load %arg5[%c3328, %c0_180] : memref<3456x64xbf16, #tpu.memory_space<vmem>>, vector<64x64xbf16>
    %cst_181 = arith.constant dense<0.000000e+00> : vector<18x64xf32>
    %325 = tpu.matmul %323, %324, %cst_181 {dimension_numbers = #tpu.dot_dimension_numbers<[1], [0], [0], [1], [0, 0, 1, 1], [], []>} : vector<18x64xbf16>, vector<64x64xbf16>, vector<18x64xf32> -> vector<18x64xf32>
    %326 = arith.addf %322, %325 : vector<18x64xf32>
    %327 = vector.extract_strided_slice %293 {offsets = [192, 0], sizes = [18, 64], strides = [1, 1]} : vector<216x64xbf16> to vector<18x64xbf16>
    %c3392 = arith.constant 3392 : index
    %c0_182 = arith.constant 0 : index
    %328 = vector.load %arg5[%c3392, %c0_182] : memref<3456x64xbf16, #tpu.memory_space<vmem>>, vector<64x64xbf16>
    %cst_183 = arith.constant dense<0.000000e+00> : vector<18x64xf32>
    %329 = tpu.matmul %327, %328, %cst_183 {dimension_numbers = #tpu.dot_dimension_numbers<[1], [0], [0], [1], [0, 0, 1, 1], [], []>} : vector<18x64xbf16>, vector<64x64xbf16>, vector<18x64xf32> -> vector<18x64xf32>
    %330 = arith.addf %326, %329 : vector<18x64xf32>
    %c7 = arith.constant 7 : index
    %c0_184 = arith.constant 0 : index
    %331 = vector.load %arg6[%c7, %c0_184] : memref<8x64xf32, #tpu.memory_space<vmem>>, vector<1x64xf32>
    %332 = vector.broadcast %331 : vector<1x64xf32> to vector<18x64xf32>
    %333 = arith.addf %330, %332 : vector<18x64xf32>
    %cst_185 = arith.constant 0.000000e+00 : f32
    %334 = vector.broadcast %cst_185 : f32 to vector<18x64xf32>
    %335 = arith.maximumf %333, %334 : vector<18x64xf32>
    %336 = arith.addf %243, %335 : vector<18x64xf32>
    %cst_186 = arith.constant 0.000000e+00 : f32
    %337 = vector.broadcast %cst_186 : f32 to vector<18x64xf32>
    %338 = arith.maximumf %336, %337 : vector<18x64xf32>
    %c0_187 = arith.constant 0 : index
    %c0_188 = arith.constant 0 : index
    %339 = vector.load %arg7[%c0_187, %c0_188] : memref<18x64xf32, #tpu.memory_space<vmem>>, vector<18x64xf32>
    tpu.vector_store %arg7[%c0_187, %c0_188], %338 {strides = array<i32>} : memref<18x64xf32, #tpu.memory_space<vmem>>, vector<18x64xf32>,
    return
  }
}

</mosaic_0001>

<bundles_post_ra>
// kernel: tinynet_forward.1
= control target key start
LH: loop header
LB: loop body
LE: loop exit
PB: predicated region body
PF: predicated region fallthrough
CT: control target
= control target key end

     0   :  { %vm115_vm0 = vcmask 1044480   ;;  %vm116_vm1 = vcmask 1045504   ;;  %v9851_v0 = vmov 0.0   ;;  %v9852_v2 = vmov 65535   ;;  %s11532_s1 = inlined_call_operand.vmem [shape: bf16[27,64], index: 1, kind: input, shape index: {}]   ;;  %s11533_s0 = inlined_call_operand.vmem [shape: bf16[98,27], index: 0, kind: input, shape index: {}]   ;;  %s11534_s2 = inlined_call_operand.vmem [shape: bf16[216,98], index: 2, kind: input, shape index: {}]   ;;  %s11535_s3 = inlined_call_operand.vmem [shape: bf16[576,64], index: 3, kind: input, shape index: {}]   ;;  %s11536_s6 = inlined_call_operand.vmem [shape: f32[8,64], index: 6, kind: input, shape index: {}]   ;;  %s11537_s4 = inlined_call_operand.vmem [shape: bf16[216,18], index: 4, kind: input, shape index: {}]   ;;  %s11538_s5 = inlined_call_operand.vmem [shape: bf16[3456,64], index: 5, kind: input, shape index: {}]   ;;  %s11539_s7 = inlined_call_operand.vmem [shape: f32[18,64], index: 7, kind: output, shape index: {}]  }
   0x1   :  { %8488 = vmatprep.subr.bf16.mxu0 %v9851_v0  ;;  %v9520_v1 = vld [vmem:[%s11532_s1] sm:$0xff]   ;;  %v117_v3 = vsel %vm115_vm0, 4294967295, %v9852_v2  ;;  %v9521_v4 = vld [vmem:[%s11532_s1 + $0x8] sm:$0x3f]   ;;  %vm9853_vm2 = vmmov 0   ;;  %vm93_vm3 = vcmask 220160  }
   0x2   :  { %8489 = vmatpush3.bf16.msra.mxu0 %v9520_v1  ;;  %v118_v5 = vsel %vm116_vm1, %v117_v3, 0  ;;  %8492 = vmatprep.mubr.msk.bf16.mxu0 %vm9853_vm2, %v9851_v0  ;;  %v9522_v7 = vld [vmem:[%s11533_s0] sm:$0xff]   ;;  %v9523_v8 = vld [vmem:[%s11533_s0 + $0x8] sm:$0xff]   ;;  %v9524_v9 = vld [vmem:[%s11533_s0 + $0x10] sm:$0xff]   ;;  %vm325_vm4 = vcmask 801792   ;;  %vm368_vm5 = vcmask 1040384  }
   0x3   :  { %8490 = vmatprep.subr.bf16.mxu0 %v9851_v0  ;;  %v120_v6 = vand.u32 %v9521_v4, %v118_v5  ;;  %v9525_v10 = vld [vmem:[%s11533_s0 + $0x18] sm:$0xff]   ;;  %v9526_v11 = vld [vmem:[%s11533_s0 + $0x20] sm:$0xff]   ;;  %v9527_v12 = vld [vmem:[%s11533_s0 + $0x28] sm:$0xff]   ;;  %vm576_vm6 = vcmask 523264   ;;  %vm548_vm7 = vcmask 1043456   ;;  %vm1455_vm8 = vcmask 146432  }
   0x4   :  { %v9528_v13 = vld [vmem:[%s11533_s0 + $0x30] ss:$0 sps:$4 sm:$0x11]   ;;  %v9529_v14 = vld [vmem:[%s11534_s2] sm:$0xff]   ;;  %v9544_v16 = vld [vmem:[%s11535_s3 + $0x28] sm:$0xff]   ;;  %vm7450_vm9 = vcmask 517120  }
   0x5   :  { %8534 = vmatprep.mubr.msk.bf16.mxu1 %vm325_vm4, %v9529_v14  ;;  %v9543_v15 = vld [vmem:[%s11535_s3 + $0x20] sm:$0xff]   ;;  %v9546_v17 = vld [vmem:[%s11535_s3 + $0x30] sm:$0xff]  }
   0x6   :  { %8491 = vmatpush3.bf16.msra.mxu0 %v120_v6  ;;  %v9951_v18 = vld [vmem:[%s11536_s6] ss:$0 sm:$0xff] }
   0x7   :  { %8562 = vmatprep.subr.bf16.mxu0 %v9543_v15 }
   0x9   :  { %8493 = vmatmul.mubr.msk.bf16.vlgmr.msra.gmra.mrb[0].mxu0 %vm93_vm3, %v9522_v7 }
   0xa   :  { %8496 = vmatprep.mubr.msk.bf16.mxu0 %vm9853_vm2, %v9851_v0  ;;  %8563 = vmatpush3.bf16.msra.mxu0 %v9543_v15 }
   0xb   :  { %8564 = vmatprep.subr.bf16.mxu0 %v9544_v16 }
   0xe   :  { %8565 = vmatpush3.bf16.msra.mxu0 %v9544_v16  ;;  %v9545_v16 = vld [vmem:[%s11535_s3 + $0x40] sm:$0xff]  }
   0xf   :  { %8566 = vmatprep.subr.bf16.mxu0 %v9546_v17 }
  0x11   :  { %8497 = vmatmul.mubr.msk.bf16.gmra.mrb[4].mxu0 %vm93_vm3, %v9523_v8 }
  0x12   :  { %8500 = vmatprep.mubr.msk.bf16.mxu0 %vm9853_vm2, %v9851_v0  ;;  %8567 = vmatpush3.bf16.msra.mxu0 %v9546_v17 }
  0x19   :  { %8501 = vmatmul.mubr.msk.bf16.gmra.mrb[8].mxu0 %vm93_vm3, %v9524_v9 }
  0x1a   :  { %8504 = vmatprep.mubr.msk.bf16.mxu0 %vm9853_vm2, %v9851_v0 }
  0x21   :  { %8505 = vmatmul.mubr.msk.bf16.gmra.mrb[12].mxu0 %vm93_vm3, %v9525_v10 }
  0x22   :  { %8508 = vmatprep.mubr.msk.bf16.mxu0 %vm9853_vm2, %v9851_v0 }
  0x29   :  { %8509 = vmatmul.mubr.msk.bf16.gmra.mrb[16].mxu0 %vm93_vm3, %v9526_v11 }
  0x2a   :  { %8512 = vmatprep.mubr.msk.bf16.mxu0 %vm9853_vm2, %v9851_v0 }
  0x31   :  { %8513 = vmatmul.mubr.msk.bf16.gmra.mrb[20].mxu0 %vm93_vm3, %v9527_v12 }
  0x32   :  { %8516 = vmatprep.mubr.msk.bf16.mxu0 %vm9853_vm2, %v9851_v0 }
  0x39   :  { %8517 = vmatmul.mubr.msk.bf16.gmra.mrb[24].mxu0 %vm93_vm3, %v9528_v13 }
  0xdc   :  { %v156_v19 = vpop.f32.mrb[0].mxu0 }
  0xdd   :  { %v157_v20 = vadd.f32 %v9951_v18, %v156_v19  ;;  %v8494_v21 = vpop.f32.mrb[1].mxu0  ;;  %v9531_v19 = vld [vmem:[%s11534_s2 + $0x10] sm:$0xff]  }
  0xde   :  { %v159_v22 = vpop.f32.mrb[2].mxu0  ;;  %v9532_v21 = vld [vmem:[%s11534_s2 + $0x18] sm:$0xff]  }
  0xdf   :  { %v160_v23 = vadd.f32 %v9951_v18, %v159_v22  ;;  %v8495_v24 = vpop.f32.mrb[3].mxu0  ;;  %v210_v25 = vmax.f32 %v157_v20, 0.0  ;;  %v9547_v20 = vld [vmem:[%s11535_s3 + $0x48] sm:$0xff]   ;;  %v9533_v22 = vld [vmem:[%s11534_s2 + $0x20] sm:$0xff]  }
  0xe0   :  { %v9535_v24 = vld [vmem:[%s11534_s2 + $0x30] sm:$0xff]  }
  0xe1   :  { %v211_v26 = vmax.f32 %v160_v23, 0.0  ;;  %v9534_v23 = vld [vmem:[%s11534_s2 + $0x28] sm:$0xff]  }
  0xe3   :  { %v223_v27 = vpack.c.bf16 %v211_v26, %v210_v25  ;;  %v9536_v25 = vld [vmem:[%s11534_s2 + $0x38] sm:$0xff]   ;;  %v9537_v26 = vld [vmem:[%s11534_s2 + $0x40] sm:$0xff]  }
  0xe4   :  { %v164_v28 = vpop.f32.mrb[4].mxu0 }
  0xe5   :  { %v165_v29 = vadd.f32 %v9951_v18, %v164_v28  ;;  %v8498_v30 = vpop.f32.mrb[5].mxu0  ;;  %8520 = vmatprep.subr.bf16.mxu1 %v223_v27  ;;  %v9539_v28 = vld [vmem:[%s11534_s2 + $0x50] sm:$0xff]  }
  0xe6   :  { %v167_v31 = vpop.f32.mrb[6].mxu0  ;;  %8521 = vmatpush3.bf16.msra.mxu1 %v223_v27  ;;  %v9538_v27 = vld [vmem:[%s11534_s2 + $0x48] sm:$0xff]   ;;  %v9541_v30 = vld [vmem:[%s11534_s2 + $0x60] sm:$0xff]  }
  0xe7   :  { %v168_v32 = vadd.f32 %v9951_v18, %v167_v31  ;;  %v8499_v33 = vpop.f32.mrb[7].mxu0  ;;  %v212_v34 = vmax.f32 %v165_v29, 0.0  ;;  %v9540_v29 = vld [vmem:[%s11534_s2 + $0x58] sm:$0xff]   ;;  %v9542_v31 = vld [vmem:[%s11534_s2 + $0x68] ss:$0 sps:$4 sm:$0xff]  }
  0xe8   :  { %v9549_v33 = vld [vmem:[%s11535_s3 + $0x50] sm:$0xff]  }
  0xe9   :  { %v213_v35 = vmax.f32 %v168_v32, 0.0  ;;  %v9548_v32 = vld [vmem:[%s11535_s3 + $0x38] sm:$0xff]  }
  0xea   :  { %8568 = vmatprep.subr.bf16.mxu0 %v9548_v32 }
  0xeb   :  { %v224_v36 = vpack.c.bf16 %v213_v35, %v212_v34  ;;  %8569 = vmatpush3.bf16.msra.mxu0 %v9548_v32  ;;  %v9550_v34 = vld [vmem:[%s11535_s3] sm:$0xff]   ;;  %v9552_v35 = vld [vmem:[%s11535_s3 + $0x58] sm:$0xff]  }
  0xec   :  { %v172_v37 = vpop.f32.mrb[8].mxu0  ;;  %8574 = vmatprep.subr.bf16.mxu0 %v9550_v34  ;;  %v9568_v32 = vld [vmem:[%s11535_s3 + $0xd8] sm:$0xff]  }
  0xed   :  { %v173_v38 = vadd.f32 %v9951_v18, %v172_v37  ;;  %v8502_v39 = vpop.f32.mrb[9].mxu0  ;;  %8522 = vmatprep.subr.bf16.mxu1 %v224_v36 }
  0xee   :  { %v175_v40 = vpop.f32.mrb[10].mxu0  ;;  %8523 = vmatpush3.bf16.msra.mxu1 %v224_v36  ;;  %v9554_v36 = vld [vmem:[%s11535_s3 + $0x80] sm:$0xff]  }
  0xef   :  { %v176_v41 = vadd.f32 %v9951_v18, %v175_v40  ;;  %v8503_v42 = vpop.f32.mrb[11].mxu0  ;;  %v214_v43 = vmax.f32 %v173_v38, 0.0 }
  0xf1   :  { %v215_v44 = vmax.f32 %v176_v41, 0.0 }
  0xf3   :  { %v225_v45 = vpack.c.bf16 %v215_v44, %v214_v43 }
  0xf4   :  { %v180_v46 = vpop.f32.mrb[12].mxu0 }
  0xf5   :  { %v181_v47 = vadd.f32 %v9951_v18, %v180_v46  ;;  %v8506_v48 = vpop.f32.mrb[13].mxu0  ;;  %8524 = vmatprep.subr.bf16.mxu1 %v225_v45 }
  0xf6   :  { %v183_v49 = vpop.f32.mrb[14].mxu0  ;;  %8525 = vmatpush3.bf16.msra.mxu1 %v225_v45 }
  0xf7   :  { %v184_v50 = vadd.f32 %v9951_v18, %v183_v49  ;;  %v8507_v51 = vpop.f32.mrb[15].mxu0  ;;  %v216_v52 = vmax.f32 %v181_v47, 0.0 }
  0xf9   :  { %v217_v53 = vmax.f32 %v184_v50, 0.0 }
  0xfb   :  { %v226_v54 = vpack.c.bf16 %v217_v53, %v216_v52  ;;  %v9551_v52 = vld [vmem:[%s11535_s3 + $0x8] sm:$0xff]  }
  0xfc   :  { %v188_v55 = vpop.f32.mrb[16].mxu0 }
  0xfd   :  { %v189_v56 = vadd.f32 %v9951_v18, %v188_v55  ;;  %v8510_v57 = vpop.f32.mrb[17].mxu0  ;;  %8526 = vmatprep.subr.bf16.mxu1 %v226_v54 }
  0xfe   :  { %v191_v58 = vpop.f32.mrb[18].mxu0  ;;  %8527 = vmatpush3.bf16.msra.mxu1 %v226_v54 }
  0xff   :  { %v192_v59 = vadd.f32 %v9951_v18, %v191_v58  ;;  %v8511_v60 = vpop.f32.mrb[19].mxu0  ;;  %v218_v61 = vmax.f32 %v189_v56, 0.0  ;;  %v9553_v58 = vld [vmem:[%s11535_s3 + $0x10] sm:$0xff]  }
 0x100   :  { %v9556_v60 = vld [vmem:[%s11535_s3 + $0x88] sm:$0xff]  }
 0x101   :  { %v219_v62 = vmax.f32 %v192_v59, 0.0 }
 0x103   :  { %v227_v63 = vpack.c.bf16 %v219_v62, %v218_v61 }
 0x104   :  { %v196_v0 = vpop.f32.mrb[20].mxu0 }
 0x105   :  { %v197_v1 = vadd.f32 %v9951_v18, %v196_v0  ;;  %v8514_v2 = vpop.f32.mrb[21].mxu0  ;;  %8528 = vmatprep.subr.bf16.mxu1 %v227_v63 }
 0x106   :  { %v199_v3 = vpop.f32.mrb[22].mxu0  ;;  %8529 = vmatpush3.bf16.msra.mxu1 %v227_v63  ;;  %v9555_v63 = vld [vmem:[%s11535_s3 + $0x18] sm:$0xff]  }
 0x107   :  { %v200_v4 = vadd.f32 %v9951_v18, %v199_v3  ;;  %v8515_v5 = vpop.f32.mrb[23].mxu0  ;;  %v220_v6 = vmax.f32 %v197_v1, 0.0  ;;  %v9558_v1 = vld [vmem:[%s11535_s3 + $0x90] sm:$0xff]  }
 0x109   :  { %v221_v7 = vmax.f32 %v200_v4, 0.0 }
 0x10b   :  { %v228_v8 = vpack.c.bf16 %v221_v7, %v220_v6  ;;  %v9557_v7 = vld [vmem:[%s11535_s3 + $0x60] sm:$0xff]  }
 0x10c   :  { %v204_v9 = vpop.f32.mrb[24].mxu0 }
 0x10d   :  { %v205_v10 = vadd.f32 %v9951_v18, %v204_v9  ;;  %v8518_v11 = vpop.f32.mrb[25].mxu0  ;;  %8530 = vmatprep.subr.bf16.mxu1 %v228_v8  ;;  %v9530_v18 = vld [vmem:[%s11534_s2 + $0x8] sm:$0xff]  }
 0x10e   :  { %v207_v12 = vpop.f32.mrb[26].mxu0  ;;  %8531 = vmatpush3.bf16.msra.mxu1 %v228_v8  ;;  %v9560_v8 = vld [vmem:[%s11535_s3 + $0x98] sm:$0xff]  }
 0x10f   :  { %v222_v13 = vmax.f32 %v205_v10, 0.0  ;;  %v8519_v14 = vpop.f32.mrb[27].mxu0  ;;  %v9559_v10 = vld [vmem:[%s11535_s3 + $0x68] sm:$0xff]  }
 0x111   :  { %v229_v15 = vpack.c.bf16 %v222_v13, %v222_v13  ;;  %v9562_v13 = vld [vmem:[%s11535_s3 + $0xc0] sm:$0xff]  }
 0x113   :  { %9510 = vmatprep.subr.msk.bf16.mxu1 %vm368_vm5, %v229_v15  ;;  %v370_v17 = vsel %vm368_vm5, %v229_v15, 0 }
 0x114   :  { %8533 = vmatpush3.bf16.msra.mxu1 %v370_v17 }
 0x115   :  { %8586 = vmatprep.subr.bf16.mxu1 %v9545_v16 }
 0x117   :  { %8535 = vmatmul.mubr.msk.bf16.vlgmr.msra.gmra.mrb[0].mxu1 %vm325_vm4, %v9530_v18  ;;  %v9561_v18 = vld [vmem:[%s11535_s3 + $0x70] sm:$0xff]  }
 0x118   :  { %8538 = vmatprep.mubr.msk.bf16.mxu1 %vm325_vm4, %v9531_v19  ;;  %8587 = vmatpush3.bf16.msra.mxu1 %v9545_v16 }
 0x119   :  { %8588 = vmatprep.subr.bf16.mxu1 %v9547_v20 }
 0x11c   :  { %8589 = vmatpush3.bf16.msra.mxu1 %v9547_v20  ;;  %v9564_v20 = vld [vmem:[%s11535_s3 + $0xc8] sm:$0xff]  }
 0x11d   :  { %8590 = vmatprep.subr.bf16.mxu1 %v9549_v33 }
 0x11f   :  { %8539 = vmatmul.mubr.msk.bf16.gmra.mrb[4].mxu1 %vm325_vm4, %v9532_v21 }
 0x120   :  { %8542 = vmatprep.mubr.msk.bf16.mxu1 %vm325_vm4, %v9533_v22  ;;  %8591 = vmatpush3.bf16.msra.mxu1 %v9549_v33  ;;  %v9563_v22 = vld [vmem:[%s11535_s3 + $0x78] sm:$0xff]  }
 0x121   :  { %8592 = vmatprep.subr.bf16.mxu1 %v9552_v35 }
 0x124   :  { %8593 = vmatpush3.bf16.msra.mxu1 %v9552_v35  ;;  %v9567_v35 = vld [vmem:[%s11535_s3 + $0xa8] sm:$0xff]  }
 0x125   :  { %8610 = vmatprep.subr.bf16.mxu1 %v9554_v36 }
 0x127   :  { %8543 = vmatmul.mubr.msk.bf16.gmra.mrb[8].mxu1 %vm325_vm4, %v9534_v23 }
 0x128   :  { %8546 = vmatprep.mubr.msk.bf16.mxu1 %vm325_vm4, %v9535_v24 }
 0x12f   :  { %8547 = vmatmul.mubr.msk.bf16.gmra.mrb[12].mxu1 %vm325_vm4, %v9536_v25  ;;  %v9566_v25 = vld [vmem:[%s11535_s3 + $0xd0] sm:$0xff]  }
 0x130   :  { %8550 = vmatprep.mubr.msk.bf16.mxu1 %vm325_vm4, %v9537_v26 }
 0x137   :  { %8551 = vmatmul.mubr.msk.bf16.gmra.mrb[16].mxu1 %vm325_vm4, %v9538_v27 }
 0x138   :  { %8554 = vmatprep.mubr.msk.bf16.mxu1 %vm325_vm4, %v9539_v28 }
 0x13f   :  { %8555 = vmatmul.mubr.msk.bf16.gmra.mrb[20].mxu1 %vm325_vm4, %v9540_v29 }
 0x140   :  { %8558 = vmatprep.mubr.msk.bf16.mxu1 %vm325_vm4, %v9541_v30  ;;  %v9565_v30 = vld [vmem:[%s11535_s3 + $0xa0] sm:$0xff]  }
 0x147   :  { %8559 = vmatmul.mubr.msk.bf16.gmra.mrb[24].mxu1 %vm325_vm4, %v9542_v31 }
 0x1ea   :  { %v8536_v37 = vpop.f32.mrb[0].mxu1 }
 0x1eb   :  { %v406_v38 = vpop.f32.mrb[1].mxu1 }
 0x1ec   :  { %v8537_v39 = vpop.f32.mrb[2].mxu1 }
 0x1ed   :  { %v517_v40 = vpack.c.bf16 %v8537_v39, %v8536_v37  ;;  %v409_v41 = vpop.f32.mrb[3].mxu1 }
 0x1ee   :  { %v516_v42 = vpack.c.bf16 %v409_v41, %v406_v38  ;;  %v9570_v38 = vld [vmem:[%s11535_s3 + $0x100] sm:$0xff]  }
 0x1ef   :  { %v549_v49 = vrot.slane %v517_v40, 4 }
 0x1f2   :  { %v8540_v43 = vpop.f32.mrb[4].mxu1 }
 0x1f3   :  { %v422_v44 = vpop.f32.mrb[5].mxu1 }
 0x1f4   :  { %v8541_v45 = vpop.f32.mrb[6].mxu1 }
 0x1f5   :  { %v519_v46 = vpack.c.bf16 %v8541_v45, %v8540_v43  ;;  %v425_v47 = vpop.f32.mrb[7].mxu1  ;;  %v9571_v45 = vld [vmem:[%s11535_s3 + $0xb8] sm:$0xff]  }
 0x1f6   :  { %v518_v48 = vpack.c.bf16 %v425_v47, %v422_v44  ;;  %v9572_v44 = vld [vmem:[%s11535_s3 + $0x108] sm:$0xff]   ;;  %v9573_v47 = vld [vmem:[%s11535_s3 + $0xe0] sm:$0xff]  }
 0x1f7   :  { %8594 = vmatprep.mubr.msk.bf16.mxu1 %vm576_vm6, %v519_v46  ;;  %v9574_v46 = vld [vmem:[%s11535_s3 + $0x110] sm:$0xff]  }
 0x1f8   :  { %v550_v50 = vrot.slane %v518_v48, 4  ;;  %v9576_v48 = vld [vmem:[%s11535_s3 + $0x118] sm:$0xff]  }
 0x1fa   :  { %v551_v51 = vsel %vm548_vm7, %v549_v49, %v550_v50  ;;  %v8544_v53 = vpop.f32.mrb[8].mxu1  ;;  %v9575_v49 = vld [vmem:[%s11535_s3 + $0xe8] sm:$0xff]  }
 0x1fb   :  { %8570 = vmatprep.mubr.msk.bf16.mxu0 %vm576_vm6, %v551_v51  ;;  %v438_v54 = vpop.f32.mrb[9].mxu1  ;;  %v9577_v51 = vld [vmem:[%s11535_s3 + $0xf0] sm:$0xff]  }
 0x1fc   :  { %8571 = vmatmul.mubr.msk.bf16.vlgmr.msra.gmra.mrb[28].mxu0 %vm576_vm6, %v550_v50  ;;  %v8545_v55 = vpop.f32.mrb[10].mxu1 }
 0x1fd   :  { %8575 = vmatpush3.bf16.msra.mxu0 %v9550_v34  ;;  %8582 = vmatprep.mubr.msk.bf16.mxu0 %vm576_vm6, %v516_v42  ;;  %v521_v56 = vpack.c.bf16 %v8545_v55, %v8544_v53  ;;  %v441_v57 = vpop.f32.mrb[11].mxu1  ;;  %v9569_v42 = vld [vmem:[%s11535_s3 + $0xb0] sm:$0xff]   ;;  %v9579_v53 = vld [vmem:[%s11537_s4] sm:$0xff]  }
 0x1fe   :  { %8576 = vmatprep.subr.bf16.mxu0 %v9551_v52  ;;  %v520_v59 = vpack.c.bf16 %v441_v57, %v438_v54 }
 0x1ff   :  { %v10055_v61 = vrot.slane %v521_v56, 4 }
 0x200   :  { %v808_v62 = vrot.slane %v520_v59, 4  ;;  %8595 = vmatmul.mubr.msk.bf16.vlgmr.msra.gmra.mrb[28].mxu1 %vm576_vm6, %v520_v59 }
 0x201   :  { %8577 = vmatpush3.bf16.msra.mxu0 %v9551_v52  ;;  %8611 = vmatpush3.bf16.msra.mxu1 %v9554_v36  ;;  %v9578_v52 = vld [vmem:[%s11535_s3 + $0xf8] sm:$0xff]  }
 0x202   :  { %8578 = vmatprep.subr.bf16.mxu0 %v9553_v58  ;;  %8612 = vmatprep.subr.bf16.mxu1 %v9556_v60  ;;  %v810_v0 = vsel %vm548_vm7, %v808_v62, %v10055_v61  ;;  %v8548_v2 = vpop.f32.mrb[12].mxu1 }
 0x203   :  { %v454_v3 = vpop.f32.mrb[13].mxu1 }
 0x204   :  { %v8549_v4 = vpop.f32.mrb[14].mxu1 }
 0x205   :  { %8579 = vmatpush3.bf16.msra.mxu0 %v9553_v58  ;;  %8613 = vmatpush3.bf16.msra.mxu1 %v9556_v60  ;;  %v523_v5 = vpack.c.bf16 %v8549_v4, %v8548_v2  ;;  %v457_v6 = vpop.f32.mrb[15].mxu1 }
 0x206   :  { %8580 = vmatprep.subr.bf16.mxu0 %v9555_v63  ;;  %8614 = vmatprep.subr.bf16.mxu1 %v9558_v1  ;;  %v522_v9 = vpack.c.bf16 %v457_v6, %v454_v3 }
 0x207   :  { %v991_v17 = vrot.slane %v523_v5, 4 }
 0x208   :  { %8618 = vmatprep.mubr.msk.bf16.mxu1 %vm576_vm6, %v522_v9 }
 0x209   :  { %8581 = vmatpush3.bf16.msra.mxu0 %v9555_v63  ;;  %8615 = vmatpush3.bf16.msra.mxu1 %v9558_v1 }
 0x20a   :  { %8598 = vmatprep.subr.bf16.mxu0 %v9557_v7  ;;  %8616 = vmatprep.subr.bf16.mxu1 %v9560_v8  ;;  %v8552_v11 = vpop.f32.mrb[16].mxu1 }
 0x20b   :  { %v470_v12 = vpop.f32.mrb[17].mxu1 }
 0x20c   :  { %8583 = vmatmul.mubr.msk.bf16.vlgmr.msra.gmra.mrb[32].mxu0 %vm576_vm6, %v517_v40  ;;  %v8553_v14 = vpop.f32.mrb[18].mxu1 }
 0x20d   :  { %8599 = vmatpush3.bf16.msra.mxu0 %v9557_v7  ;;  %8606 = vmatprep.mubr.msk.bf16.mxu0 %vm576_vm6, %v810_v0  ;;  %v525_v15 = vpack.c.bf16 %v8553_v14, %v8552_v11  ;;  %v473_v16 = vpop.f32.mrb[19].mxu1 }
 0x20e   :  { %8600 = vmatprep.subr.bf16.mxu0 %v9559_v10  ;;  %8617 = vmatpush3.bf16.msra.mxu1 %v9560_v8  ;;  %v524_v19 = vpack.c.bf16 %v473_v16, %v470_v12 }
 0x20f   :  { %8634 = vmatprep.subr.bf16.mxu1 %v9562_v13 }
 0x210   :  { %v10087_v21 = vrot.slane %v524_v19, 4 }
 0x211   :  { %8601 = vmatpush3.bf16.msra.mxu0 %v9559_v10  ;;  %8619 = vmatmul.mubr.msk.bf16.vlgmr.msra.gmra.mrb[32].mxu1 %vm576_vm6, %v523_v5 }
 0x212   :  { %8602 = vmatprep.subr.bf16.mxu0 %v9561_v18  ;;  %8635 = vmatpush3.bf16.msra.mxu1 %v9562_v13  ;;  %v993_v23 = vsel %vm548_vm7, %v991_v17, %v10087_v21  ;;  %v8556_v24 = vpop.f32.mrb[20].mxu1 }
 0x213   :  { %8636 = vmatprep.subr.bf16.mxu1 %v9564_v20  ;;  %v486_v26 = vpop.f32.mrb[21].mxu1  ;;  %8642 = vmatprep.mubr.msk.bf16.mxu1 %vm576_vm6, %v525_v15 }
 0x214   :  { %v8557_v27 = vpop.f32.mrb[22].mxu1 }
 0x215   :  { %8603 = vmatpush3.bf16.msra.mxu0 %v9561_v18  ;;  %v527_v28 = vpack.c.bf16 %v8557_v27, %v8556_v24  ;;  %v489_v29 = vpop.f32.mrb[23].mxu1 }
 0x216   :  { %8604 = vmatprep.subr.bf16.mxu0 %v9563_v22  ;;  %8637 = vmatpush3.bf16.msra.mxu1 %v9564_v20  ;;  %v526_v31 = vpack.c.bf16 %v489_v29, %v486_v26 }
 0x217   :  { %8638 = vmatprep.subr.bf16.mxu1 %v9566_v25  ;;  %v1175_v33 = vrot.slane %v527_v28, 4 }
 0x218   :  { %v1174_v34 = vrot.slane %v526_v31, 4 }
 0x219   :  { %8605 = vmatpush3.bf16.msra.mxu0 %v9563_v22 }
 0x21a   :  { %8622 = vmatprep.subr.bf16.mxu0 %v9565_v30  ;;  %8639 = vmatpush3.bf16.msra.mxu1 %v9566_v25  ;;  %v1176_v36 = vsel %vm548_vm7, %v1174_v34, %v1175_v33  ;;  %v8560_v37 = vpop.f32.mrb[24].mxu1 }
 0x21b   :  { %8640 = vmatprep.subr.bf16.mxu1 %v9568_v32  ;;  %v502_v39 = vpop.f32.mrb[25].mxu1  ;;  %v529_v50 = vpack.c.bf16 %v8560_v37, %v8560_v37 }
 0x21c   :  { %8607 = vmatmul.mubr.msk.bf16.vlgmr.msra.gmra.mrb[36].mxu0 %vm576_vm6, %v10055_v61  ;;  %v8561_v40 = vpop.f32.mrb[26].mxu1 }
 0x21d   :  { %8623 = vmatpush3.bf16.msra.mxu0 %v9565_v30  ;;  %8630 = vmatprep.mubr.msk.bf16.mxu0 %vm576_vm6, %v993_v23  ;;  %v505_v41 = vpop.f32.mrb[27].mxu1 }
 0x21e   :  { %8624 = vmatprep.subr.bf16.mxu0 %v9567_v35  ;;  %8641 = vmatpush3.bf16.msra.mxu1 %v9568_v32  ;;  %v528_v43 = vpack.c.bf16 %v505_v41, %v502_v39 }
 0x21f   :  { %8658 = vmatprep.subr.bf16.mxu1 %v9570_v38 }
 0x221   :  { %8625 = vmatpush3.bf16.msra.mxu0 %v9567_v35  ;;  %8643 = vmatmul.mubr.msk.bf16.vlgmr.msra.gmra.mrb[36].mxu1 %vm576_vm6, %v526_v31 }
 0x222   :  { %8626 = vmatprep.subr.bf16.mxu0 %v9569_v42  ;;  %8659 = vmatpush3.bf16.msra.mxu1 %v9570_v38 }
 0x223   :  { %8660 = vmatprep.subr.bf16.mxu1 %v9572_v44  ;;  %8666 = vmatprep.mubr.msk.bf16.mxu1 %vm576_vm6, %v528_v43 }
 0x225   :  { %8627 = vmatpush3.bf16.msra.mxu0 %v9569_v42 }
 0x226   :  { %8628 = vmatprep.subr.bf16.mxu0 %v9571_v45  ;;  %8661 = vmatpush3.bf16.msra.mxu1 %v9572_v44 }
 0x227   :  { %8662 = vmatprep.subr.bf16.mxu1 %v9574_v46 }
 0x229   :  { %8629 = vmatpush3.bf16.msra.mxu0 %v9571_v45 }
 0x22a   :  { %8646 = vmatprep.subr.bf16.mxu0 %v9573_v47  ;;  %8663 = vmatpush3.bf16.msra.mxu1 %v9574_v46  ;;  %v7555_v46 = vld [vmem:[%s11536_s6 + $0x1] ss:$0 sm:$0xff] }
 0x22b   :  { %8664 = vmatprep.subr.bf16.mxu1 %v9576_v48 }
 0x22c   :  { %8631 = vmatmul.mubr.msk.bf16.vlgmr.msra.gmra.mrb[40].mxu0 %vm576_vm6, %v10087_v21 }
 0x22d   :  { %8647 = vmatpush3.bf16.msra.mxu0 %v9573_v47  ;;  %8654 = vmatprep.mubr.msk.bf16.mxu0 %vm576_vm6, %v1176_v36 }
 0x22e   :  { %8648 = vmatprep.subr.bf16.mxu0 %v9575_v49  ;;  %8665 = vmatpush3.bf16.msra.mxu1 %v9576_v48 }
 0x231   :  { %8649 = vmatpush3.bf16.msra.mxu0 %v9575_v49  ;;  %8667 = vmatmul.mubr.msk.bf16.vlgmr.msra.gmra.mrb[40].mxu1 %vm576_vm6, %v529_v50 }
 0x232   :  { %8650 = vmatprep.subr.bf16.mxu0 %v9577_v51 }
 0x235   :  { %8651 = vmatpush3.bf16.msra.mxu0 %v9577_v51 }
 0x236   :  { %8652 = vmatprep.subr.bf16.mxu0 %v9578_v52 }
 0x239   :  { %8653 = vmatpush3.bf16.msra.mxu0 %v9578_v52 }
 0x23c   :  { %8655 = vmatmul.mubr.msk.bf16.vlgmr.msra.gmra.mrb[44].mxu0 %vm576_vm6, %v1175_v33 }
 0x23d   :  { %8674 = vmatprep.mubr.msk.bf16.mxu0 %vm1455_vm8, %v9579_v53 }
 0x2cf   :  { %v8572_v54 = vpop.f32.mrb[28].mxu0 }
 0x2d0   :  { %v617_v55 = vpop.f32.mrb[29].mxu0 }
 0x2d1   :  { %v8573_v56 = vpop.f32.mrb[30].mxu0 }
 0x2d2   :  { %v620_v57 = vpop.f32.mrb[31].mxu0 }
 0x2d3   :  { %v8596_v58 = vpop.f32.mrb[28].mxu1 }
 0x2d4   :  { %v781_v59 = vpop.f32.mrb[29].mxu1 }
 0x2d5   :  { %v8597_v60 = vpop.f32.mrb[30].mxu1 }
 0x2d6   :  { %v784_v61 = vpop.f32.mrb[31].mxu1  ;;  %v9580_v60 = vld [vmem:[%s11537_s4 + $0x8] sm:$0xff]  }
 0x2df   :  { %v8584_v62 = vpop.f32.mrb[32].mxu0 }
 0x2e0   :  { %v704_v63 = vadd.f32 %v8584_v62, %v8572_v54  ;;  %v695_v0 = vpop.f32.mrb[33].mxu0  ;;  %v9582_v62 = vld [vmem:[%s11537_s4 + $0x18] sm:$0xff]  }
 0x2e1   :  { %v696_v1 = vadd.f32 %v695_v0, %v617_v55  ;;  %v8585_v2 = vpop.f32.mrb[34].mxu0  ;;  %v9584_v0 = vld [vmem:[%s11537_s4 + $0x28] sm:$0xff]  }
 0x2e2   :  { %v698_v3 = vpop.f32.mrb[35].mxu0  ;;  %v797_v4 = vadd.f32 %v8596_v58, %v704_v63  ;;  %v9583_v63 = vld [vmem:[%s11537_s4 + $0x20] sm:$0xff]   ;;  %v9586_v2 = vld [vmem:[%s11537_s4 + $0x38] sm:$0xff]  }
 0x2e3   :  { %v699_v5 = vadd.f32 %v698_v3, %v620_v57  ;;  %v795_v6 = vadd.f32 %v781_v59, %v696_v1  ;;  %v9585_v1 = vld [vmem:[%s11537_s4 + $0x30] sm:$0xff]   ;;  %v9587_v3 = vld [vmem:[%s11537_s4 + $0x40] sm:$0xff]  }
 0x2e4   :  { %v8620_v7 = vpop.f32.mrb[32].mxu1 }
 0x2e5   :  { %v964_v8 = vpop.f32.mrb[33].mxu1  ;;  %v796_v9 = vadd.f32 %v784_v61, %v699_v5  ;;  %v9581_v61 = vld [vmem:[%s11537_s4 + $0x10] sm:$0xff]  }
 0x2e6   :  { %v8621_v10 = vpop.f32.mrb[34].mxu1  ;;  %v9589_v5 = vld [vmem:[%s11537_s4 + $0x50] sm:$0xff]  }
 0x2e7   :  { %v967_v11 = vpop.f32.mrb[35].mxu1  ;;  %v9594_v10 = vld [vmem:[%s11538_s5 + $0x28] sm:$0xff]  }
 0x2ef   :  { %v8608_v12 = vpop.f32.mrb[36].mxu0 }
 0x2f0   :  { %v891_v13 = vadd.f32 %v8608_v12, %v797_v4  ;;  %v875_v14 = vpop.f32.mrb[37].mxu0  ;;  %v9588_v4 = vld [vmem:[%s11537_s4 + $0x48] sm:$0xff]   ;;  %v9595_v12 = vld [vmem:[%s11538_s5 + $0x60] sm:$0xff]  }
 0x2f1   :  { %v889_v15 = vadd.f32 %v875_v14, %v795_v6  ;;  %v8609_v16 = vpop.f32.mrb[38].mxu0  ;;  %v9590_v6 = vld [vmem:[%s11537_s4 + $0x58] sm:$0xff]   ;;  %v9598_v14 = vld [vmem:[%s11538_s5] sm:$0xff]  }
 0x2f2   :  { %v878_v17 = vpop.f32.mrb[39].mxu0  ;;  %v980_v18 = vadd.f32 %v8620_v7, %v891_v13  ;;  %v9591_v7 = vld [vmem:[%s11537_s4 + $0x60] sm:$0xff]   ;;  %v9597_v13 = vld [vmem:[%s11538_s5 + $0x38] sm:$0xff]   ;;  %v9604_v16 = vld [vmem:[%s11538_s5 + $0x70] sm:$0xff]  }
 0x2f3   :  { %v890_v19 = vadd.f32 %v878_v17, %v796_v9  ;;  %v978_v20 = vadd.f32 %v964_v8, %v889_v15  ;;  %v9592_v8 = vld [vmem:[%s11537_s4 + $0x68] ss:$0 sps:$4 sm:$0xff]   ;;  %v9593_v9 = vld [vmem:[%s11538_s5 + $0x20] sm:$0xff]   ;;  %v9607_v17 = vld [vmem:[%s11538_s5 + $0x78] sm:$0xff]  }
 0x2f4   :  { %v8644_v21 = vpop.f32.mrb[36].mxu1  ;;  %8702 = vmatprep.subr.bf16.mxu1 %v9593_v9  ;;  %v9600_v15 = vld [vmem:[%s11538_s5 + $0x68] sm:$0xff]  }
 0x2f5   :  { %v1147_v22 = vpop.f32.mrb[37].mxu1  ;;  %v979_v23 = vadd.f32 %v967_v11, %v890_v19  ;;  %8703 = vmatpush3.bf16.msra.mxu1 %v9593_v9  ;;  %v9596_v11 = vld [vmem:[%s11538_s5 + $0x30] sm:$0xff]  }
 0x2f6   :  { %v8645_v24 = vpop.f32.mrb[38].mxu1  ;;  %8704 = vmatprep.subr.bf16.mxu1 %v9594_v10 }
 0x2f7   :  { %v1150_v25 = vpop.f32.mrb[39].mxu1 }
 0x2f9   :  { %8705 = vmatpush3.bf16.msra.mxu1 %v9594_v10 }
 0x2fa   :  { %8706 = vmatprep.subr.bf16.mxu1 %v9596_v11 }
 0x2fd   :  { %8707 = vmatpush3.bf16.msra.mxu1 %v9596_v11  ;;  %v9619_v11 = vld [vmem:[%s11538_s5 + $0xe8] sm:$0xff]  }
 0x2fe   :  { %8708 = vmatprep.subr.bf16.mxu1 %v9597_v13 }
 0x2ff   :  { %v8632_v26 = vpop.f32.mrb[40].mxu0 }
 0x300   :  { %v1074_v27 = vadd.f32 %v8632_v26, %v980_v18  ;;  %v1058_v28 = vpop.f32.mrb[41].mxu0  ;;  %v9609_v18 = vld [vmem:[%s11538_s5 + $0xa0] sm:$0xff]  }
 0x301   :  { %v1072_v29 = vadd.f32 %v1058_v28, %v978_v20  ;;  %v8633_v30 = vpop.f32.mrb[42].mxu0  ;;  %8709 = vmatpush3.bf16.msra.mxu1 %v9597_v13 }
 0x302   :  { %v1061_v31 = vpop.f32.mrb[43].mxu0  ;;  %v1163_v32 = vadd.f32 %v8644_v21, %v1074_v27  ;;  %8714 = vmatprep.subr.bf16.mxu1 %v9598_v14 }
 0x303   :  { %v1073_v33 = vadd.f32 %v1061_v31, %v979_v23  ;;  %v1161_v34 = vadd.f32 %v1147_v22, %v1072_v29 }
 0x304   :  { %v8668_v35 = vpop.f32.mrb[40].mxu1 }
 0x305   :  { %v1330_v36 = vpop.f32.mrb[41].mxu1  ;;  %v1162_v37 = vadd.f32 %v1150_v25, %v1073_v33 }
 0x306   :  { %v8669_v38 = vpop.f32.mrb[42].mxu1 }
 0x307   :  { %v1333_v39 = vpop.f32.mrb[43].mxu1  ;;  %v9601_v38 = vld [vmem:[%s11538_s5 + $0x10] sm:$0xff]  }
 0x30f   :  { %v8656_v40 = vpop.f32.mrb[44].mxu0 }
 0x310   :  { %v1257_v41 = vadd.f32 %v8656_v40, %v1163_v32  ;;  %v1241_v42 = vpop.f32.mrb[45].mxu0 }
 0x311   :  { %v1255_v43 = vadd.f32 %v1241_v42, %v1161_v34  ;;  %v8657_v44 = vpop.f32.mrb[46].mxu0  ;;  %v9599_v34 = vld [vmem:[%s11538_s5 + $0x8] sm:$0xff]  }
 0x312   :  { %v1346_v45 = vadd.f32 %v8668_v35, %v1257_v41  ;;  %v1244_v47 = vpop.f32.mrb[47].mxu0 }
 0x313   :  { %v1344_v48 = vadd.f32 %v1330_v36, %v1255_v43  ;;  %v1256_v49 = vadd.f32 %v1244_v47, %v1162_v37  ;;  %v9602_v43 = vld [vmem:[%s11538_s5 + $0x18] sm:$0xff]   ;;  %v9611_v47 = vld [vmem:[%s11538_s5 + $0xa8] sm:$0xff]  }
 0x314   :  { %v1354_v50 = vadd.f32 %v7555_v46, %v1346_v45 }
 0x315   :  { %v10156_v51 = vadd.f32 %v7555_v46, %v1344_v48  ;;  %v1345_v52 = vadd.f32 %v1333_v39, %v1256_v49  ;;  %v9603_v49 = vld [vmem:[%s11538_s5 + $0x40] sm:$0xff]  }
 0x316   :  { %v10160_v54 = vmax.f32 %v1354_v50, 0.0 }
 0x317   :  { %v10158_v53 = vadd.f32 %v7555_v46, %v1345_v52  ;;  %v1355_v55 = vmax.f32 %v10156_v51, 0.0 }
 0x318   :  { %v1359_v58 = vpack.c.bf16 %v10160_v54, %v10160_v54 }
 0x319   :  { %v1356_v56 = vmax.f32 %v10158_v53, 0.0 }
 0x31a   :  { %v1499_v59 = vsel %vm368_vm5, %v1359_v58, 0 }
 0x31b   :  { %v1358_v57 = vpack.c.bf16 %v1356_v56, %v1355_v55 }
 0x31d   :  { %8670 = vmatprep.subr.bf16.mxu0 %v1358_v57 }
 0x31e   :  { %8671 = vmatpush3.bf16.msra.mxu0 %v1358_v57 }
 0x31f   :  { %9511 = vmatprep.subr.msk.bf16.mxu0 %vm368_vm5, %v1359_v58  ;;  %v9613_v58 = vld [vmem:[%s11538_s5 + $0xb0] sm:$0xff]  }
 0x322   :  { %8673 = vmatpush3.bf16.msra.mxu0 %v1499_v59 }
 0x323   :  { %8738 = vmatprep.subr.bf16.mxu0 %v9595_v12 }
 0x325   :  { %8675 = vmatmul.mubr.msk.bf16.vlgmr.msra.gmra.mrb[48].mxu0 %vm1455_vm8, %v9580_v60  ;;  %v9605_v60 = vld [vmem:[%s11538_s5 + $0x48] sm:$0xff]  }
 0x326   :  { %8678 = vmatprep.mubr.msk.bf16.mxu0 %vm1455_vm8, %v9581_v61  ;;  %8739 = vmatpush3.bf16.msra.mxu0 %v9595_v12 }
 0x327   :  { %8740 = vmatprep.subr.bf16.mxu0 %v9600_v15 }
 0x32a   :  { %8741 = vmatpush3.bf16.msra.mxu0 %v9600_v15 }
 0x32b   :  { %8742 = vmatprep.subr.bf16.mxu0 %v9604_v16 }
 0x32d   :  { %8679 = vmatmul.mubr.msk.bf16.gmra.mrb[52].mxu0 %vm1455_vm8, %v9582_v62 }
 0x32e   :  { %8682 = vmatprep.mubr.msk.bf16.mxu0 %vm1455_vm8, %v9583_v63  ;;  %8743 = vmatpush3.bf16.msra.mxu0 %v9604_v16  ;;  %v9615_v63 = vld [vmem:[%s11538_s5 + $0xb8] sm:$0xff]   ;;  %v9610_v16 = vld [vmem:[%s11538_s5 + $0x80] sm:$0xff]  }
 0x32f   :  { %8744 = vmatprep.subr.bf16.mxu0 %v9607_v17 }
 0x332   :  { %8745 = vmatpush3.bf16.msra.mxu0 %v9607_v17 }
 0x333   :  { %8762 = vmatprep.subr.bf16.mxu0 %v9609_v18 }
 0x335   :  { %8683 = vmatmul.mubr.msk.bf16.gmra.mrb[56].mxu0 %vm1455_vm8, %v9584_v0 }
 0x336   :  { %8686 = vmatprep.mubr.msk.bf16.mxu0 %vm1455_vm8, %v9585_v1 }
 0x33d   :  { %8687 = vmatmul.mubr.msk.bf16.gmra.mrb[60].mxu0 %vm1455_vm8, %v9586_v2 }
 0x33e   :  { %8690 = vmatprep.mubr.msk.bf16.mxu0 %vm1455_vm8, %v9587_v3  ;;  %v9606_v3 = vld [vmem:[%s11538_s5 + $0x50] sm:$0xff]  }
 0x345   :  { %8691 = vmatmul.mubr.msk.bf16.gmra.mrb[64].mxu0 %vm1455_vm8, %v9588_v4 }
 0x346   :  { %8694 = vmatprep.mubr.msk.bf16.mxu0 %vm1455_vm8, %v9589_v5 }
 0x34d   :  { %8695 = vmatmul.mubr.msk.bf16.gmra.mrb[68].mxu0 %vm1455_vm8, %v9590_v6  ;;  %v9617_v6 = vld [vmem:[%s11538_s5 + $0xe0] sm:$0xff]  }
 0x34e   :  { %8698 = vmatprep.mubr.msk.bf16.mxu0 %vm1455_vm8, %v9591_v7 }
 0x355   :  { %8699 = vmatmul.mubr.msk.bf16.gmra.mrb[72].mxu0 %vm1455_vm8, %v9592_v8  ;;  %v9608_v8 = vld [vmem:[%s11538_s5 + $0x58] sm:$0xff]  }
 0x3f8   :  { %v8676_v19 = vpop.f32.mrb[48].mxu0 }
 0x3f9   :  { %v1535_v20 = vpop.f32.mrb[49].mxu0 }
 0x3fa   :  { %v8677_v21 = vpop.f32.mrb[50].mxu0 }
 0x3fb   :  { %v1646_v22 = vpack.c.bf16 %v8677_v21, %v8676_v19  ;;  %v1538_v23 = vpop.f32.mrb[51].mxu0  ;;  %v9621_v19 = vld [vmem:[%s11538_s5 + $0xf0] sm:$0xff]   ;;  %v9612_v21 = vld [vmem:[%s11538_s5 + $0x88] sm:$0xff]  }
 0x3fc   :  { %v1645_v24 = vpack.c.bf16 %v1538_v23, %v1535_v20 }
 0x3fd   :  { %v1677_v31 = vrot.slane %v1646_v22, 4 }
 0x400   :  { %v8680_v25 = vpop.f32.mrb[52].mxu0 }
 0x401   :  { %v1551_v26 = vpop.f32.mrb[53].mxu0 }
 0x402   :  { %v8681_v27 = vpop.f32.mrb[54].mxu0 }
 0x403   :  { %v1648_v28 = vpack.c.bf16 %v8681_v27, %v8680_v25  ;;  %v1554_v29 = vpop.f32.mrb[55].mxu0 }
 0x404   :  { %v1647_v30 = vpack.c.bf16 %v1554_v29, %v1551_v26 }
 0x406   :  { %v1678_v32 = vrot.slane %v1647_v30, 4  ;;  %v9616_v30 = vld [vmem:[%s11538_s5 + $0x98] sm:$0xff]  }
 0x408   :  { %v1679_v33 = vsel %vm548_vm7, %v1677_v31, %v1678_v32  ;;  %v8684_v35 = vpop.f32.mrb[56].mxu0  ;;  %v9618_v31 = vld [vmem:[%s11538_s5 + $0xc0] sm:$0xff]  }
 0x409   :  { %8710 = vmatprep.mubr.msk.bf16.mxu1 %vm576_vm6, %v1679_v33  ;;  %v1567_v36 = vpop.f32.mrb[57].mxu0  ;;  %v9620_v33 = vld [vmem:[%s11538_s5 + $0xc8] sm:$0xff]  }
 0x40a   :  { %8711 = vmatmul.mubr.msk.bf16.vlgmr.msra.gmra.mrb[44].mxu1 %vm576_vm6, %v1678_v32  ;;  %v8685_v37 = vpop.f32.mrb[58].mxu0  ;;  %v10350_v32 = vld [vmem:[%s11537_s4] sm:$0xff]  }
 0x40b   :  { %8715 = vmatpush3.bf16.msra.mxu1 %v9598_v14  ;;  %8722 = vmatprep.mubr.msk.bf16.mxu1 %vm576_vm6, %v1645_v24  ;;  %v1650_v39 = vpack.c.bf16 %v8685_v37, %v8684_v35  ;;  %v1570_v40 = vpop.f32.mrb[59].mxu0  ;;  %v9623_v24 = vld [vmem:[%s11538_s5 + $0xf8] sm:$0xff]   ;;  %v9626_v37 = vld [vmem:[%s11538_s5 + $0x108] sm:$0xff]  }
 0x40c   :  { %8716 = vmatprep.subr.bf16.mxu1 %v9599_v34  ;;  %v10264_v41 = vpack.c.bf16 %v1570_v40, %v1567_v36  ;;  %v9624_v35 = vld [vmem:[%s11538_s5 + $0xd8] sm:$0xff]   ;;  %v9625_v36 = vld [vmem:[%s11538_s5 + $0x100] sm:$0xff]  }
 0x40d   :  { %v1936_v42 = vrot.slane %v1650_v39, 4  ;;  %v9628_v39 = vld [vmem:[%s11538_s5 + $0x118] sm:$0xff]  }
 0x40e   :  { %v1935_v44 = vrot.slane %v10264_v41, 4 }
 0x40f   :  { %8717 = vmatpush3.bf16.msra.mxu1 %v9599_v34  ;;  %v9622_v34 = vld [vmem:[%s11538_s5 + $0xd0] sm:$0xff]  }
 0x410   :  { %8718 = vmatprep.subr.bf16.mxu1 %v9601_v38  ;;  %v1937_v45 = vsel %vm548_vm7, %v1935_v44, %v1936_v42  ;;  %v8688_v46 = vpop.f32.mrb[60].mxu0 }
 0x411   :  { %8746 = vmatprep.mubr.msk.bf16.mxu0 %vm576_vm6, %v1937_v45  ;;  %v10275_v48 = vpop.f32.mrb[61].mxu0 }
 0x412   :  { %8747 = vmatmul.mubr.msk.bf16.vlgmr.msra.gmra.mrb[76].mxu0 %vm576_vm6, %v1936_v42  ;;  %v8689_v50 = vpop.f32.mrb[62].mxu0 }
 0x413   :  { %8719 = vmatpush3.bf16.msra.mxu1 %v9601_v38  ;;  %8763 = vmatpush3.bf16.msra.mxu0 %v9609_v18  ;;  %v10281_v52 = vpack.c.bf16 %v8689_v50, %v8688_v46  ;;  %v10283_v57 = vpop.f32.mrb[63].mxu0  ;;  %v9627_v38 = vld [vmem:[%s11538_s5 + $0x110] sm:$0xff]  }
 0x414   :  { %8720 = vmatprep.subr.bf16.mxu1 %v9602_v43  ;;  %8764 = vmatprep.subr.bf16.mxu0 %v9611_v47  ;;  %v1651_v59 = vpack.c.bf16 %v10283_v57, %v10275_v48 }
 0x415   :  { %v2118_v4 = vrot.slane %v10281_v52, 4 }
 0x417   :  { %8721 = vmatpush3.bf16.msra.mxu1 %v9602_v43  ;;  %8765 = vmatpush3.bf16.msra.mxu0 %v9611_v47 }
 0x418   :  { %8726 = vmatprep.subr.bf16.mxu1 %v9603_v49  ;;  %v10293_v61 = vpop.f32.mrb[64].mxu0  ;;  %8766 = vmatprep.subr.bf16.mxu0 %v9613_v58 }
 0x419   :  { %v1599_v62 = vpop.f32.mrb[65].mxu0 }
 0x41a   :  { %8723 = vmatmul.mubr.msk.bf16.vlgmr.msra.gmra.mrb[48].mxu1 %vm576_vm6, %v1646_v22  ;;  %v10299_v0 = vpop.f32.mrb[66].mxu0 }
 0x41b   :  { %8727 = vmatpush3.bf16.msra.mxu1 %v9603_v49  ;;  %8734 = vmatprep.mubr.msk.bf16.mxu1 %vm576_vm6, %v1648_v28  ;;  %v1654_v1 = vpack.c.bf16 %v10299_v0, %v10293_v61  ;;  %v1602_v2 = vpop.f32.mrb[67].mxu0  ;;  %v9614_v28 = vld [vmem:[%s11538_s5 + $0x90] sm:$0xff]  }
 0x41c   :  { %8728 = vmatprep.subr.bf16.mxu1 %v9605_v60  ;;  %8767 = vmatpush3.bf16.msra.mxu0 %v9613_v58  ;;  %v1653_v5 = vpack.c.bf16 %v1602_v2, %v1599_v62 }
 0x41d   :  { %8768 = vmatprep.subr.bf16.mxu0 %v9615_v63 }
 0x41e   :  { %v2119_v7 = vrot.slane %v1653_v5, 4 }
 0x41f   :  { %8729 = vmatpush3.bf16.msra.mxu1 %v9605_v60 }
 0x420   :  { %8730 = vmatprep.subr.bf16.mxu1 %v9606_v3  ;;  %8769 = vmatpush3.bf16.msra.mxu0 %v9615_v63  ;;  %v2120_v9 = vsel %vm548_vm7, %v2118_v4, %v2119_v7  ;;  %v8696_v10 = vpop.f32.mrb[68].mxu0 }
 0x421   :  { %8770 = vmatprep.mubr.msk.bf16.mxu0 %vm576_vm6, %v2120_v9  ;;  %8786 = vmatprep.subr.bf16.mxu0 %v9617_v6  ;;  %v1615_v12 = vpop.f32.mrb[69].mxu0 }
 0x422   :  { %v8697_v13 = vpop.f32.mrb[70].mxu0 }
 0x423   :  { %8731 = vmatpush3.bf16.msra.mxu1 %v9606_v3  ;;  %8771 = vmatmul.mubr.msk.bf16.vlgmr.msra.gmra.mrb[80].mxu0 %vm576_vm6, %v2119_v7  ;;  %v1656_v14 = vpack.c.bf16 %v8697_v13, %v8696_v10  ;;  %v1618_v15 = vpop.f32.mrb[71].mxu0 }
 0x424   :  { %8732 = vmatprep.subr.bf16.mxu1 %v9608_v8  ;;  %8787 = vmatpush3.bf16.msra.mxu0 %v9617_v6  ;;  %v1655_v17 = vpack.c.bf16 %v1618_v15, %v1615_v12 }
 0x425   :  { %8788 = vmatprep.subr.bf16.mxu0 %v9619_v11  ;;  %v2302_v18 = vrot.slane %v1656_v14, 4 }
 0x426   :  { %v2301_v20 = vrot.slane %v1655_v17, 4 }
 0x427   :  { %8733 = vmatpush3.bf16.msra.mxu1 %v9608_v8 }
 0x428   :  { %8750 = vmatprep.subr.bf16.mxu1 %v9610_v16  ;;  %8789 = vmatpush3.bf16.msra.mxu0 %v9619_v11  ;;  %v2303_v22 = vsel %vm548_vm7, %v2301_v20, %v2302_v18  ;;  %v8700_v23 = vpop.f32.mrb[72].mxu0 }
 0x429   :  { %8790 = vmatprep.subr.bf16.mxu0 %v9621_v19  ;;  %8794 = vmatprep.mubr.msk.bf16.mxu0 %vm576_vm6, %v2303_v22  ;;  %v1631_v25 = vpop.f32.mrb[73].mxu0  ;;  %v1658_v40 = vpack.c.bf16 %v8700_v23, %v8700_v23 }
 0x42a   :  { %8735 = vmatmul.mubr.msk.bf16.vlgmr.msra.gmra.mrb[52].mxu1 %vm576_vm6, %v10264_v41  ;;  %v8701_v26 = vpop.f32.mrb[74].mxu0 }
 0x42b   :  { %8751 = vmatpush3.bf16.msra.mxu1 %v9610_v16  ;;  %8758 = vmatprep.mubr.msk.bf16.mxu1 %vm576_vm6, %v1651_v59  ;;  %v1634_v27 = vpop.f32.mrb[75].mxu0 }
 0x42c   :  { %8752 = vmatprep.subr.bf16.mxu1 %v9612_v21  ;;  %8791 = vmatpush3.bf16.msra.mxu0 %v9621_v19  ;;  %v1657_v29 = vpack.c.bf16 %v1634_v27, %v1631_v25 }
 0x42d   :  { %8792 = vmatprep.subr.bf16.mxu0 %v9623_v24 }
 0x42f   :  { %8753 = vmatpush3.bf16.msra.mxu1 %v9612_v21 }
 0x430   :  { %8754 = vmatprep.subr.bf16.mxu1 %v9614_v28  ;;  %8793 = vmatpush3.bf16.msra.mxu0 %v9623_v24 }
 0x433   :  { %8755 = vmatpush3.bf16.msra.mxu1 %v9614_v28  ;;  %8795 = vmatmul.mubr.msk.bf16.vlgmr.msra.gmra.mrb[84].mxu0 %vm576_vm6, %v2302_v18 }
 0x434   :  { %8756 = vmatprep.subr.bf16.mxu1 %v9616_v30  ;;  %8814 = vmatprep.mubr.msk.bf16.mxu0 %vm1455_vm8, %v10350_v32 }
 0x437   :  { %8757 = vmatpush3.bf16.msra.mxu1 %v9616_v30 }
 0x438   :  { %8774 = vmatprep.subr.bf16.mxu1 %v9618_v31 }
 0x43a   :  { %8759 = vmatmul.mubr.msk.bf16.vlgmr.msra.gmra.mrb[56].mxu1 %vm576_vm6, %v10281_v52 }
 0x43b   :  { %8775 = vmatpush3.bf16.msra.mxu1 %v9618_v31  ;;  %8782 = vmatprep.mubr.msk.bf16.mxu1 %vm576_vm6, %v1654_v1 }
 0x43c   :  { %8776 = vmatprep.subr.bf16.mxu1 %v9620_v33 }
 0x43f   :  { %8777 = vmatpush3.bf16.msra.mxu1 %v9620_v33 }
 0x440   :  { %8778 = vmatprep.subr.bf16.mxu1 %v9622_v34 }
 0x443   :  { %8779 = vmatpush3.bf16.msra.mxu1 %v9622_v34 }
 0x444   :  { %8780 = vmatprep.subr.bf16.mxu1 %v9624_v35 }
 0x447   :  { %8781 = vmatpush3.bf16.msra.mxu1 %v9624_v35 }
 0x448   :  { %8798 = vmatprep.subr.bf16.mxu1 %v9625_v36 }
 0x44a   :  { %8783 = vmatmul.mubr.msk.bf16.vlgmr.msra.gmra.mrb[60].mxu1 %vm576_vm6, %v1655_v17 }
 0x44b   :  { %8799 = vmatpush3.bf16.msra.mxu1 %v9625_v36  ;;  %8806 = vmatprep.mubr.msk.bf16.mxu1 %vm576_vm6, %v1657_v29 }
 0x44c   :  { %8800 = vmatprep.subr.bf16.mxu1 %v9626_v37 }
 0x44f   :  { %8801 = vmatpush3.bf16.msra.mxu1 %v9626_v37 }
 0x450   :  { %8802 = vmatprep.subr.bf16.mxu1 %v9627_v38 }
 0x453   :  { %8803 = vmatpush3.bf16.msra.mxu1 %v9627_v38  ;;  %v7638_v38 = vld [vmem:[%s11536_s6 + $0x2] ss:$0 sm:$0xff] }
 0x454   :  { %8804 = vmatprep.subr.bf16.mxu1 %v9628_v39 }
 0x457   :  { %8805 = vmatpush3.bf16.msra.mxu1 %v9628_v39 }
 0x45a   :  { %8807 = vmatmul.mubr.msk.bf16.vlgmr.msra.gmra.mrb[64].mxu1 %vm576_vm6, %v1658_v40 }
 0x4dd   :  { %v8712_v41 = vpop.f32.mrb[44].mxu1 }
 0x4de   :  { %v1744_v42 = vpop.f32.mrb[45].mxu1 }
 0x4df   :  { %v8713_v43 = vpop.f32.mrb[46].mxu1 }
 0x4e0   :  { %v1747_v44 = vpop.f32.mrb[47].mxu1 }
 0x4e5   :  { %v8748_v45 = vpop.f32.mrb[76].mxu0 }
 0x4e6   :  { %v2002_v46 = vpop.f32.mrb[77].mxu0 }
 0x4e7   :  { %v8749_v47 = vpop.f32.mrb[78].mxu0 }
 0x4e8   :  { %v2005_v48 = vpop.f32.mrb[79].mxu0 }
 0x4ed   :  { %v8724_v49 = vpop.f32.mrb[48].mxu1 }
 0x4ee   :  { %v1831_v50 = vadd.f32 %v8724_v49, %v8712_v41  ;;  %v1822_v52 = vpop.f32.mrb[49].mxu1 }
 0x4ef   :  { %v1823_v57 = vadd.f32 %v1822_v52, %v1744_v42  ;;  %v8725_v58 = vpop.f32.mrb[50].mxu1 }
 0x4f0   :  { %v1825_v59 = vpop.f32.mrb[51].mxu1  ;;  %v10392_v58 = vld [vmem:[%s11537_s4 + $0x8] sm:$0xff]  }
 0x4f1   :  { %v1826_v60 = vadd.f32 %v1825_v59, %v1747_v44  ;;  %v10399_v59 = vld [vmem:[%s11537_s4 + $0x10] sm:$0xff]  }
 0x4f6   :  { %v8772_v61 = vpop.f32.mrb[80].mxu0 }
 0x4f7   :  { %v2185_v62 = vpop.f32.mrb[81].mxu0 }
 0x4f8   :  { %v8773_v63 = vpop.f32.mrb[82].mxu0 }
 0x4f9   :  { %v2188_v0 = vpop.f32.mrb[83].mxu0  ;;  %v10427_v63 = vld [vmem:[%s11537_s4 + $0x30] sm:$0xff]  }
 0x4fd   :  { %v8736_v1 = vpop.f32.mrb[52].mxu1 }
 0x4fe   :  { %v1924_v2 = vadd.f32 %v8736_v1, %v1831_v50  ;;  %v1908_v3 = vpop.f32.mrb[53].mxu1  ;;  %v10441_v1 = vld [vmem:[%s11537_s4 + $0x40] sm:$0xff]  }
 0x4ff   :  { %v1922_v4 = vadd.f32 %v1908_v3, %v1823_v57  ;;  %v8737_v5 = vpop.f32.mrb[54].mxu1  ;;  %v10455_v3 = vld [vmem:[%s11537_s4 + $0x50] sm:$0xff]  }
 0x500   :  { %v1911_v6 = vpop.f32.mrb[55].mxu1  ;;  %v2018_v7 = vadd.f32 %v8748_v45, %v1924_v2  ;;  %v10448_v2 = vld [vmem:[%s11537_s4 + $0x48] sm:$0xff]   ;;  %v10469_v5 = vld [vmem:[%s11537_s4 + $0x60] sm:$0xff]  }
 0x501   :  { %v1923_v8 = vadd.f32 %v1911_v6, %v1826_v60  ;;  %v2016_v9 = vadd.f32 %v2002_v46, %v1922_v4  ;;  %v10406_v60 = vld [vmem:[%s11537_s4 + $0x18] sm:$0xff]   ;;  %v10476_v6 = vld [vmem:[%s11537_s4 + $0x68] ss:$0 sps:$4 sm:$0xff]  }
 0x502   :  { %v10462_v4 = vld [vmem:[%s11537_s4 + $0x58] sm:$0xff]  }
 0x503   :  { %v2017_v10 = vadd.f32 %v2005_v48, %v1923_v8  ;;  %v9630_v8 = vld [vmem:[%s11538_s5 + $0x148] sm:$0xff]  }
 0x506   :  { %v8796_v11 = vpop.f32.mrb[84].mxu0 }
 0x507   :  { %v2368_v12 = vpop.f32.mrb[85].mxu0 }
 0x508   :  { %v8797_v13 = vpop.f32.mrb[86].mxu0 }
 0x509   :  { %v2371_v14 = vpop.f32.mrb[87].mxu0  ;;  %v9636_v13 = vld [vmem:[%s11538_s5 + $0x188] sm:$0xff]  }
 0x50d   :  { %v8760_v15 = vpop.f32.mrb[56].mxu1 }
 0x50e   :  { %v2107_v16 = vadd.f32 %v8760_v15, %v2018_v7  ;;  %v2091_v17 = vpop.f32.mrb[57].mxu1  ;;  %v9629_v7 = vld [vmem:[%s11538_s5 + $0x140] sm:$0xff]   ;;  %v9643_v15 = vld [vmem:[%s11538_s5 + $0x198] sm:$0xff]  }
 0x50f   :  { %v2105_v18 = vadd.f32 %v2091_v17, %v2016_v9  ;;  %v8761_v19 = vpop.f32.mrb[58].mxu1  ;;  %8842 = vmatprep.subr.bf16.mxu1 %v9629_v7  ;;  %v9632_v9 = vld [vmem:[%s11538_s5 + $0x150] sm:$0xff]  }
 0x510   :  { %v2201_v20 = vadd.f32 %v8772_v61, %v2107_v16  ;;  %v2094_v21 = vpop.f32.mrb[59].mxu1  ;;  %v10413_v61 = vld [vmem:[%s11537_s4 + $0x20] sm:$0xff]   ;;  %8843 = vmatpush3.bf16.msra.mxu1 %v9629_v7  ;;  %v9649_v7 = vld [vmem:[%s11538_s5 + $0x1d0] sm:$0xff]  }
 0x511   :  { %v2106_v22 = vadd.f32 %v2094_v21, %v2017_v10  ;;  %v2199_v23 = vadd.f32 %v2185_v62, %v2105_v18  ;;  %v10420_v62 = vld [vmem:[%s11537_s4 + $0x28] sm:$0xff]   ;;  %8844 = vmatprep.subr.bf16.mxu1 %v9630_v8  ;;  %v9631_v10 = vld [vmem:[%s11538_s5 + $0x180] sm:$0xff]  }
 0x512   :  { %v9645_v16 = vld [vmem:[%s11538_s5 + $0x1c0] sm:$0xff]  }
 0x513   :  { %v2200_v24 = vadd.f32 %v2188_v0, %v2106_v22  ;;  %v10434_v0 = vld [vmem:[%s11537_s4 + $0x38] sm:$0xff]  }
 0x514   :  { %8845 = vmatpush3.bf16.msra.mxu1 %v9630_v8  ;;  %v9641_v8 = vld [vmem:[%s11538_s5 + $0x168] sm:$0xff]  }
 0x515   :  { %8846 = vmatprep.subr.bf16.mxu1 %v9632_v9 }
 0x518   :  { %8847 = vmatpush3.bf16.msra.mxu1 %v9632_v9 }
 0x51d   :  { %v8784_v25 = vpop.f32.mrb[60].mxu1 }
 0x51e   :  { %v2290_v26 = vadd.f32 %v8784_v25, %v2201_v20  ;;  %v2274_v27 = vpop.f32.mrb[61].mxu1 }
 0x51f   :  { %v2288_v28 = vadd.f32 %v2274_v27, %v2199_v23  ;;  %v8785_v29 = vpop.f32.mrb[62].mxu1 }
 0x520   :  { %v2277_v30 = vpop.f32.mrb[63].mxu1  ;;  %v2384_v31 = vadd.f32 %v8796_v11, %v2290_v26  ;;  %v9633_v11 = vld [vmem:[%s11538_s5 + $0x158] sm:$0xff]  }
 0x521   :  { %v2289_v33 = vadd.f32 %v2277_v30, %v2200_v24  ;;  %v2382_v34 = vadd.f32 %v2368_v12, %v2288_v28  ;;  %8848 = vmatprep.subr.bf16.mxu1 %v9633_v11  ;;  %v9634_v12 = vld [vmem:[%s11538_s5 + $0x120] sm:$0xff]  }
 0x522   :  { %8849 = vmatpush3.bf16.msra.mxu1 %v9633_v11  ;;  %v9651_v11 = vld [vmem:[%s11538_s5 + $0x1d8] sm:$0xff]  }
 0x523   :  { %v2383_v35 = vadd.f32 %v2371_v14, %v2289_v33  ;;  %8854 = vmatprep.subr.bf16.mxu1 %v9634_v12  ;;  %v9640_v14 = vld [vmem:[%s11538_s5 + $0x190] sm:$0xff]   ;;  %v9635_v33 = vld [vmem:[%s11538_s5 + $0x128] sm:$0xff]  }
 0x52d   :  { %v8808_v36 = vpop.f32.mrb[64].mxu1 }
 0x52e   :  { %v2473_v37 = vadd.f32 %v8808_v36, %v2384_v31  ;;  %v2457_v39 = vpop.f32.mrb[65].mxu1 }
 0x52f   :  { %v2471_v40 = vadd.f32 %v2457_v39, %v2382_v34  ;;  %v8809_v41 = vpop.f32.mrb[66].mxu1  ;;  %v9637_v39 = vld [vmem:[%s11538_s5 + $0x130] sm:$0xff]  }
 0x530   :  { %v2460_v42 = vpop.f32.mrb[67].mxu1  ;;  %v2481_v43 = vadd.f32 %v7638_v38, %v2473_v37 }
 0x531   :  { %v2479_v44 = vadd.f32 %v7638_v38, %v2471_v40  ;;  %v2472_v45 = vadd.f32 %v2460_v42, %v2383_v35 }
 0x532   :  { %v2484_v47 = vmax.f32 %v2481_v43, 0.0  ;;  %v9638_v43 = vld [vmem:[%s11538_s5 + $0x138] sm:$0xff]  }
 0x533   :  { %v2480_v46 = vadd.f32 %v7638_v38, %v2472_v45  ;;  %v2482_v48 = vmax.f32 %v2479_v44, 0.0 }
 0x534   :  { %v2486_v52 = vpack.c.bf16 %v2484_v47, %v2484_v47 }
 0x535   :  { %v2483_v49 = vmax.f32 %v2480_v46, 0.0  ;;  %v9647_v46 = vld [vmem:[%s11538_s5 + $0x1c8] sm:$0xff]  }
 0x536   :  { %v2488_v57 = vsel %vm368_vm5, %v2486_v52, 0 }
 0x537   :  { %v2485_v50 = vpack.c.bf16 %v2483_v49, %v2482_v48 }
 0x539   :  { %8810 = vmatprep.subr.bf16.mxu0 %v2485_v50 }
 0x53a   :  { %8811 = vmatpush3.bf16.msra.mxu0 %v2485_v50 }
 0x53b   :  { %9512 = vmatprep.subr.msk.bf16.mxu0 %vm368_vm5, %v2486_v52  ;;  %v9639_v52 = vld [vmem:[%s11538_s5 + $0x160] sm:$0xff]  }
 0x53e   :  { %8813 = vmatpush3.bf16.msra.mxu0 %v2488_v57 }
 0x53f   :  { %8878 = vmatprep.subr.bf16.mxu0 %v9631_v10 }
 0x541   :  { %8815 = vmatmul.mubr.msk.bf16.vlgmr.msra.gmra.mrb[88].mxu0 %vm1455_vm8, %v10392_v58 }
 0x542   :  { %8818 = vmatprep.mubr.msk.bf16.mxu0 %vm1455_vm8, %v10399_v59  ;;  %8879 = vmatpush3.bf16.msra.mxu0 %v9631_v10 }
 0x543   :  { %8880 = vmatprep.subr.bf16.mxu0 %v9636_v13 }
 0x546   :  { %8881 = vmatpush3.bf16.msra.mxu0 %v9636_v13 }
 0x547   :  { %8882 = vmatprep.subr.bf16.mxu0 %v9640_v14 }
 0x549   :  { %8819 = vmatmul.mubr.msk.bf16.gmra.mrb[92].mxu0 %vm1455_vm8, %v10406_v60 }
 0x54a   :  { %8822 = vmatprep.mubr.msk.bf16.mxu0 %vm1455_vm8, %v10413_v61  ;;  %8883 = vmatpush3.bf16.msra.mxu0 %v9640_v14 }
 0x54b   :  { %8884 = vmatprep.subr.bf16.mxu0 %v9643_v15 }
 0x54e   :  { %8885 = vmatpush3.bf16.msra.mxu0 %v9643_v15  ;;  %v9642_v15 = vld [vmem:[%s11538_s5 + $0x170] sm:$0xff]  }
 0x54f   :  { %8902 = vmatprep.subr.bf16.mxu0 %v9645_v16 }
 0x551   :  { %8823 = vmatmul.mubr.msk.bf16.gmra.mrb[96].mxu0 %vm1455_vm8, %v10420_v62 }
 0x552   :  { %8826 = vmatprep.mubr.msk.bf16.mxu0 %vm1455_vm8, %v10427_v63 }
 0x559   :  { %8827 = vmatmul.mubr.msk.bf16.gmra.mrb[100].mxu0 %vm1455_vm8, %v10434_v0 }
 0x55a   :  { %8830 = vmatprep.mubr.msk.bf16.mxu0 %vm1455_vm8, %v10441_v1 }
 0x561   :  { %8831 = vmatmul.mubr.msk.bf16.gmra.mrb[104].mxu0 %vm1455_vm8, %v10448_v2 }
 0x562   :  { %8834 = vmatprep.mubr.msk.bf16.mxu0 %vm1455_vm8, %v10455_v3 }
 0x569   :  { %8835 = vmatmul.mubr.msk.bf16.gmra.mrb[108].mxu0 %vm1455_vm8, %v10462_v4 }
 0x56a   :  { %8838 = vmatprep.mubr.msk.bf16.mxu0 %vm1455_vm8, %v10469_v5 }
 0x571   :  { %8839 = vmatmul.mubr.msk.bf16.gmra.mrb[112].mxu0 %vm1455_vm8, %v10476_v6 }
 0x614   :  { %v8816_v17 = vpop.f32.mrb[88].mxu0 }
 0x615   :  { %v2524_v18 = vpop.f32.mrb[89].mxu0 }
 0x616   :  { %v8817_v19 = vpop.f32.mrb[90].mxu0 }
 0x617   :  { %v2635_v20 = vpack.c.bf16 %v8817_v19, %v8816_v17  ;;  %v2527_v21 = vpop.f32.mrb[91].mxu0 }
 0x618   :  { %v2634_v22 = vpack.c.bf16 %v2527_v21, %v2524_v18  ;;  %v9653_v18 = vld [vmem:[%s11538_s5 + $0x200] sm:$0xff]  }
 0x619   :  { %v2666_v29 = vrot.slane %v2635_v20, 4 }
 0x61c   :  { %v8820_v23 = vpop.f32.mrb[92].mxu0 }
 0x61d   :  { %v2540_v24 = vpop.f32.mrb[93].mxu0 }
 0x61e   :  { %v8821_v25 = vpop.f32.mrb[94].mxu0 }
 0x61f   :  { %v2637_v26 = vpack.c.bf16 %v8821_v25, %v8820_v23  ;;  %v2543_v27 = vpop.f32.mrb[95].mxu0  ;;  %v9655_v23 = vld [vmem:[%s11538_s5 + $0x208] sm:$0xff]  }
 0x620   :  { %v2636_v28 = vpack.c.bf16 %v2543_v27, %v2540_v24 }
 0x622   :  { %v2667_v30 = vrot.slane %v2636_v28, 4  ;;  %v9646_v28 = vld [vmem:[%s11538_s5 + $0x1a0] sm:$0xff]  }
 0x624   :  { %v2668_v31 = vsel %vm548_vm7, %v2666_v29, %v2667_v30  ;;  %v8824_v34 = vpop.f32.mrb[96].mxu0 }
 0x625   :  { %8850 = vmatprep.mubr.msk.bf16.mxu1 %vm576_vm6, %v2668_v31  ;;  %v2556_v35 = vpop.f32.mrb[97].mxu0  ;;  %v9657_v31 = vld [vmem:[%s11538_s5 + $0x210] sm:$0xff]  }
 0x626   :  { %8851 = vmatmul.mubr.msk.bf16.vlgmr.msra.gmra.mrb[68].mxu1 %vm576_vm6, %v2667_v30  ;;  %v8825_v36 = vpop.f32.mrb[98].mxu0 }
 0x627   :  { %8855 = vmatpush3.bf16.msra.mxu1 %v9634_v12  ;;  %8862 = vmatprep.mubr.msk.bf16.mxu1 %vm576_vm6, %v2634_v22  ;;  %v2639_v37 = vpack.c.bf16 %v8825_v36, %v8824_v34  ;;  %v2559_v38 = vpop.f32.mrb[99].mxu0  ;;  %v9648_v34 = vld [vmem:[%s11538_s5 + $0x1a8] sm:$0xff]  }
 0x628   :  { %8856 = vmatprep.subr.bf16.mxu1 %v9635_v33  ;;  %v10520_v40 = vpack.c.bf16 %v2559_v38, %v2556_v35 }
 0x629   :  { %v2925_v41 = vrot.slane %v2639_v37, 4  ;;  %v9659_v37 = vld [vmem:[%s11538_s5 + $0x218] sm:$0xff]  }
 0x62a   :  { %v2924_v42 = vrot.slane %v10520_v40, 4 }
 0x62b   :  { %8857 = vmatpush3.bf16.msra.mxu1 %v9635_v33 }
 0x62c   :  { %8858 = vmatprep.subr.bf16.mxu1 %v9637_v39  ;;  %v2926_v44 = vsel %vm548_vm7, %v2924_v42, %v2925_v41  ;;  %v8828_v45 = vpop.f32.mrb[100].mxu0  ;;  %v9650_v42 = vld [vmem:[%s11538_s5 + $0x1b0] sm:$0xff]  }
 0x62d   :  { %8886 = vmatprep.mubr.msk.bf16.mxu0 %vm576_vm6, %v2926_v44  ;;  %v10531_v47 = vpop.f32.mrb[101].mxu0  ;;  %v9652_v44 = vld [vmem:[%s11538_s5 + $0x1b8] sm:$0xff]  }
 0x62e   :  { %8887 = vmatmul.mubr.msk.bf16.vlgmr.msra.gmra.mrb[116].mxu0 %vm576_vm6, %v2925_v41  ;;  %v8829_v48 = vpop.f32.mrb[102].mxu0 }
 0x62f   :  { %8859 = vmatpush3.bf16.msra.mxu1 %v9637_v39  ;;  %8903 = vmatpush3.bf16.msra.mxu0 %v9645_v16  ;;  %v10534_v49 = vpack.c.bf16 %v8829_v48, %v8828_v45  ;;  %v10536_v50 = vpop.f32.mrb[103].mxu0  ;;  %v9656_v45 = vld [vmem:[%s11538_s5 + $0x1e8] sm:$0xff]  }
 0x630   :  { %8860 = vmatprep.subr.bf16.mxu1 %v9638_v43  ;;  %8904 = vmatprep.subr.bf16.mxu0 %v9647_v46  ;;  %v2640_v57 = vpack.c.bf16 %v10536_v50, %v10531_v47  ;;  %v9661_v47 = vld [vmem:[%s11538_s5 + $0x220] sm:$0xff]   ;;  %v9662_v48 = vld [vmem:[%s11538_s5 + $0x228] sm:$0xff]   ;;  %v9664_v50 = vld [vmem:[%s11538_s5 + $0x238] sm:$0xff]  }
 0x631   :  { %v3107_v16 = vrot.slane %v10534_v49, 4 }
 0x633   :  { %8861 = vmatpush3.bf16.msra.mxu1 %v9638_v43  ;;  %8905 = vmatpush3.bf16.msra.mxu0 %v9647_v46  ;;  %v9660_v46 = vld [vmem:[%s11538_s5 + $0x1f8] sm:$0xff]  }
 0x634   :  { %8866 = vmatprep.subr.bf16.mxu1 %v9639_v52  ;;  %v10549_v9 = vpop.f32.mrb[104].mxu0  ;;  %8906 = vmatprep.subr.bf16.mxu0 %v9649_v7 }
 0x635   :  { %v2588_v10 = vpop.f32.mrb[105].mxu0 }
 0x636   :  { %8863 = vmatmul.mubr.msk.bf16.vlgmr.msra.gmra.mrb[72].mxu1 %vm576_vm6, %v2635_v20  ;;  %v10555_v12 = vpop.f32.mrb[106].mxu0  ;;  %v9644_v20 = vld [vmem:[%s11538_s5 + $0x178] sm:$0xff]  }
 0x637   :  { %8867 = vmatpush3.bf16.msra.mxu1 %v9639_v52  ;;  %8874 = vmatprep.mubr.msk.bf16.mxu1 %vm576_vm6, %v2637_v26  ;;  %v2643_v13 = vpack.c.bf16 %v10555_v12, %v10549_v9  ;;  %v2591_v14 = vpop.f32.mrb[107].mxu0 }
 0x638   :  { %8868 = vmatprep.subr.bf16.mxu1 %v9641_v8  ;;  %8907 = vmatpush3.bf16.msra.mxu0 %v9649_v7  ;;  %v2642_v17 = vpack.c.bf16 %v2591_v14, %v2588_v10 }
 0x639   :  { %8908 = vmatprep.subr.bf16.mxu0 %v9651_v11 }
 0x63a   :  { %v3108_v19 = vrot.slane %v2642_v17, 4 }
 0x63b   :  { %8869 = vmatpush3.bf16.msra.mxu1 %v9641_v8 }
 0x63c   :  { %8870 = vmatprep.subr.bf16.mxu1 %v9642_v15  ;;  %8909 = vmatpush3.bf16.msra.mxu0 %v9651_v11  ;;  %v3109_v21 = vsel %vm548_vm7, %v3107_v16, %v3108_v19  ;;  %v8836_v22 = vpop.f32.mrb[108].mxu0 }
 0x63d   :  { %8910 = vmatprep.mubr.msk.bf16.mxu0 %vm576_vm6, %v3109_v21  ;;  %8926 = vmatprep.subr.bf16.mxu0 %v9653_v18  ;;  %v2604_v24 = vpop.f32.mrb[109].mxu0 }
 0x63e   :  { %v8837_v25 = vpop.f32.mrb[110].mxu0 }
 0x63f   :  { %8871 = vmatpush3.bf16.msra.mxu1 %v9642_v15  ;;  %8911 = vmatmul.mubr.msk.bf16.vlgmr.msra.gmra.mrb[120].mxu0 %vm576_vm6, %v3108_v19  ;;  %v2645_v26 = vpack.c.bf16 %v8837_v25, %v8836_v22  ;;  %v2607_v27 = vpop.f32.mrb[111].mxu0 }
 0x640   :  { %8872 = vmatprep.subr.bf16.mxu1 %v9644_v20  ;;  %8927 = vmatpush3.bf16.msra.mxu0 %v9653_v18  ;;  %v2644_v29 = vpack.c.bf16 %v2607_v27, %v2604_v24 }
 0x641   :  { %8928 = vmatprep.subr.bf16.mxu0 %v9655_v23  ;;  %v3291_v30 = vrot.slane %v2645_v26, 4 }
 0x642   :  { %v3290_v33 = vrot.slane %v2644_v29, 4 }
 0x643   :  { %8873 = vmatpush3.bf16.msra.mxu1 %v9644_v20 }
 0x644   :  { %8890 = vmatprep.subr.bf16.mxu1 %v9646_v28  ;;  %8929 = vmatpush3.bf16.msra.mxu0 %v9655_v23  ;;  %v3292_v35 = vsel %vm548_vm7, %v3290_v33, %v3291_v30  ;;  %v8840_v36 = vpop.f32.mrb[112].mxu0 }
 0x645   :  { %8930 = vmatprep.subr.bf16.mxu0 %v9657_v31  ;;  %8934 = vmatprep.mubr.msk.bf16.mxu0 %vm576_vm6, %v3292_v35  ;;  %v2620_v38 = vpop.f32.mrb[113].mxu0  ;;  %v2647_v52 = vpack.c.bf16 %v8840_v36, %v8840_v36 }
 0x646   :  { %8875 = vmatmul.mubr.msk.bf16.vlgmr.msra.gmra.mrb[76].mxu1 %vm576_vm6, %v10520_v40  ;;  %v8841_v39 = vpop.f32.mrb[114].mxu0  ;;  %v9654_v40 = vld [vmem:[%s11538_s5 + $0x1e0] sm:$0xff]  }
 0x647   :  { %8891 = vmatpush3.bf16.msra.mxu1 %v9646_v28  ;;  %8898 = vmatprep.mubr.msk.bf16.mxu1 %vm576_vm6, %v2640_v57  ;;  %v2623_v41 = vpop.f32.mrb[115].mxu0 }
 0x648   :  { %8892 = vmatprep.subr.bf16.mxu1 %v9648_v34  ;;  %8931 = vmatpush3.bf16.msra.mxu0 %v9657_v31  ;;  %v2646_v43 = vpack.c.bf16 %v2623_v41, %v2620_v38 }
 0x649   :  { %8932 = vmatprep.subr.bf16.mxu0 %v9659_v37 }
 0x64b   :  { %8893 = vmatpush3.bf16.msra.mxu1 %v9648_v34 }
 0x64c   :  { %8894 = vmatprep.subr.bf16.mxu1 %v9650_v42  ;;  %8933 = vmatpush3.bf16.msra.mxu0 %v9659_v37 }
 0x64f   :  { %8895 = vmatpush3.bf16.msra.mxu1 %v9650_v42  ;;  %8935 = vmatmul.mubr.msk.bf16.vlgmr.msra.gmra.mrb[124].mxu0 %vm576_vm6, %v3291_v30 }
 0x650   :  { %8896 = vmatprep.subr.bf16.mxu1 %v9652_v44  ;;  %8954 = vmatprep.mubr.msk.bf16.mxu0 %vm1455_vm8, %v10350_v32  ;;  %v9658_v32 = vld [vmem:[%s11538_s5 + $0x1f0] sm:$0xff]  }
 0x653   :  { %8897 = vmatpush3.bf16.msra.mxu1 %v9652_v44 }
 0x654   :  { %8914 = vmatprep.subr.bf16.mxu1 %v9654_v40 }
 0x656   :  { %8899 = vmatmul.mubr.msk.bf16.vlgmr.msra.gmra.mrb[80].mxu1 %vm576_vm6, %v10534_v49  ;;  %v9663_v49 = vld [vmem:[%s11538_s5 + $0x230] sm:$0xff]  }
 0x657   :  { %8915 = vmatpush3.bf16.msra.mxu1 %v9654_v40  ;;  %8922 = vmatprep.mubr.msk.bf16.mxu1 %vm576_vm6, %v2643_v13 }
 0x658   :  { %8916 = vmatprep.subr.bf16.mxu1 %v9656_v45 }
 0x65b   :  { %8917 = vmatpush3.bf16.msra.mxu1 %v9656_v45 }
 0x65c   :  { %8918 = vmatprep.subr.bf16.mxu1 %v9658_v32 }
 0x65f   :  { %8919 = vmatpush3.bf16.msra.mxu1 %v9658_v32 }
 0x660   :  { %8920 = vmatprep.subr.bf16.mxu1 %v9660_v46 }
 0x663   :  { %8921 = vmatpush3.bf16.msra.mxu1 %v9660_v46 }
 0x664   :  { %8938 = vmatprep.subr.bf16.mxu1 %v9661_v47 }
 0x666   :  { %8923 = vmatmul.mubr.msk.bf16.vlgmr.msra.gmra.mrb[84].mxu1 %vm576_vm6, %v2644_v29 }
 0x667   :  { %8939 = vmatpush3.bf16.msra.mxu1 %v9661_v47  ;;  %8946 = vmatprep.mubr.msk.bf16.mxu1 %vm576_vm6, %v2646_v43 }
 0x668   :  { %8940 = vmatprep.subr.bf16.mxu1 %v9662_v48 }
 0x66b   :  { %8941 = vmatpush3.bf16.msra.mxu1 %v9662_v48 }
 0x66c   :  { %8942 = vmatprep.subr.bf16.mxu1 %v9663_v49 }
 0x66f   :  { %8943 = vmatpush3.bf16.msra.mxu1 %v9663_v49 }
 0x670   :  { %8944 = vmatprep.subr.bf16.mxu1 %v9664_v50 }
 0x673   :  { %8945 = vmatpush3.bf16.msra.mxu1 %v9664_v50 }
 0x676   :  { %8947 = vmatmul.mubr.msk.bf16.vlgmr.msra.gmra.mrb[88].mxu1 %vm576_vm6, %v2647_v52 }
 0x6f9   :  { %v8852_v57 = vpop.f32.mrb[68].mxu1 }
 0x6fa   :  { %v2733_v7 = vpop.f32.mrb[69].mxu1 }
 0x6fb   :  { %v8853_v8 = vpop.f32.mrb[70].mxu1 }
 0x6fc   :  { %v2736_v9 = vpop.f32.mrb[71].mxu1 }
 0x701   :  { %v8888_v10 = vpop.f32.mrb[116].mxu0 }
 0x702   :  { %v2991_v11 = vpop.f32.mrb[117].mxu0 }
 0x703   :  { %v8889_v12 = vpop.f32.mrb[118].mxu0 }
 0x704   :  { %v2994_v13 = vpop.f32.mrb[119].mxu0 }
 0x709   :  { %v8864_v14 = vpop.f32.mrb[72].mxu1 }
 0x70a   :  { %v2820_v15 = vadd.f32 %v8864_v14, %v8852_v57  ;;  %v2811_v16 = vpop.f32.mrb[73].mxu1  ;;  %v7707_v14 = vld [vmem:[%s11536_s6 + $0x3] ss:$0 sm:$0xff] }
 0x70b   :  { %v2812_v17 = vadd.f32 %v2811_v16, %v2733_v7  ;;  %v8865_v18 = vpop.f32.mrb[74].mxu1 }
 0x70c   :  { %v2814_v19 = vpop.f32.mrb[75].mxu1 }
 0x70d   :  { %v2815_v20 = vadd.f32 %v2814_v19, %v2736_v9 }
 0x712   :  { %v8912_v21 = vpop.f32.mrb[120].mxu0 }
 0x713   :  { %v3174_v22 = vpop.f32.mrb[121].mxu0 }
 0x714   :  { %v8913_v23 = vpop.f32.mrb[122].mxu0 }
 0x715   :  { %v3177_v24 = vpop.f32.mrb[123].mxu0 }
 0x719   :  { %v8876_v25 = vpop.f32.mrb[76].mxu1 }
 0x71a   :  { %v2913_v26 = vadd.f32 %v8876_v25, %v2820_v15  ;;  %v2897_v27 = vpop.f32.mrb[77].mxu1 }
 0x71b   :  { %v2911_v28 = vadd.f32 %v2897_v27, %v2812_v17  ;;  %v8877_v29 = vpop.f32.mrb[78].mxu1 }
 0x71c   :  { %v2900_v30 = vpop.f32.mrb[79].mxu1  ;;  %v3007_v31 = vadd.f32 %v8888_v10, %v2913_v26 }
 0x71d   :  { %v2912_v33 = vadd.f32 %v2900_v30, %v2815_v20  ;;  %v3005_v34 = vadd.f32 %v2991_v11, %v2911_v28 }
 0x71f   :  { %v3006_v35 = vadd.f32 %v2994_v13, %v2912_v33 }
 0x722   :  { %v8936_v36 = vpop.f32.mrb[124].mxu0 }
 0x723   :  { %v3357_v37 = vpop.f32.mrb[125].mxu0 }
 0x724   :  { %v8937_v38 = vpop.f32.mrb[126].mxu0 }
 0x725   :  { %v3360_v39 = vpop.f32.mrb[127].mxu0 }
 0x729   :  { %v8900_v41 = vpop.f32.mrb[80].mxu1 }
 0x72a   :  { %v3096_v42 = vadd.f32 %v8900_v41, %v3007_v31  ;;  %v3080_v43 = vpop.f32.mrb[81].mxu1 }
 0x72b   :  { %v3094_v44 = vadd.f32 %v3080_v43, %v3005_v34  ;;  %v8901_v40 = vpop.f32.mrb[82].mxu1 }
 0x72c   :  { %v3190_v45 = vadd.f32 %v8912_v21, %v3096_v42  ;;  %v3083_v32 = vpop.f32.mrb[83].mxu1  ;;  %v9671_v40 = vld [vmem:[%s11538_s5 + $0x248] sm:$0xff]  }
 0x72d   :  { %v3095_v46 = vadd.f32 %v3083_v32, %v3006_v35  ;;  %v3188_v47 = vadd.f32 %v3174_v22, %v3094_v44 }
 0x72f   :  { %v3189_v48 = vadd.f32 %v3177_v24, %v3095_v46 }
 0x739   :  { %v8924_v49 = vpop.f32.mrb[84].mxu1 }
 0x73a   :  { %v3279_v50 = vadd.f32 %v8924_v49, %v3190_v45  ;;  %v3263_v52 = vpop.f32.mrb[85].mxu1  ;;  %v9673_v49 = vld [vmem:[%s11538_s5 + $0x250] sm:$0xff]  }
 0x73b   :  { %v3277_v57 = vadd.f32 %v3263_v52, %v3188_v47  ;;  %v8925_v7 = vpop.f32.mrb[86].mxu1 }
 0x73c   :  { %v3266_v8 = vpop.f32.mrb[87].mxu1  ;;  %v3373_v9 = vadd.f32 %v8936_v36, %v3279_v50  ;;  %v9674_v7 = vld [vmem:[%s11538_s5 + $0x258] sm:$0xff]  }
 0x73d   :  { %v3278_v10 = vadd.f32 %v3266_v8, %v3189_v48  ;;  %v3371_v11 = vadd.f32 %v3357_v37, %v3277_v57 }
 0x73f   :  { %v3372_v12 = vadd.f32 %v3360_v39, %v3278_v10  ;;  %v9683_v10 = vld [vmem:[%s11538_s5 + $0x2e8] sm:$0xff]  }
 0x749   :  { %v8948_v13 = vpop.f32.mrb[88].mxu1 }
 0x74a   :  { %v3462_v15 = vadd.f32 %v8948_v13, %v3373_v9  ;;  %v3446_v16 = vpop.f32.mrb[89].mxu1 }
 0x74b   :  { %v3460_v17 = vadd.f32 %v3446_v16, %v3371_v11  ;;  %v8949_v18 = vpop.f32.mrb[90].mxu1 }
 0x74c   :  { %v3470_v19 = vadd.f32 %v7707_v14, %v3462_v15  ;;  %v3449_v20 = vpop.f32.mrb[91].mxu1  ;;  %v9675_v15 = vld [vmem:[%s11538_s5 + $0x280] sm:$0xff]   ;;  %v9677_v18 = vld [vmem:[%s11538_s5 + $0x288] sm:$0xff]  }
 0x74d   :  { %v3468_v21 = vadd.f32 %v7707_v14, %v3460_v17  ;;  %v3461_v22 = vadd.f32 %v3449_v20, %v3372_v12  ;;  %v9685_v17 = vld [vmem:[%s11538_s5 + $0x2f0] sm:$0xff]  }
 0x74e   :  { %v3473_v23 = vmax.f32 %v3470_v19, 0.0 }
 0x74f   :  { %v3471_v24 = vmax.f32 %v3468_v21, 0.0  ;;  %v3469_v25 = vadd.f32 %v7707_v14, %v3461_v22  ;;  %v9687_v21 = vld [vmem:[%s11538_s5 + $0x2f8] sm:$0xff]  }
 0x750   :  { %v3476_v26 = vadd.f32 %v3473_v23, %v10160_v54 }
 0x751   :  { %v10641_v27 = vadd.f32 %v3471_v24, %v1355_v55  ;;  %v3472_v28 = vmax.f32 %v3469_v25, 0.0  ;;  %v9665_v55 = vld [vmem:[%s11538_s5 + $0x260] sm:$0xff]   ;;  %v9678_v25 = vld [vmem:[%s11538_s5 + $0x290] sm:$0xff]  }
 0x752   :  { %v10647_v30 = vmax.f32 %v3476_v26, 0.0  ;;  %8982 = vmatprep.subr.bf16.mxu1 %v9665_v55 }
 0x753   :  { %v10645_v29 = vadd.f32 %v3472_v28, %v1356_v56  ;;  %v3477_v31 = vmax.f32 %v10641_v27, 0.0  ;;  %8983 = vmatpush3.bf16.msra.mxu1 %v9665_v55  ;;  %v9666_v56 = vld [vmem:[%s11538_s5 + $0x268] sm:$0xff]  }
 0x754   :  { %v3481_v51 = vpack.c.bf16 %v10647_v30, %v10647_v30  ;;  %8984 = vmatprep.subr.bf16.mxu1 %v9666_v56 }
 0x755   :  { %v3478_v33 = vmax.f32 %v10645_v29, 0.0 }
 0x756   :  { %v3483_v53 = vsel %vm368_vm5, %v3481_v51, 0 }
 0x757   :  { %v3480_v54 = vpack.c.bf16 %v3478_v33, %v3477_v31  ;;  %8985 = vmatpush3.bf16.msra.mxu1 %v9666_v56 }
 0x759   :  { %8950 = vmatprep.subr.bf16.mxu0 %v3480_v54 }
 0x75a   :  { %8951 = vmatpush3.bf16.msra.mxu0 %v3480_v54  ;;  %v9689_v54 = vld [vmem:[%s11538_s5 + $0x320] sm:$0xff]  }
 0x75b   :  { %9513 = vmatprep.subr.msk.bf16.mxu0 %vm368_vm5, %v3481_v51 }
 0x75e   :  { %8953 = vmatpush3.bf16.msra.mxu0 %v3483_v53  ;;  %v9680_v53 = vld [vmem:[%s11538_s5 + $0x298] sm:$0xff]  }
 0x761   :  { %8955 = vmatmul.mubr.msk.bf16.vlgmr.msra.gmra.mrb[128].mxu0 %vm1455_vm8, %v10392_v58  ;;  %v9668_v58 = vld [vmem:[%s11538_s5 + $0x270] sm:$0xff]  }
 0x762   :  { %8958 = vmatprep.mubr.msk.bf16.mxu0 %vm1455_vm8, %v10399_v59  ;;  %v9667_v59 = vld [vmem:[%s11538_s5 + $0x2a0] sm:$0xff]   ;;  %8986 = vmatprep.subr.bf16.mxu1 %v9668_v58 }
 0x763   :  { %9018 = vmatprep.subr.bf16.mxu0 %v9667_v59  ;;  %8987 = vmatpush3.bf16.msra.mxu1 %v9668_v58  ;;  %v9691_v58 = vld [vmem:[%s11538_s5 + $0x328] sm:$0xff]  }
 0x764   :  { %9019 = vmatpush3.bf16.msra.mxu0 %v9667_v59 }
 0x769   :  { %8959 = vmatmul.mubr.msk.bf16.gmra.mrb[132].mxu0 %vm1455_vm8, %v10406_v60  ;;  %v9669_v60 = vld [vmem:[%s11538_s5 + $0x278] sm:$0xff]  }
 0x76a   :  { %8962 = vmatprep.mubr.msk.bf16.mxu0 %vm1455_vm8, %v10413_v61  ;;  %8988 = vmatprep.subr.bf16.mxu1 %v9669_v60  ;;  %v9670_v61 = vld [vmem:[%s11538_s5 + $0x240] sm:$0xff]  }
 0x76b   :  { %8989 = vmatpush3.bf16.msra.mxu1 %v9669_v60 }
 0x76c   :  { %8994 = vmatprep.subr.bf16.mxu1 %v9670_v61 }
 0x771   :  { %8963 = vmatmul.mubr.msk.bf16.gmra.mrb[136].mxu0 %vm1455_vm8, %v10420_v62  ;;  %v9672_v62 = vld [vmem:[%s11538_s5 + $0x2a8] sm:$0xff]  }
 0x772   :  { %8966 = vmatprep.mubr.msk.bf16.mxu0 %vm1455_vm8, %v10427_v63  ;;  %9020 = vmatprep.subr.bf16.mxu0 %v9672_v62  ;;  %v9676_v63 = vld [vmem:[%s11538_s5 + $0x2b0] sm:$0xff]  }
 0x773   :  { %9021 = vmatpush3.bf16.msra.mxu0 %v9672_v62 }
 0x774   :  { %9022 = vmatprep.subr.bf16.mxu0 %v9676_v63 }
 0x777   :  { %9023 = vmatpush3.bf16.msra.mxu0 %v9676_v63  ;;  %v9682_v63 = vld [vmem:[%s11538_s5 + $0x2c0] sm:$0xff]  }
 0x779   :  { %8967 = vmatmul.mubr.msk.bf16.gmra.mrb[140].mxu0 %vm1455_vm8, %v10434_v0  ;;  %v9679_v0 = vld [vmem:[%s11538_s5 + $0x2b8] sm:$0xff]  }
 0x77a   :  { %8970 = vmatprep.mubr.msk.bf16.mxu0 %vm1455_vm8, %v10441_v1  ;;  %9024 = vmatprep.subr.bf16.mxu0 %v9679_v0  ;;  %v9681_v1 = vld [vmem:[%s11538_s5 + $0x2e0] sm:$0xff]  }
 0x77b   :  { %9025 = vmatpush3.bf16.msra.mxu0 %v9679_v0 }
 0x77c   :  { %9042 = vmatprep.subr.bf16.mxu0 %v9681_v1 }
 0x781   :  { %8971 = vmatmul.mubr.msk.bf16.gmra.mrb[144].mxu0 %vm1455_vm8, %v10448_v2 }
 0x782   :  { %8974 = vmatprep.mubr.msk.bf16.mxu0 %vm1455_vm8, %v10455_v3 }
 0x789   :  { %8975 = vmatmul.mubr.msk.bf16.gmra.mrb[148].mxu0 %vm1455_vm8, %v10462_v4 }
 0x78a   :  { %8978 = vmatprep.mubr.msk.bf16.mxu0 %vm1455_vm8, %v10469_v5 }
 0x791   :  { %8979 = vmatmul.mubr.msk.bf16.gmra.mrb[152].mxu0 %vm1455_vm8, %v10476_v6 }
 0x834   :  { %v8956_v2 = vpop.f32.mrb[128].mxu0 }
 0x835   :  { %v3519_v3 = vpop.f32.mrb[129].mxu0 }
 0x836   :  { %v8957_v4 = vpop.f32.mrb[130].mxu0 }
 0x837   :  { %v3630_v5 = vpack.c.bf16 %v8957_v4, %v8956_v2  ;;  %v3522_v6 = vpop.f32.mrb[131].mxu0  ;;  %v9693_v2 = vld [vmem:[%s11538_s5 + $0x330] sm:$0xff]   ;;  %v9684_v4 = vld [vmem:[%s11538_s5 + $0x2c8] sm:$0xff]  }
 0x838   :  { %v3629_v34 = vpack.c.bf16 %v3522_v6, %v3519_v3 }
 0x839   :  { %v3661_v42 = vrot.slane %v3630_v5, 4 }
 0x83c   :  { %v8960_v35 = vpop.f32.mrb[132].mxu0 }
 0x83d   :  { %v3535_v36 = vpop.f32.mrb[133].mxu0 }
 0x83e   :  { %v8961_v37 = vpop.f32.mrb[134].mxu0 }
 0x83f   :  { %v3632_v38 = vpack.c.bf16 %v8961_v37, %v8960_v35  ;;  %v3538_v39 = vpop.f32.mrb[135].mxu0 }
 0x840   :  { %v3631_v41 = vpack.c.bf16 %v3538_v39, %v3535_v36 }
 0x842   :  { %v3662_v43 = vrot.slane %v3631_v41, 4  ;;  %v9688_v41 = vld [vmem:[%s11538_s5 + $0x2d8] sm:$0xff]  }
 0x844   :  { %v3663_v44 = vsel %vm548_vm7, %v3661_v42, %v3662_v43  ;;  %v8964_v45 = vpop.f32.mrb[136].mxu0  ;;  %v9690_v42 = vld [vmem:[%s11538_s5 + $0x300] sm:$0xff]  }
 0x845   :  { %8990 = vmatprep.mubr.msk.bf16.mxu1 %vm576_vm6, %v3663_v44  ;;  %v3551_v32 = vpop.f32.mrb[137].mxu0  ;;  %v9692_v44 = vld [vmem:[%s11538_s5 + $0x308] sm:$0xff]  }
 0x846   :  { %8991 = vmatmul.mubr.msk.bf16.vlgmr.msra.gmra.mrb[92].mxu1 %vm576_vm6, %v3662_v43  ;;  %v8965_v46 = vpop.f32.mrb[138].mxu0  ;;  %v10811_v43 = vld [vmem:[%s11537_s4] sm:$0xff]  }
 0x847   :  { %8995 = vmatpush3.bf16.msra.mxu1 %v9670_v61  ;;  %9002 = vmatprep.mubr.msk.bf16.mxu1 %vm576_vm6, %v3629_v34  ;;  %v3634_v47 = vpack.c.bf16 %v8965_v46, %v8964_v45  ;;  %v3554_v48 = vpop.f32.mrb[139].mxu0  ;;  %v9695_v34 = vld [vmem:[%s11538_s5 + $0x338] sm:$0xff]   ;;  %v9698_v46 = vld [vmem:[%s11538_s5 + $0x348] sm:$0xff]  }
 0x848   :  { %8996 = vmatprep.subr.bf16.mxu1 %v9671_v40  ;;  %v10725_v50 = vpack.c.bf16 %v3554_v48, %v3551_v32  ;;  %v9696_v45 = vld [vmem:[%s11538_s5 + $0x318] sm:$0xff]   ;;  %v9697_v32 = vld [vmem:[%s11538_s5 + $0x340] sm:$0xff]  }
 0x849   :  { %v3920_v52 = vrot.slane %v3634_v47, 4  ;;  %v9699_v47 = vld [vmem:[%s11538_s5 + $0x350] sm:$0xff]   ;;  %v9700_v48 = vld [vmem:[%s11538_s5 + $0x358] sm:$0xff]  }
 0x84a   :  { %v3919_v57 = vrot.slane %v10725_v50, 4 }
 0x84b   :  { %8997 = vmatpush3.bf16.msra.mxu1 %v9671_v40  ;;  %v9694_v40 = vld [vmem:[%s11538_s5 + $0x310] sm:$0xff]  }
 0x84c   :  { %8998 = vmatprep.subr.bf16.mxu1 %v9673_v49  ;;  %v3921_v8 = vsel %vm548_vm7, %v3919_v57, %v3920_v52  ;;  %v8968_v9 = vpop.f32.mrb[140].mxu0 }
 0x84d   :  { %9026 = vmatprep.mubr.msk.bf16.mxu0 %vm576_vm6, %v3921_v8  ;;  %v10736_v11 = vpop.f32.mrb[141].mxu0 }
 0x84e   :  { %9027 = vmatmul.mubr.msk.bf16.vlgmr.msra.gmra.mrb[156].mxu0 %vm576_vm6, %v3920_v52  ;;  %v8969_v12 = vpop.f32.mrb[142].mxu0 }
 0x84f   :  { %8999 = vmatpush3.bf16.msra.mxu1 %v9673_v49  ;;  %9043 = vmatpush3.bf16.msra.mxu0 %v9681_v1  ;;  %v10739_v13 = vpack.c.bf16 %v8969_v12, %v8968_v9  ;;  %v10741_v14 = vpop.f32.mrb[143].mxu0 }
 0x850   :  { %9000 = vmatprep.subr.bf16.mxu1 %v9674_v7  ;;  %9044 = vmatprep.subr.bf16.mxu0 %v9683_v10  ;;  %v3635_v16 = vpack.c.bf16 %v10741_v14, %v10736_v11 }
 0x851   :  { %v4102_v26 = vrot.slane %v10739_v13, 4 }
 0x853   :  { %9001 = vmatpush3.bf16.msra.mxu1 %v9674_v7  ;;  %9045 = vmatpush3.bf16.msra.mxu0 %v9683_v10 }
 0x854   :  { %9006 = vmatprep.subr.bf16.mxu1 %v9675_v15  ;;  %v10754_v19 = vpop.f32.mrb[144].mxu0  ;;  %9046 = vmatprep.subr.bf16.mxu0 %v9685_v17 }
 0x855   :  { %v3583_v20 = vpop.f32.mrb[145].mxu0 }
 0x856   :  { %9003 = vmatmul.mubr.msk.bf16.vlgmr.msra.gmra.mrb[96].mxu1 %vm576_vm6, %v3630_v5  ;;  %v10760_v22 = vpop.f32.mrb[146].mxu0 }
 0x857   :  { %9007 = vmatpush3.bf16.msra.mxu1 %v9675_v15  ;;  %9014 = vmatprep.mubr.msk.bf16.mxu1 %vm576_vm6, %v3632_v38  ;;  %v3638_v23 = vpack.c.bf16 %v10760_v22, %v10754_v19  ;;  %v3586_v24 = vpop.f32.mrb[147].mxu0  ;;  %v9686_v38 = vld [vmem:[%s11538_s5 + $0x2d0] sm:$0xff]  }
 0x858   :  { %9008 = vmatprep.subr.bf16.mxu1 %v9677_v18  ;;  %9047 = vmatpush3.bf16.msra.mxu0 %v9685_v17  ;;  %v3637_v28 = vpack.c.bf16 %v3586_v24, %v3583_v20 }
 0x859   :  { %9048 = vmatprep.subr.bf16.mxu0 %v9687_v21 }
 0x85a   :  { %v4103_v51 = vrot.slane %v3637_v28, 4 }
 0x85b   :  { %9009 = vmatpush3.bf16.msra.mxu1 %v9677_v18 }
 0x85c   :  { %9010 = vmatprep.subr.bf16.mxu1 %v9678_v25  ;;  %9049 = vmatpush3.bf16.msra.mxu0 %v9687_v21  ;;  %v4104_v55 = vsel %vm548_vm7, %v4102_v26, %v4103_v51  ;;  %v8976_v56 = vpop.f32.mrb[148].mxu0 }
 0x85d   :  { %9050 = vmatprep.mubr.msk.bf16.mxu0 %vm576_vm6, %v4104_v55  ;;  %9066 = vmatprep.subr.bf16.mxu0 %v9689_v54  ;;  %v3599_v59 = vpop.f32.mrb[149].mxu0 }
 0x85e   :  { %v8977_v60 = vpop.f32.mrb[150].mxu0 }
 0x85f   :  { %9011 = vmatpush3.bf16.msra.mxu1 %v9678_v25  ;;  %9051 = vmatmul.mubr.msk.bf16.vlgmr.msra.gmra.mrb[160].mxu0 %vm576_vm6, %v4103_v51  ;;  %v3640_v61 = vpack.c.bf16 %v8977_v60, %v8976_v56  ;;  %v3602_v62 = vpop.f32.mrb[151].mxu0 }
 0x860   :  { %9012 = vmatprep.subr.bf16.mxu1 %v9680_v53  ;;  %9067 = vmatpush3.bf16.msra.mxu0 %v9689_v54  ;;  %v3639_v0 = vpack.c.bf16 %v3602_v62, %v3599_v59 }
 0x861   :  { %9068 = vmatprep.subr.bf16.mxu0 %v9691_v58  ;;  %v4286_v1 = vrot.slane %v3640_v61, 4 }
 0x862   :  { %v4285_v3 = vrot.slane %v3639_v0, 4 }
 0x863   :  { %9013 = vmatpush3.bf16.msra.mxu1 %v9680_v53 }
 0x864   :  { %9030 = vmatprep.subr.bf16.mxu1 %v9682_v63  ;;  %9069 = vmatpush3.bf16.msra.mxu0 %v9691_v58  ;;  %v4287_v5 = vsel %vm548_vm7, %v4285_v3, %v4286_v1  ;;  %v8980_v6 = vpop.f32.mrb[152].mxu0 }
 0x865   :  { %9070 = vmatprep.subr.bf16.mxu0 %v9693_v2  ;;  %9074 = vmatprep.mubr.msk.bf16.mxu0 %vm576_vm6, %v4287_v5  ;;  %v3615_v35 = vpop.f32.mrb[153].mxu0  ;;  %v3642_v49 = vpack.c.bf16 %v8980_v6, %v8980_v6 }
 0x866   :  { %9015 = vmatmul.mubr.msk.bf16.vlgmr.msra.gmra.mrb[100].mxu1 %vm576_vm6, %v10725_v50  ;;  %v8981_v36 = vpop.f32.mrb[154].mxu0 }
 0x867   :  { %9031 = vmatpush3.bf16.msra.mxu1 %v9682_v63  ;;  %9038 = vmatprep.mubr.msk.bf16.mxu1 %vm576_vm6, %v3635_v16  ;;  %v3618_v37 = vpop.f32.mrb[155].mxu0 }
 0x868   :  { %9032 = vmatprep.subr.bf16.mxu1 %v9684_v4  ;;  %9071 = vmatpush3.bf16.msra.mxu0 %v9693_v2  ;;  %v3641_v39 = vpack.c.bf16 %v3618_v37, %v3615_v35 }
 0x869   :  { %9072 = vmatprep.subr.bf16.mxu0 %v9695_v34 }
 0x86b   :  { %9033 = vmatpush3.bf16.msra.mxu1 %v9684_v4 }
 0x86c   :  { %9034 = vmatprep.subr.bf16.mxu1 %v9686_v38  ;;  %9073 = vmatpush3.bf16.msra.mxu0 %v9695_v34 }
 0x86f   :  { %9035 = vmatpush3.bf16.msra.mxu1 %v9686_v38  ;;  %9075 = vmatmul.mubr.msk.bf16.vlgmr.msra.gmra.mrb[164].mxu0 %vm576_vm6, %v4286_v1 }
 0x870   :  { %9036 = vmatprep.subr.bf16.mxu1 %v9688_v41  ;;  %9094 = vmatprep.mubr.msk.bf16.mxu0 %vm1455_vm8, %v10811_v43 }
 0x873   :  { %9037 = vmatpush3.bf16.msra.mxu1 %v9688_v41 }
 0x874   :  { %9054 = vmatprep.subr.bf16.mxu1 %v9690_v42 }
 0x876   :  { %9039 = vmatmul.mubr.msk.bf16.vlgmr.msra.gmra.mrb[104].mxu1 %vm576_vm6, %v10739_v13 }
 0x877   :  { %9055 = vmatpush3.bf16.msra.mxu1 %v9690_v42  ;;  %9062 = vmatprep.mubr.msk.bf16.mxu1 %vm576_vm6, %v3638_v23 }
 0x878   :  { %9056 = vmatprep.subr.bf16.mxu1 %v9692_v44 }
 0x87b   :  { %9057 = vmatpush3.bf16.msra.mxu1 %v9692_v44 }
 0x87c   :  { %9058 = vmatprep.subr.bf16.mxu1 %v9694_v40 }
 0x87f   :  { %9059 = vmatpush3.bf16.msra.mxu1 %v9694_v40 }
 0x880   :  { %9060 = vmatprep.subr.bf16.mxu1 %v9696_v45 }
 0x883   :  { %9061 = vmatpush3.bf16.msra.mxu1 %v9696_v45 }
 0x884   :  { %9078 = vmatprep.subr.bf16.mxu1 %v9697_v32 }
 0x886   :  { %9063 = vmatmul.mubr.msk.bf16.vlgmr.msra.gmra.mrb[108].mxu1 %vm576_vm6, %v3639_v0 }
 0x887   :  { %9079 = vmatpush3.bf16.msra.mxu1 %v9697_v32  ;;  %9086 = vmatprep.mubr.msk.bf16.mxu1 %vm576_vm6, %v3641_v39 }
 0x888   :  { %9080 = vmatprep.subr.bf16.mxu1 %v9698_v46 }
 0x88b   :  { %9081 = vmatpush3.bf16.msra.mxu1 %v9698_v46 }
 0x88c   :  { %9082 = vmatprep.subr.bf16.mxu1 %v9699_v47 }
 0x88f   :  { %9083 = vmatpush3.bf16.msra.mxu1 %v9699_v47  ;;  %v7776_v47 = vld [vmem:[%s11536_s6 + $0x4] ss:$0 sm:$0xff] }
 0x890   :  { %9084 = vmatprep.subr.bf16.mxu1 %v9700_v48 }
 0x893   :  { %9085 = vmatpush3.bf16.msra.mxu1 %v9700_v48 }
 0x896   :  { %9087 = vmatmul.mubr.msk.bf16.vlgmr.msra.gmra.mrb[112].mxu1 %vm576_vm6, %v3642_v49 }
 0x919   :  { %v8992_v50 = vpop.f32.mrb[92].mxu1 }
 0x91a   :  { %v3728_v52 = vpop.f32.mrb[93].mxu1 }
 0x91b   :  { %v8993_v57 = vpop.f32.mrb[94].mxu1 }
 0x91c   :  { %v3731_v7 = vpop.f32.mrb[95].mxu1 }
 0x921   :  { %v9028_v8 = vpop.f32.mrb[156].mxu0 }
 0x922   :  { %v3986_v9 = vpop.f32.mrb[157].mxu0 }
 0x923   :  { %v9029_v10 = vpop.f32.mrb[158].mxu0 }
 0x924   :  { %v3989_v11 = vpop.f32.mrb[159].mxu0 }
 0x929   :  { %v9004_v12 = vpop.f32.mrb[96].mxu1 }
 0x92a   :  { %v3815_v13 = vadd.f32 %v9004_v12, %v8992_v50  ;;  %v3806_v14 = vpop.f32.mrb[97].mxu1 }
 0x92b   :  { %v3807_v15 = vadd.f32 %v3806_v14, %v3728_v52  ;;  %v9005_v16 = vpop.f32.mrb[98].mxu1 }
 0x92c   :  { %v3809_v17 = vpop.f32.mrb[99].mxu1  ;;  %v10853_v16 = vld [vmem:[%s11537_s4 + $0x8] sm:$0xff]  }
 0x92d   :  { %v3810_v18 = vadd.f32 %v3809_v17, %v3731_v7  ;;  %v10860_v17 = vld [vmem:[%s11537_s4 + $0x10] sm:$0xff]  }
 0x932   :  { %v9052_v19 = vpop.f32.mrb[160].mxu0 }
 0x933   :  { %v4169_v20 = vpop.f32.mrb[161].mxu0 }
 0x934   :  { %v9053_v21 = vpop.f32.mrb[162].mxu0 }
 0x935   :  { %v4172_v22 = vpop.f32.mrb[163].mxu0  ;;  %v10888_v21 = vld [vmem:[%s11537_s4 + $0x30] sm:$0xff]  }
 0x939   :  { %v9016_v23 = vpop.f32.mrb[100].mxu1 }
 0x93a   :  { %v3908_v24 = vadd.f32 %v9016_v23, %v3815_v13  ;;  %v3892_v25 = vpop.f32.mrb[101].mxu1  ;;  %v10902_v23 = vld [vmem:[%s11537_s4 + $0x40] sm:$0xff]  }
 0x93b   :  { %v3906_v26 = vadd.f32 %v3892_v25, %v3807_v15  ;;  %v9017_v28 = vpop.f32.mrb[102].mxu1  ;;  %v10916_v25 = vld [vmem:[%s11537_s4 + $0x50] sm:$0xff]  }
 0x93c   :  { %v3895_v54 = vpop.f32.mrb[103].mxu1  ;;  %v4002_v51 = vadd.f32 %v9028_v8, %v3908_v24  ;;  %v10909_v24 = vld [vmem:[%s11537_s4 + $0x48] sm:$0xff]   ;;  %v10930_v28 = vld [vmem:[%s11537_s4 + $0x60] sm:$0xff]  }
 0x93d   :  { %v3907_v53 = vadd.f32 %v3895_v54, %v3810_v18  ;;  %v4000_v55 = vadd.f32 %v3986_v9, %v3906_v26  ;;  %v10867_v18 = vld [vmem:[%s11537_s4 + $0x18] sm:$0xff]   ;;  %v10937_v54 = vld [vmem:[%s11537_s4 + $0x68] ss:$0 sps:$4 sm:$0xff]  }
 0x93e   :  { %v10923_v26 = vld [vmem:[%s11537_s4 + $0x58] sm:$0xff]  }
 0x93f   :  { %v4001_v56 = vadd.f32 %v3989_v11, %v3907_v53  ;;  %v9702_v53 = vld [vmem:[%s11538_s5 + $0x388] sm:$0xff]  }
 0x942   :  { %v9076_v58 = vpop.f32.mrb[164].mxu0 }
 0x943   :  { %v4352_v59 = vpop.f32.mrb[165].mxu0 }
 0x944   :  { %v9077_v60 = vpop.f32.mrb[166].mxu0 }
 0x945   :  { %v4355_v61 = vpop.f32.mrb[167].mxu0  ;;  %v9708_v60 = vld [vmem:[%s11538_s5 + $0x3c8] sm:$0xff]  }
 0x949   :  { %v9040_v62 = vpop.f32.mrb[104].mxu1 }
 0x94a   :  { %v4091_v63 = vadd.f32 %v9040_v62, %v4002_v51  ;;  %v4075_v0 = vpop.f32.mrb[105].mxu1  ;;  %v9701_v51 = vld [vmem:[%s11538_s5 + $0x380] sm:$0xff]   ;;  %v9715_v62 = vld [vmem:[%s11538_s5 + $0x3d8] sm:$0xff]  }
 0x94b   :  { %v4089_v1 = vadd.f32 %v4075_v0, %v4000_v55  ;;  %v9041_v2 = vpop.f32.mrb[106].mxu1  ;;  %9122 = vmatprep.subr.bf16.mxu1 %v9701_v51  ;;  %v9704_v55 = vld [vmem:[%s11538_s5 + $0x390] sm:$0xff]  }
 0x94c   :  { %v4185_v3 = vadd.f32 %v9052_v19, %v4091_v63  ;;  %v4078_v4 = vpop.f32.mrb[107].mxu1  ;;  %v10874_v19 = vld [vmem:[%s11537_s4 + $0x20] sm:$0xff]   ;;  %9123 = vmatpush3.bf16.msra.mxu1 %v9701_v51  ;;  %v9721_v51 = vld [vmem:[%s11538_s5 + $0x410] sm:$0xff]  }
 0x94d   :  { %v4090_v5 = vadd.f32 %v4078_v4, %v4001_v56  ;;  %v4183_v6 = vadd.f32 %v4169_v20, %v4089_v1  ;;  %v10881_v20 = vld [vmem:[%s11537_s4 + $0x28] sm:$0xff]   ;;  %9124 = vmatprep.subr.bf16.mxu1 %v9702_v53  ;;  %v9703_v56 = vld [vmem:[%s11538_s5 + $0x3c0] sm:$0xff]  }
 0x94e   :  { %v9717_v63 = vld [vmem:[%s11538_s5 + $0x400] sm:$0xff]  }
 0x94f   :  { %v4184_v34 = vadd.f32 %v4172_v22, %v4090_v5  ;;  %v10895_v22 = vld [vmem:[%s11537_s4 + $0x38] sm:$0xff]  }
 0x950   :  { %9125 = vmatpush3.bf16.msra.mxu1 %v9702_v53  ;;  %v9713_v53 = vld [vmem:[%s11538_s5 + $0x3a8] sm:$0xff]  }
 0x951   :  { %9126 = vmatprep.subr.bf16.mxu1 %v9704_v55 }
 0x954   :  { %9127 = vmatpush3.bf16.msra.mxu1 %v9704_v55 }
 0x959   :  { %v9064_v35 = vpop.f32.mrb[108].mxu1 }
 0x95a   :  { %v4274_v36 = vadd.f32 %v9064_v35, %v4185_v3  ;;  %v4258_v37 = vpop.f32.mrb[109].mxu1 }
 0x95b   :  { %v4272_v38 = vadd.f32 %v4258_v37, %v4183_v6  ;;  %v9065_v39 = vpop.f32.mrb[110].mxu1 }
 0x95c   :  { %v4261_v41 = vpop.f32.mrb[111].mxu1  ;;  %v4368_v42 = vadd.f32 %v9076_v58, %v4274_v36  ;;  %v9705_v58 = vld [vmem:[%s11538_s5 + $0x398] sm:$0xff]  }
 0x95d   :  { %v4273_v44 = vadd.f32 %v4261_v41, %v4184_v34  ;;  %v4366_v40 = vadd.f32 %v4352_v59, %v4272_v38  ;;  %9128 = vmatprep.subr.bf16.mxu1 %v9705_v58  ;;  %v9706_v59 = vld [vmem:[%s11538_s5 + $0x360] sm:$0xff]  }
 0x95e   :  { %9129 = vmatpush3.bf16.msra.mxu1 %v9705_v58  ;;  %v9723_v58 = vld [vmem:[%s11538_s5 + $0x418] sm:$0xff]  }
 0x95f   :  { %v4367_v45 = vadd.f32 %v4355_v61, %v4273_v44  ;;  %9134 = vmatprep.subr.bf16.mxu1 %v9706_v59  ;;  %v9712_v61 = vld [vmem:[%s11538_s5 + $0x3d0] sm:$0xff]   ;;  %v9707_v44 = vld [vmem:[%s11538_s5 + $0x368] sm:$0xff]  }
 0x969   :  { %v9088_v32 = vpop.f32.mrb[112].mxu1 }
 0x96a   :  { %v4457_v46 = vadd.f32 %v9088_v32, %v4368_v42  ;;  %v4441_v48 = vpop.f32.mrb[113].mxu1 }
 0x96b   :  { %v4455_v49 = vadd.f32 %v4441_v48, %v4366_v40  ;;  %v9089_v50 = vpop.f32.mrb[114].mxu1  ;;  %v9709_v48 = vld [vmem:[%s11538_s5 + $0x370] sm:$0xff]  }
 0x96c   :  { %v4444_v52 = vpop.f32.mrb[115].mxu1  ;;  %v4465_v57 = vadd.f32 %v7776_v47, %v4457_v46 }
 0x96d   :  { %v4463_v7 = vadd.f32 %v7776_v47, %v4455_v49  ;;  %v4456_v8 = vadd.f32 %v4444_v52, %v4367_v45 }
 0x96e   :  { %v4468_v10 = vmax.f32 %v4465_v57, 0.0  ;;  %v9710_v57 = vld [vmem:[%s11538_s5 + $0x378] sm:$0xff]  }
 0x96f   :  { %v4464_v9 = vadd.f32 %v7776_v47, %v4456_v8  ;;  %v4466_v11 = vmax.f32 %v4463_v7, 0.0 }
 0x970   :  { %v4470_v14 = vpack.c.bf16 %v4468_v10, %v4468_v10 }
 0x971   :  { %v4467_v12 = vmax.f32 %v4464_v9, 0.0  ;;  %v9719_v9 = vld [vmem:[%s11538_s5 + $0x408] sm:$0xff]  }
 0x972   :  { %v4472_v15 = vsel %vm368_vm5, %v4470_v14, 0 }
 0x973   :  { %v4469_v13 = vpack.c.bf16 %v4467_v12, %v4466_v11 }
 0x975   :  { %9090 = vmatprep.subr.bf16.mxu0 %v4469_v13 }
 0x976   :  { %9091 = vmatpush3.bf16.msra.mxu0 %v4469_v13 }
 0x977   :  { %9514 = vmatprep.subr.msk.bf16.mxu0 %vm368_vm5, %v4470_v14  ;;  %v9711_v14 = vld [vmem:[%s11538_s5 + $0x3a0] sm:$0xff]  }
 0x97a   :  { %9093 = vmatpush3.bf16.msra.mxu0 %v4472_v15 }
 0x97b   :  { %9158 = vmatprep.subr.bf16.mxu0 %v9703_v56 }
 0x97d   :  { %9095 = vmatmul.mubr.msk.bf16.vlgmr.msra.gmra.mrb[168].mxu0 %vm1455_vm8, %v10853_v16 }
 0x97e   :  { %9098 = vmatprep.mubr.msk.bf16.mxu0 %vm1455_vm8, %v10860_v17  ;;  %9159 = vmatpush3.bf16.msra.mxu0 %v9703_v56 }
 0x97f   :  { %9160 = vmatprep.subr.bf16.mxu0 %v9708_v60 }
 0x982   :  { %9161 = vmatpush3.bf16.msra.mxu0 %v9708_v60 }
 0x983   :  { %9162 = vmatprep.subr.bf16.mxu0 %v9712_v61 }
 0x985   :  { %9099 = vmatmul.mubr.msk.bf16.gmra.mrb[172].mxu0 %vm1455_vm8, %v10867_v18 }
 0x986   :  { %9102 = vmatprep.mubr.msk.bf16.mxu0 %vm1455_vm8, %v10874_v19  ;;  %9163 = vmatpush3.bf16.msra.mxu0 %v9712_v61 }
 0x987   :  { %9164 = vmatprep.subr.bf16.mxu0 %v9715_v62 }
 0x98a   :  { %9165 = vmatpush3.bf16.msra.mxu0 %v9715_v62  ;;  %v9714_v62 = vld [vmem:[%s11538_s5 + $0x3b0] sm:$0xff]  }
 0x98b   :  { %9182 = vmatprep.subr.bf16.mxu0 %v9717_v63 }
 0x98d   :  { %9103 = vmatmul.mubr.msk.bf16.gmra.mrb[176].mxu0 %vm1455_vm8, %v10881_v20 }
 0x98e   :  { %9106 = vmatprep.mubr.msk.bf16.mxu0 %vm1455_vm8, %v10888_v21 }
 0x995   :  { %9107 = vmatmul.mubr.msk.bf16.gmra.mrb[180].mxu0 %vm1455_vm8, %v10895_v22 }
 0x996   :  { %9110 = vmatprep.mubr.msk.bf16.mxu0 %vm1455_vm8, %v10902_v23 }
 0x99d   :  { %9111 = vmatmul.mubr.msk.bf16.gmra.mrb[184].mxu0 %vm1455_vm8, %v10909_v24 }
 0x99e   :  { %9114 = vmatprep.mubr.msk.bf16.mxu0 %vm1455_vm8, %v10916_v25 }
 0x9a5   :  { %9115 = vmatmul.mubr.msk.bf16.gmra.mrb[188].mxu0 %vm1455_vm8, %v10923_v26 }
 0x9a6   :  { %9118 = vmatprep.mubr.msk.bf16.mxu0 %vm1455_vm8, %v10930_v28 }
 0x9ad   :  { %9119 = vmatmul.mubr.msk.bf16.gmra.mrb[192].mxu0 %vm1455_vm8, %v10937_v54 }
 0xa50   :  { %v9096_v0 = vpop.f32.mrb[168].mxu0 }
 0xa51   :  { %v4508_v1 = vpop.f32.mrb[169].mxu0 }
 0xa52   :  { %v9097_v2 = vpop.f32.mrb[170].mxu0 }
 0xa53   :  { %v4619_v3 = vpack.c.bf16 %v9097_v2, %v9096_v0  ;;  %v4511_v4 = vpop.f32.mrb[171].mxu0 }
 0xa54   :  { %v4618_v5 = vpack.c.bf16 %v4511_v4, %v4508_v1  ;;  %v9725_v1 = vld [vmem:[%s11538_s5 + $0x440] sm:$0xff]  }
 0xa55   :  { %v4650_v39 = vrot.slane %v4619_v3, 4 }
 0xa58   :  { %v9100_v6 = vpop.f32.mrb[172].mxu0 }
 0xa59   :  { %v4524_v34 = vpop.f32.mrb[173].mxu0 }
 0xa5a   :  { %v9101_v35 = vpop.f32.mrb[174].mxu0 }
 0xa5b   :  { %v4621_v36 = vpack.c.bf16 %v9101_v35, %v9100_v6  ;;  %v4527_v37 = vpop.f32.mrb[175].mxu0  ;;  %v9727_v6 = vld [vmem:[%s11538_s5 + $0x448] sm:$0xff]  }
 0xa5c   :  { %v4620_v38 = vpack.c.bf16 %v4527_v37, %v4524_v34 }
 0xa5e   :  { %v4651_v41 = vrot.slane %v4620_v38, 4  ;;  %v9718_v38 = vld [vmem:[%s11538_s5 + $0x3e0] sm:$0xff]  }
 0xa60   :  { %v4652_v42 = vsel %vm548_vm7, %v4650_v39, %v4651_v41  ;;  %v9104_v40 = vpop.f32.mrb[176].mxu0 }
 0xa61   :  { %9130 = vmatprep.mubr.msk.bf16.mxu1 %vm576_vm6, %v4652_v42  ;;  %v4540_v45 = vpop.f32.mrb[177].mxu0  ;;  %v9729_v42 = vld [vmem:[%s11538_s5 + $0x450] sm:$0xff]  }
 0xa62   :  { %9131 = vmatmul.mubr.msk.bf16.vlgmr.msra.gmra.mrb[116].mxu1 %vm576_vm6, %v4651_v41  ;;  %v9105_v32 = vpop.f32.mrb[178].mxu0 }
 0xa63   :  { %9135 = vmatpush3.bf16.msra.mxu1 %v9706_v59  ;;  %9142 = vmatprep.mubr.msk.bf16.mxu1 %vm576_vm6, %v4618_v5  ;;  %v4623_v46 = vpack.c.bf16 %v9105_v32, %v9104_v40  ;;  %v4543_v47 = vpop.f32.mrb[179].mxu0  ;;  %v9720_v40 = vld [vmem:[%s11538_s5 + $0x3e8] sm:$0xff]  }
 0xa64   :  { %9136 = vmatprep.subr.bf16.mxu1 %v9707_v44  ;;  %v10981_v49 = vpack.c.bf16 %v4543_v47, %v4540_v45 }
 0xa65   :  { %v4909_v50 = vrot.slane %v4623_v46, 4  ;;  %v9731_v46 = vld [vmem:[%s11538_s5 + $0x458] sm:$0xff]  }
 0xa66   :  { %v4908_v52 = vrot.slane %v10981_v49, 4 }
 0xa67   :  { %9137 = vmatpush3.bf16.msra.mxu1 %v9707_v44 }
 0xa68   :  { %9138 = vmatprep.subr.bf16.mxu1 %v9709_v48  ;;  %v4910_v7 = vsel %vm548_vm7, %v4908_v52, %v4909_v50  ;;  %v9108_v8 = vpop.f32.mrb[180].mxu0  ;;  %v9722_v52 = vld [vmem:[%s11538_s5 + $0x3f0] sm:$0xff]  }
 0xa69   :  { %9166 = vmatprep.mubr.msk.bf16.mxu0 %vm576_vm6, %v4910_v7  ;;  %v10992_v10 = vpop.f32.mrb[181].mxu0  ;;  %v9724_v7 = vld [vmem:[%s11538_s5 + $0x3f8] sm:$0xff]  }
 0xa6a   :  { %9167 = vmatmul.mubr.msk.bf16.vlgmr.msra.gmra.mrb[196].mxu0 %vm576_vm6, %v4909_v50  ;;  %v9109_v11 = vpop.f32.mrb[182].mxu0 }
 0xa6b   :  { %9139 = vmatpush3.bf16.msra.mxu1 %v9709_v48  ;;  %9183 = vmatpush3.bf16.msra.mxu0 %v9717_v63  ;;  %v10995_v12 = vpack.c.bf16 %v9109_v11, %v9108_v8  ;;  %v10997_v13 = vpop.f32.mrb[183].mxu0  ;;  %v9728_v8 = vld [vmem:[%s11538_s5 + $0x428] sm:$0xff]  }
 0xa6c   :  { %9140 = vmatprep.subr.bf16.mxu1 %v9710_v57  ;;  %9184 = vmatprep.subr.bf16.mxu0 %v9719_v9  ;;  %v4624_v15 = vpack.c.bf16 %v10997_v13, %v10992_v10  ;;  %v9733_v10 = vld [vmem:[%s11538_s5 + $0x460] sm:$0xff]   ;;  %v9734_v11 = vld [vmem:[%s11538_s5 + $0x468] sm:$0xff]   ;;  %v9736_v13 = vld [vmem:[%s11538_s5 + $0x478] sm:$0xff]  }
 0xa6d   :  { %v5091_v63 = vrot.slane %v10995_v12, 4 }
 0xa6f   :  { %9141 = vmatpush3.bf16.msra.mxu1 %v9710_v57  ;;  %9185 = vmatpush3.bf16.msra.mxu0 %v9719_v9  ;;  %v9732_v9 = vld [vmem:[%s11538_s5 + $0x438] sm:$0xff]  }
 0xa70   :  { %9146 = vmatprep.subr.bf16.mxu1 %v9711_v14  ;;  %v11010_v55 = vpop.f32.mrb[184].mxu0  ;;  %9186 = vmatprep.subr.bf16.mxu0 %v9721_v51 }
 0xa71   :  { %v4572_v56 = vpop.f32.mrb[185].mxu0 }
 0xa72   :  { %9143 = vmatmul.mubr.msk.bf16.vlgmr.msra.gmra.mrb[120].mxu1 %vm576_vm6, %v4619_v3  ;;  %v11016_v59 = vpop.f32.mrb[186].mxu0  ;;  %v9716_v3 = vld [vmem:[%s11538_s5 + $0x3b8] sm:$0xff]  }
 0xa73   :  { %9147 = vmatpush3.bf16.msra.mxu1 %v9711_v14  ;;  %9154 = vmatprep.mubr.msk.bf16.mxu1 %vm576_vm6, %v4621_v36  ;;  %v4627_v60 = vpack.c.bf16 %v11016_v59, %v11010_v55  ;;  %v4575_v61 = vpop.f32.mrb[187].mxu0 }
 0xa74   :  { %9148 = vmatprep.subr.bf16.mxu1 %v9713_v53  ;;  %9187 = vmatpush3.bf16.msra.mxu0 %v9721_v51  ;;  %v4626_v0 = vpack.c.bf16 %v4575_v61, %v4572_v56 }
 0xa75   :  { %9188 = vmatprep.subr.bf16.mxu0 %v9723_v58 }
 0xa76   :  { %v5092_v2 = vrot.slane %v4626_v0, 4 }
 0xa77   :  { %9149 = vmatpush3.bf16.msra.mxu1 %v9713_v53 }
 0xa78   :  { %9150 = vmatprep.subr.bf16.mxu1 %v9714_v62  ;;  %9189 = vmatpush3.bf16.msra.mxu0 %v9723_v58  ;;  %v5093_v4 = vsel %vm548_vm7, %v5091_v63, %v5092_v2  ;;  %v9116_v5 = vpop.f32.mrb[188].mxu0 }
 0xa79   :  { %9190 = vmatprep.mubr.msk.bf16.mxu0 %vm576_vm6, %v5093_v4  ;;  %9206 = vmatprep.subr.bf16.mxu0 %v9725_v1  ;;  %v4588_v34 = vpop.f32.mrb[189].mxu0 }
 0xa7a   :  { %v9117_v35 = vpop.f32.mrb[190].mxu0 }
 0xa7b   :  { %9151 = vmatpush3.bf16.msra.mxu1 %v9714_v62  ;;  %9191 = vmatmul.mubr.msk.bf16.vlgmr.msra.gmra.mrb[200].mxu0 %vm576_vm6, %v5092_v2  ;;  %v4629_v36 = vpack.c.bf16 %v9117_v35, %v9116_v5  ;;  %v4591_v37 = vpop.f32.mrb[191].mxu0 }
 0xa7c   :  { %9152 = vmatprep.subr.bf16.mxu1 %v9716_v3  ;;  %9207 = vmatpush3.bf16.msra.mxu0 %v9725_v1  ;;  %v4628_v39 = vpack.c.bf16 %v4591_v37, %v4588_v34 }
 0xa7d   :  { %9208 = vmatprep.subr.bf16.mxu0 %v9727_v6  ;;  %v5275_v41 = vrot.slane %v4629_v36, 4 }
 0xa7e   :  { %v5274_v44 = vrot.slane %v4628_v39, 4 }
 0xa7f   :  { %9153 = vmatpush3.bf16.msra.mxu1 %v9716_v3 }
 0xa80   :  { %9170 = vmatprep.subr.bf16.mxu1 %v9718_v38  ;;  %9209 = vmatpush3.bf16.msra.mxu0 %v9727_v6  ;;  %v5276_v45 = vsel %vm548_vm7, %v5274_v44, %v5275_v41  ;;  %v9120_v32 = vpop.f32.mrb[192].mxu0 }
 0xa81   :  { %9210 = vmatprep.subr.bf16.mxu0 %v9729_v42  ;;  %9214 = vmatprep.mubr.msk.bf16.mxu0 %vm576_vm6, %v5276_v45  ;;  %v4604_v47 = vpop.f32.mrb[193].mxu0  ;;  %v4631_v14 = vpack.c.bf16 %v9120_v32, %v9120_v32 }
 0xa82   :  { %9155 = vmatmul.mubr.msk.bf16.vlgmr.msra.gmra.mrb[124].mxu1 %vm576_vm6, %v10981_v49  ;;  %v9121_v48 = vpop.f32.mrb[194].mxu0  ;;  %v9726_v49 = vld [vmem:[%s11538_s5 + $0x420] sm:$0xff]  }
 0xa83   :  { %9171 = vmatpush3.bf16.msra.mxu1 %v9718_v38  ;;  %9178 = vmatprep.mubr.msk.bf16.mxu1 %vm576_vm6, %v4624_v15  ;;  %v4607_v50 = vpop.f32.mrb[195].mxu0 }
 0xa84   :  { %9172 = vmatprep.subr.bf16.mxu1 %v9720_v40  ;;  %9211 = vmatpush3.bf16.msra.mxu0 %v9729_v42  ;;  %v4630_v57 = vpack.c.bf16 %v4607_v50, %v4604_v47 }
 0xa85   :  { %9212 = vmatprep.subr.bf16.mxu0 %v9731_v46 }
 0xa87   :  { %9173 = vmatpush3.bf16.msra.mxu1 %v9720_v40 }
 0xa88   :  { %9174 = vmatprep.subr.bf16.mxu1 %v9722_v52  ;;  %9213 = vmatpush3.bf16.msra.mxu0 %v9731_v46 }
 0xa8b   :  { %9175 = vmatpush3.bf16.msra.mxu1 %v9722_v52  ;;  %9215 = vmatmul.mubr.msk.bf16.vlgmr.msra.gmra.mrb[204].mxu0 %vm576_vm6, %v5275_v41 }
 0xa8c   :  { %9176 = vmatprep.subr.bf16.mxu1 %v9724_v7  ;;  %9234 = vmatprep.mubr.msk.bf16.mxu0 %vm1455_vm8, %v10811_v43  ;;  %v9730_v43 = vld [vmem:[%s11538_s5 + $0x430] sm:$0xff]  }
 0xa8f   :  { %9177 = vmatpush3.bf16.msra.mxu1 %v9724_v7 }
 0xa90   :  { %9194 = vmatprep.subr.bf16.mxu1 %v9726_v49 }
 0xa92   :  { %9179 = vmatmul.mubr.msk.bf16.vlgmr.msra.gmra.mrb[128].mxu1 %vm576_vm6, %v10995_v12  ;;  %v9735_v12 = vld [vmem:[%s11538_s5 + $0x470] sm:$0xff]  }
 0xa93   :  { %9195 = vmatpush3.bf16.msra.mxu1 %v9726_v49  ;;  %9202 = vmatprep.mubr.msk.bf16.mxu1 %vm576_vm6, %v4627_v60 }
 0xa94   :  { %9196 = vmatprep.subr.bf16.mxu1 %v9728_v8 }
 0xa97   :  { %9197 = vmatpush3.bf16.msra.mxu1 %v9728_v8 }
 0xa98   :  { %9198 = vmatprep.subr.bf16.mxu1 %v9730_v43 }
 0xa9b   :  { %9199 = vmatpush3.bf16.msra.mxu1 %v9730_v43 }
 0xa9c   :  { %9200 = vmatprep.subr.bf16.mxu1 %v9732_v9 }
 0xa9f   :  { %9201 = vmatpush3.bf16.msra.mxu1 %v9732_v9 }
 0xaa0   :  { %9218 = vmatprep.subr.bf16.mxu1 %v9733_v10 }
 0xaa2   :  { %9203 = vmatmul.mubr.msk.bf16.vlgmr.msra.gmra.mrb[132].mxu1 %vm576_vm6, %v4628_v39 }
 0xaa3   :  { %9219 = vmatpush3.bf16.msra.mxu1 %v9733_v10  ;;  %9226 = vmatprep.mubr.msk.bf16.mxu1 %vm576_vm6, %v4630_v57 }
 0xaa4   :  { %9220 = vmatprep.subr.bf16.mxu1 %v9734_v11 }
 0xaa7   :  { %9221 = vmatpush3.bf16.msra.mxu1 %v9734_v11 }
 0xaa8   :  { %9222 = vmatprep.subr.bf16.mxu1 %v9735_v12 }
 0xaab   :  { %9223 = vmatpush3.bf16.msra.mxu1 %v9735_v12 }
 0xaac   :  { %9224 = vmatprep.subr.bf16.mxu1 %v9736_v13 }
 0xaaf   :  { %9225 = vmatpush3.bf16.msra.mxu1 %v9736_v13 }
 0xab2   :  { %9227 = vmatmul.mubr.msk.bf16.vlgmr.msra.gmra.mrb[136].mxu1 %vm576_vm6, %v4631_v14 }
 0xb35   :  { %v9132_v15 = vpop.f32.mrb[116].mxu1 }
 0xb36   :  { %v4717_v51 = vpop.f32.mrb[117].mxu1 }
 0xb37   :  { %v9133_v53 = vpop.f32.mrb[118].mxu1 }
 0xb38   :  { %v4720_v55 = vpop.f32.mrb[119].mxu1 }
 0xb3d   :  { %v9168_v56 = vpop.f32.mrb[196].mxu0 }
 0xb3e   :  { %v4975_v58 = vpop.f32.mrb[197].mxu0 }
 0xb3f   :  { %v9169_v59 = vpop.f32.mrb[198].mxu0 }
 0xb40   :  { %v4978_v60 = vpop.f32.mrb[199].mxu0 }
 0xb45   :  { %v9144_v61 = vpop.f32.mrb[120].mxu1 }
 0xb46   :  { %v4804_v62 = vadd.f32 %v9144_v61, %v9132_v15  ;;  %v4795_v63 = vpop.f32.mrb[121].mxu1  ;;  %v7845_v61 = vld [vmem:[%s11536_s6 + $0x5] ss:$0 sm:$0xff] }
 0xb47   :  { %v4796_v0 = vadd.f32 %v4795_v63, %v4717_v51  ;;  %v9145_v1 = vpop.f32.mrb[122].mxu1 }
 0xb48   :  { %v4798_v2 = vpop.f32.mrb[123].mxu1 }
 0xb49   :  { %v4799_v3 = vadd.f32 %v4798_v2, %v4720_v55 }
 0xb4e   :  { %v9192_v4 = vpop.f32.mrb[200].mxu0 }
 0xb4f   :  { %v5158_v5 = vpop.f32.mrb[201].mxu0 }
 0xb50   :  { %v9193_v6 = vpop.f32.mrb[202].mxu0 }
 0xb51   :  { %v5161_v34 = vpop.f32.mrb[203].mxu0 }
 0xb55   :  { %v9156_v35 = vpop.f32.mrb[124].mxu1 }
 0xb56   :  { %v4897_v36 = vadd.f32 %v9156_v35, %v4804_v62  ;;  %v4881_v37 = vpop.f32.mrb[125].mxu1 }
 0xb57   :  { %v4895_v38 = vadd.f32 %v4881_v37, %v4796_v0  ;;  %v9157_v39 = vpop.f32.mrb[126].mxu1 }
 0xb58   :  { %v4884_v41 = vpop.f32.mrb[127].mxu1  ;;  %v4991_v42 = vadd.f32 %v9168_v56, %v4897_v36 }
 0xb59   :  { %v4896_v44 = vadd.f32 %v4884_v41, %v4799_v3  ;;  %v4989_v40 = vadd.f32 %v4975_v58, %v4895_v38 }
 0xb5b   :  { %v4990_v45 = vadd.f32 %v4978_v60, %v4896_v44 }
 0xb5e   :  { %v9216_v32 = vpop.f32.mrb[204].mxu0 }
 0xb5f   :  { %v5341_v46 = vpop.f32.mrb[205].mxu0 }
 0xb60   :  { %v9217_v47 = vpop.f32.mrb[206].mxu0 }
 0xb61   :  { %v5344_v48 = vpop.f32.mrb[207].mxu0 }
 0xb65   :  { %v9180_v50 = vpop.f32.mrb[128].mxu1 }
 0xb66   :  { %v5080_v52 = vadd.f32 %v9180_v50, %v4991_v42  ;;  %v5064_v57 = vpop.f32.mrb[129].mxu1 }
 0xb67   :  { %v5078_v7 = vadd.f32 %v5064_v57, %v4989_v40  ;;  %v9181_v49 = vpop.f32.mrb[130].mxu1 }
 0xb68   :  { %v5174_v8 = vadd.f32 %v9192_v4, %v5080_v52  ;;  %v5067_v43 = vpop.f32.mrb[131].mxu1  ;;  %v9743_v49 = vld [vmem:[%s11538_s5 + $0x488] sm:$0xff]  }
 0xb69   :  { %v5079_v9 = vadd.f32 %v5067_v43, %v4990_v45  ;;  %v5172_v10 = vadd.f32 %v5158_v5, %v5078_v7 }
 0xb6b   :  { %v5173_v11 = vadd.f32 %v5161_v34, %v5079_v9 }
 0xb75   :  { %v9204_v12 = vpop.f32.mrb[132].mxu1 }
 0xb76   :  { %v5263_v13 = vadd.f32 %v9204_v12, %v5174_v8  ;;  %v5247_v14 = vpop.f32.mrb[133].mxu1  ;;  %v9745_v12 = vld [vmem:[%s11538_s5 + $0x490] sm:$0xff]  }
 0xb77   :  { %v5261_v15 = vadd.f32 %v5247_v14, %v5172_v10  ;;  %v9205_v51 = vpop.f32.mrb[134].mxu1 }
 0xb78   :  { %v5250_v53 = vpop.f32.mrb[135].mxu1  ;;  %v5357_v55 = vadd.f32 %v9216_v32, %v5263_v13  ;;  %v9746_v51 = vld [vmem:[%s11538_s5 + $0x498] sm:$0xff]  }
 0xb79   :  { %v5262_v56 = vadd.f32 %v5250_v53, %v5173_v11  ;;  %v5355_v58 = vadd.f32 %v5341_v46, %v5261_v15 }
 0xb7b   :  { %v5356_v59 = vadd.f32 %v5344_v48, %v5262_v56  ;;  %v9755_v56 = vld [vmem:[%s11538_s5 + $0x528] sm:$0xff]  }
 0xb85   :  { %v9228_v60 = vpop.f32.mrb[136].mxu1 }
 0xb86   :  { %v5446_v62 = vadd.f32 %v9228_v60, %v5357_v55  ;;  %v5430_v63 = vpop.f32.mrb[137].mxu1 }
 0xb87   :  { %v5444_v0 = vadd.f32 %v5430_v63, %v5355_v58  ;;  %v9229_v1 = vpop.f32.mrb[138].mxu1 }
 0xb88   :  { %v5454_v2 = vadd.f32 %v7845_v61, %v5446_v62  ;;  %v5433_v3 = vpop.f32.mrb[139].mxu1  ;;  %v9747_v62 = vld [vmem:[%s11538_s5 + $0x4c0] sm:$0xff]   ;;  %v9749_v1 = vld [vmem:[%s11538_s5 + $0x4c8] sm:$0xff]  }
 0xb89   :  { %v5452_v4 = vadd.f32 %v7845_v61, %v5444_v0  ;;  %v5445_v5 = vadd.f32 %v5433_v3, %v5356_v59  ;;  %v9757_v0 = vld [vmem:[%s11538_s5 + $0x530] sm:$0xff]  }
 0xb8a   :  { %v5457_v6 = vmax.f32 %v5454_v2, 0.0 }
 0xb8b   :  { %v5455_v34 = vmax.f32 %v5452_v4, 0.0  ;;  %v5453_v35 = vadd.f32 %v7845_v61, %v5445_v5  ;;  %v9759_v4 = vld [vmem:[%s11538_s5 + $0x538] sm:$0xff]  }
 0xb8c   :  { %v5460_v36 = vadd.f32 %v5457_v6, %v10647_v30 }
 0xb8d   :  { %v11102_v37 = vadd.f32 %v5455_v34, %v3477_v31  ;;  %v5456_v38 = vmax.f32 %v5453_v35, 0.0  ;;  %v9737_v31 = vld [vmem:[%s11538_s5 + $0x4a0] sm:$0xff]   ;;  %v9750_v35 = vld [vmem:[%s11538_s5 + $0x4d0] sm:$0xff]  }
 0xb8e   :  { %v11108_v41 = vmax.f32 %v5460_v36, 0.0  ;;  %9262 = vmatprep.subr.bf16.mxu1 %v9737_v31 }
 0xb8f   :  { %v11106_v39 = vadd.f32 %v5456_v38, %v3478_v33  ;;  %v5461_v42 = vmax.f32 %v11102_v37, 0.0  ;;  %9263 = vmatpush3.bf16.msra.mxu1 %v9737_v31  ;;  %v9738_v33 = vld [vmem:[%s11538_s5 + $0x4a8] sm:$0xff]  }
 0xb90   :  { %v5465_v27 = vpack.c.bf16 %v11108_v41, %v11108_v41  ;;  %9264 = vmatprep.subr.bf16.mxu1 %v9738_v33 }
 0xb91   :  { %v5462_v44 = vmax.f32 %v11106_v39, 0.0 }
 0xb92   :  { %v5467_v29 = vsel %vm368_vm5, %v5465_v27, 0 }
 0xb93   :  { %v5464_v30 = vpack.c.bf16 %v5462_v44, %v5461_v42  ;;  %9265 = vmatpush3.bf16.msra.mxu1 %v9738_v33 }
 0xb95   :  { %9230 = vmatprep.subr.bf16.mxu0 %v5464_v30 }
 0xb96   :  { %9231 = vmatpush3.bf16.msra.mxu0 %v5464_v30  ;;  %v9761_v30 = vld [vmem:[%s11538_s5 + $0x560] sm:$0xff]  }
 0xb97   :  { %9515 = vmatprep.subr.msk.bf16.mxu0 %vm368_vm5, %v5465_v27 }
 0xb9a   :  { %9233 = vmatpush3.bf16.msra.mxu0 %v5467_v29  ;;  %v9752_v29 = vld [vmem:[%s11538_s5 + $0x4d8] sm:$0xff]  }
 0xb9d   :  { %9235 = vmatmul.mubr.msk.bf16.vlgmr.msra.gmra.mrb[208].mxu0 %vm1455_vm8, %v10853_v16  ;;  %v9740_v16 = vld [vmem:[%s11538_s5 + $0x4b0] sm:$0xff]  }
 0xb9e   :  { %9238 = vmatprep.mubr.msk.bf16.mxu0 %vm1455_vm8, %v10860_v17  ;;  %v9739_v17 = vld [vmem:[%s11538_s5 + $0x4e0] sm:$0xff]   ;;  %9266 = vmatprep.subr.bf16.mxu1 %v9740_v16 }
 0xb9f   :  { %9298 = vmatprep.subr.bf16.mxu0 %v9739_v17  ;;  %9267 = vmatpush3.bf16.msra.mxu1 %v9740_v16  ;;  %v9763_v16 = vld [vmem:[%s11538_s5 + $0x568] sm:$0xff]  }
 0xba0   :  { %9299 = vmatpush3.bf16.msra.mxu0 %v9739_v17 }
 0xba5   :  { %9239 = vmatmul.mubr.msk.bf16.gmra.mrb[212].mxu0 %vm1455_vm8, %v10867_v18  ;;  %v9741_v18 = vld [vmem:[%s11538_s5 + $0x4b8] sm:$0xff]  }
 0xba6   :  { %9242 = vmatprep.mubr.msk.bf16.mxu0 %vm1455_vm8, %v10874_v19  ;;  %9268 = vmatprep.subr.bf16.mxu1 %v9741_v18  ;;  %v9742_v19 = vld [vmem:[%s11538_s5 + $0x480] sm:$0xff]  }
 0xba7   :  { %9269 = vmatpush3.bf16.msra.mxu1 %v9741_v18 }
 0xba8   :  { %9274 = vmatprep.subr.bf16.mxu1 %v9742_v19 }
 0xbad   :  { %9243 = vmatmul.mubr.msk.bf16.gmra.mrb[216].mxu0 %vm1455_vm8, %v10881_v20  ;;  %v9744_v20 = vld [vmem:[%s11538_s5 + $0x4e8] sm:$0xff]  }
 0xbae   :  { %9246 = vmatprep.mubr.msk.bf16.mxu0 %vm1455_vm8, %v10888_v21  ;;  %9300 = vmatprep.subr.bf16.mxu0 %v9744_v20  ;;  %v9748_v21 = vld [vmem:[%s11538_s5 + $0x4f0] sm:$0xff]  }
 0xbaf   :  { %9301 = vmatpush3.bf16.msra.mxu0 %v9744_v20 }
 0xbb0   :  { %9302 = vmatprep.subr.bf16.mxu0 %v9748_v21 }
 0xbb3   :  { %9303 = vmatpush3.bf16.msra.mxu0 %v9748_v21  ;;  %v9754_v21 = vld [vmem:[%s11538_s5 + $0x500] sm:$0xff]  }
 0xbb5   :  { %9247 = vmatmul.mubr.msk.bf16.gmra.mrb[220].mxu0 %vm1455_vm8, %v10895_v22  ;;  %v9751_v22 = vld [vmem:[%s11538_s5 + $0x4f8] sm:$0xff]  }
 0xbb6   :  { %9250 = vmatprep.mubr.msk.bf16.mxu0 %vm1455_vm8, %v10902_v23  ;;  %9304 = vmatprep.subr.bf16.mxu0 %v9751_v22  ;;  %v9753_v23 = vld [vmem:[%s11538_s5 + $0x520] sm:$0xff]  }
 0xbb7   :  { %9305 = vmatpush3.bf16.msra.mxu0 %v9751_v22 }
 0xbb8   :  { %9322 = vmatprep.subr.bf16.mxu0 %v9753_v23 }
 0xbbd   :  { %9251 = vmatmul.mubr.msk.bf16.gmra.mrb[224].mxu0 %vm1455_vm8, %v10909_v24 }
 0xbbe   :  { %9254 = vmatprep.mubr.msk.bf16.mxu0 %vm1455_vm8, %v10916_v25 }
 0xbc5   :  { %9255 = vmatmul.mubr.msk.bf16.gmra.mrb[228].mxu0 %vm1455_vm8, %v10923_v26 }
 0xbc6   :  { %9258 = vmatprep.mubr.msk.bf16.mxu0 %vm1455_vm8, %v10930_v28 }
 0xbcd   :  { %9259 = vmatmul.mubr.msk.bf16.gmra.mrb[232].mxu0 %vm1455_vm8, %v10937_v54 }
 0xc70   :  { %v9236_v24 = vpop.f32.mrb[208].mxu0 }
 0xc71   :  { %v5503_v25 = vpop.f32.mrb[209].mxu0 }
 0xc72   :  { %v9237_v26 = vpop.f32.mrb[210].mxu0 }
 0xc73   :  { %v5614_v28 = vpack.c.bf16 %v9237_v26, %v9236_v24  ;;  %v5506_v54 = vpop.f32.mrb[211].mxu0  ;;  %v9765_v24 = vld [vmem:[%s11538_s5 + $0x570] sm:$0xff]   ;;  %v9756_v26 = vld [vmem:[%s11538_s5 + $0x508] sm:$0xff]  }
 0xc74   :  { %v5613_v40 = vpack.c.bf16 %v5506_v54, %v5503_v25 }
 0xc75   :  { %v5645_v52 = vrot.slane %v5614_v28, 4 }
 0xc78   :  { %v9240_v45 = vpop.f32.mrb[212].mxu0 }
 0xc79   :  { %v5519_v32 = vpop.f32.mrb[213].mxu0 }
 0xc7a   :  { %v9241_v46 = vpop.f32.mrb[214].mxu0 }
 0xc7b   :  { %v5616_v47 = vpack.c.bf16 %v9241_v46, %v9240_v45  ;;  %v5522_v48 = vpop.f32.mrb[215].mxu0 }
 0xc7c   :  { %v5615_v50 = vpack.c.bf16 %v5522_v48, %v5519_v32 }
 0xc7e   :  { %v5646_v57 = vrot.slane %v5615_v50, 4  ;;  %v9760_v50 = vld [vmem:[%s11538_s5 + $0x518] sm:$0xff]  }
 0xc80   :  { %v5647_v7 = vsel %vm548_vm7, %v5645_v52, %v5646_v57  ;;  %v9244_v8 = vpop.f32.mrb[216].mxu0  ;;  %v9762_v52 = vld [vmem:[%s11538_s5 + $0x540] sm:$0xff]  }
 0xc81   :  { %9270 = vmatprep.mubr.msk.bf16.mxu1 %vm576_vm6, %v5647_v7  ;;  %v5535_v43 = vpop.f32.mrb[217].mxu0  ;;  %v9764_v7 = vld [vmem:[%s11538_s5 + $0x548] sm:$0xff]  }
 0xc82   :  { %9271 = vmatmul.mubr.msk.bf16.vlgmr.msra.gmra.mrb[140].mxu1 %vm576_vm6, %v5646_v57  ;;  %v9245_v9 = vpop.f32.mrb[218].mxu0  ;;  %v9837_v57 = vld [vmem:[%s11537_s4] sm:$0xff]  }
 0xc83   :  { %9275 = vmatpush3.bf16.msra.mxu1 %v9742_v19  ;;  %9282 = vmatprep.mubr.msk.bf16.mxu1 %vm576_vm6, %v5613_v40  ;;  %v5618_v10 = vpack.c.bf16 %v9245_v9, %v9244_v8  ;;  %v5538_v11 = vpop.f32.mrb[219].mxu0  ;;  %v9767_v40 = vld [vmem:[%s11538_s5 + $0x578] sm:$0xff]   ;;  %v9770_v9 = vld [vmem:[%s11538_s5 + $0x588] sm:$0xff]  }
 0xc84   :  { %9276 = vmatprep.subr.bf16.mxu1 %v9743_v49  ;;  %v11186_v13 = vpack.c.bf16 %v5538_v11, %v5535_v43  ;;  %v9768_v8 = vld [vmem:[%s11538_s5 + $0x558] sm:$0xff]   ;;  %v9769_v43 = vld [vmem:[%s11538_s5 + $0x580] sm:$0xff]  }
 0xc85   :  { %v5904_v14 = vrot.slane %v5618_v10, 4  ;;  %v9771_v10 = vld [vmem:[%s11538_s5 + $0x590] sm:$0xff]   ;;  %v9772_v11 = vld [vmem:[%s11538_s5 + $0x598] sm:$0xff]  }
 0xc86   :  { %v5903_v15 = vrot.slane %v11186_v13, 4 }
 0xc87   :  { %9277 = vmatpush3.bf16.msra.mxu1 %v9743_v49  ;;  %v9766_v49 = vld [vmem:[%s11538_s5 + $0x550] sm:$0xff]  }
 0xc88   :  { %9278 = vmatprep.subr.bf16.mxu1 %v9745_v12  ;;  %v5905_v53 = vsel %vm548_vm7, %v5903_v15, %v5904_v14  ;;  %v9248_v55 = vpop.f32.mrb[220].mxu0 }
 0xc89   :  { %9306 = vmatprep.mubr.msk.bf16.mxu0 %vm576_vm6, %v5905_v53  ;;  %v11197_v58 = vpop.f32.mrb[221].mxu0 }
 0xc8a   :  { %9307 = vmatmul.mubr.msk.bf16.vlgmr.msra.gmra.mrb[236].mxu0 %vm576_vm6, %v5904_v14  ;;  %v9249_v59 = vpop.f32.mrb[222].mxu0 }
 0xc8b   :  { %9279 = vmatpush3.bf16.msra.mxu1 %v9745_v12  ;;  %9323 = vmatpush3.bf16.msra.mxu0 %v9753_v23  ;;  %v11200_v60 = vpack.c.bf16 %v9249_v59, %v9248_v55  ;;  %v11202_v61 = vpop.f32.mrb[223].mxu0 }
 0xc8c   :  { %9280 = vmatprep.subr.bf16.mxu1 %v9746_v51  ;;  %9324 = vmatprep.subr.bf16.mxu0 %v9755_v56  ;;  %v5619_v63 = vpack.c.bf16 %v11202_v61, %v11197_v58 }
 0xc8d   :  { %v6086_v36 = vrot.slane %v11200_v60, 4 }
 0xc8f   :  { %9281 = vmatpush3.bf16.msra.mxu1 %v9746_v51  ;;  %9325 = vmatpush3.bf16.msra.mxu0 %v9755_v56 }
 0xc90   :  { %9286 = vmatprep.subr.bf16.mxu1 %v9747_v62  ;;  %v11215_v2 = vpop.f32.mrb[224].mxu0  ;;  %9326 = vmatprep.subr.bf16.mxu0 %v9757_v0 }
 0xc91   :  { %v5567_v3 = vpop.f32.mrb[225].mxu0 }
 0xc92   :  { %9283 = vmatmul.mubr.msk.bf16.vlgmr.msra.gmra.mrb[144].mxu1 %vm576_vm6, %v5614_v28  ;;  %v11221_v5 = vpop.f32.mrb[226].mxu0 }
 0xc93   :  { %9287 = vmatpush3.bf16.msra.mxu1 %v9747_v62  ;;  %9294 = vmatprep.mubr.msk.bf16.mxu1 %vm576_vm6, %v5616_v47  ;;  %v5622_v6 = vpack.c.bf16 %v11221_v5, %v11215_v2  ;;  %v5570_v34 = vpop.f32.mrb[227].mxu0  ;;  %v9758_v47 = vld [vmem:[%s11538_s5 + $0x510] sm:$0xff]  }
 0xc94   :  { %9288 = vmatprep.subr.bf16.mxu1 %v9749_v1  ;;  %9327 = vmatpush3.bf16.msra.mxu0 %v9757_v0  ;;  %v5621_v38 = vpack.c.bf16 %v5570_v34, %v5567_v3 }
 0xc95   :  { %9328 = vmatprep.subr.bf16.mxu0 %v9759_v4 }
 0xc96   :  { %v6087_v27 = vrot.slane %v5621_v38, 4 }
 0xc97   :  { %9289 = vmatpush3.bf16.msra.mxu1 %v9749_v1 }
 0xc98   :  { %9290 = vmatprep.subr.bf16.mxu1 %v9750_v35  ;;  %9329 = vmatpush3.bf16.msra.mxu0 %v9759_v4  ;;  %v6088_v31 = vsel %vm548_vm7, %v6086_v36, %v6087_v27  ;;  %v9256_v33 = vpop.f32.mrb[228].mxu0 }
 0xc99   :  { %9330 = vmatprep.mubr.msk.bf16.mxu0 %vm576_vm6, %v6088_v31  ;;  %9346 = vmatprep.subr.bf16.mxu0 %v9761_v30  ;;  %v5583_v17 = vpop.f32.mrb[229].mxu0 }
 0xc9a   :  { %v9257_v18 = vpop.f32.mrb[230].mxu0 }
 0xc9b   :  { %9291 = vmatpush3.bf16.msra.mxu1 %v9750_v35  ;;  %9331 = vmatmul.mubr.msk.bf16.vlgmr.msra.gmra.mrb[240].mxu0 %vm576_vm6, %v6087_v27  ;;  %v5624_v19 = vpack.c.bf16 %v9257_v18, %v9256_v33  ;;  %v5586_v20 = vpop.f32.mrb[231].mxu0 }
 0xc9c   :  { %9292 = vmatprep.subr.bf16.mxu1 %v9752_v29  ;;  %9347 = vmatpush3.bf16.msra.mxu0 %v9761_v30  ;;  %v5623_v22 = vpack.c.bf16 %v5586_v20, %v5583_v17 }
 0xc9d   :  { %9348 = vmatprep.subr.bf16.mxu0 %v9763_v16  ;;  %v6270_v23 = vrot.slane %v5624_v19, 4 }
 0xc9e   :  { %v6269_v25 = vrot.slane %v5623_v22, 4 }
 0xc9f   :  { %9293 = vmatpush3.bf16.msra.mxu1 %v9752_v29 }
 0xca0   :  { %9310 = vmatprep.subr.bf16.mxu1 %v9754_v21  ;;  %9349 = vmatpush3.bf16.msra.mxu0 %v9763_v16  ;;  %v6271_v28 = vsel %vm548_vm7, %v6269_v25, %v6270_v23  ;;  %v9260_v54 = vpop.f32.mrb[232].mxu0 }
 0xca1   :  { %9350 = vmatprep.subr.bf16.mxu0 %v9765_v24  ;;  %9354 = vmatprep.mubr.msk.bf16.mxu0 %vm576_vm6, %v6271_v28  ;;  %v5599_v45 = vpop.f32.mrb[233].mxu0  ;;  %v5626_v12 = vpack.c.bf16 %v9260_v54, %v9260_v54 }
 0xca2   :  { %9295 = vmatmul.mubr.msk.bf16.vlgmr.msra.gmra.mrb[148].mxu1 %vm576_vm6, %v11186_v13  ;;  %v9261_v32 = vpop.f32.mrb[234].mxu0 }
 0xca3   :  { %9311 = vmatpush3.bf16.msra.mxu1 %v9754_v21  ;;  %9318 = vmatprep.mubr.msk.bf16.mxu1 %vm576_vm6, %v5619_v63  ;;  %v5602_v46 = vpop.f32.mrb[235].mxu0 }
 0xca4   :  { %9312 = vmatprep.subr.bf16.mxu1 %v9756_v26  ;;  %9351 = vmatpush3.bf16.msra.mxu0 %v9765_v24  ;;  %v5625_v48 = vpack.c.bf16 %v5602_v46, %v5599_v45 }
 0xca5   :  { %9352 = vmatprep.subr.bf16.mxu0 %v9767_v40 }
 0xca7   :  { %9313 = vmatpush3.bf16.msra.mxu1 %v9756_v26 }
 0xca8   :  { %9314 = vmatprep.subr.bf16.mxu1 %v9758_v47  ;;  %9353 = vmatpush3.bf16.msra.mxu0 %v9767_v40 }
 0xcab   :  { %9315 = vmatpush3.bf16.msra.mxu1 %v9758_v47  ;;  %9355 = vmatmul.mubr.msk.bf16.vlgmr.msra.gmra.mrb[244].mxu0 %vm576_vm6, %v6270_v23 }
 0xcac   :  { %9316 = vmatprep.subr.bf16.mxu1 %v9760_v50  ;;  %9374 = vmatprep.mubr.msk.bf16.mxu0 %vm1455_vm8, %v9837_v57 }
 0xcaf   :  { %9317 = vmatpush3.bf16.msra.mxu1 %v9760_v50 }
 0xcb0   :  { %9334 = vmatprep.subr.bf16.mxu1 %v9762_v52 }
 0xcb2   :  { %9319 = vmatmul.mubr.msk.bf16.vlgmr.msra.gmra.mrb[152].mxu1 %vm576_vm6, %v11200_v60 }
 0xcb3   :  { %9335 = vmatpush3.bf16.msra.mxu1 %v9762_v52  ;;  %9342 = vmatprep.mubr.msk.bf16.mxu1 %vm576_vm6, %v5622_v6 }
 0xcb4   :  { %9336 = vmatprep.subr.bf16.mxu1 %v9764_v7 }
 0xcb7   :  { %9337 = vmatpush3.bf16.msra.mxu1 %v9764_v7 }
 0xcb8   :  { %9338 = vmatprep.subr.bf16.mxu1 %v9766_v49 }
 0xcbb   :  { %9339 = vmatpush3.bf16.msra.mxu1 %v9766_v49 }
 0xcbc   :  { %9340 = vmatprep.subr.bf16.mxu1 %v9768_v8 }
 0xcbf   :  { %9341 = vmatpush3.bf16.msra.mxu1 %v9768_v8 }
 0xcc0   :  { %9358 = vmatprep.subr.bf16.mxu1 %v9769_v43 }
 0xcc2   :  { %9343 = vmatmul.mubr.msk.bf16.vlgmr.msra.gmra.mrb[156].mxu1 %vm576_vm6, %v5623_v22 }
 0xcc3   :  { %9359 = vmatpush3.bf16.msra.mxu1 %v9769_v43  ;;  %9366 = vmatprep.mubr.msk.bf16.mxu1 %vm576_vm6, %v5625_v48 }
 0xcc4   :  { %9360 = vmatprep.subr.bf16.mxu1 %v9770_v9 }
 0xcc7   :  { %9361 = vmatpush3.bf16.msra.mxu1 %v9770_v9  ;;  %v7914_v9 = vld [vmem:[%s11536_s6 + $0x6] ss:$0 sm:$0xff] }
 0xcc8   :  { %9362 = vmatprep.subr.bf16.mxu1 %v9771_v10 }
 0xccb   :  { %9363 = vmatpush3.bf16.msra.mxu1 %v9771_v10 }
 0xccc   :  { %9364 = vmatprep.subr.bf16.mxu1 %v9772_v11 }
 0xccf   :  { %9365 = vmatpush3.bf16.msra.mxu1 %v9772_v11 }
 0xcd2   :  { %9367 = vmatmul.mubr.msk.bf16.vlgmr.msra.gmra.mrb[160].mxu1 %vm576_vm6, %v5626_v12 }
 0xd55   :  { %v9272_v13 = vpop.f32.mrb[140].mxu1 }
 0xd56   :  { %v5712_v14 = vpop.f32.mrb[141].mxu1 }
 0xd57   :  { %v9273_v15 = vpop.f32.mrb[142].mxu1 }
 0xd58   :  { %v5715_v51 = vpop.f32.mrb[143].mxu1 }
 0xd5d   :  { %v9308_v53 = vpop.f32.mrb[236].mxu0 }
 0xd5e   :  { %v5970_v55 = vpop.f32.mrb[237].mxu0 }
 0xd5f   :  { %v9309_v56 = vpop.f32.mrb[238].mxu0 }
 0xd60   :  { %v5973_v58 = vpop.f32.mrb[239].mxu0 }
 0xd65   :  { %v9284_v59 = vpop.f32.mrb[144].mxu1 }
 0xd66   :  { %v5799_v60 = vadd.f32 %v9284_v59, %v9272_v13  ;;  %v5790_v61 = vpop.f32.mrb[145].mxu1 }
 0xd67   :  { %v5791_v62 = vadd.f32 %v5790_v61, %v5712_v14  ;;  %v9285_v63 = vpop.f32.mrb[146].mxu1 }
 0xd68   :  { %v5793_v0 = vpop.f32.mrb[147].mxu1  ;;  %v9839_v63 = vld [vmem:[%s11537_s4 + $0x10] sm:$0xff]  }
 0xd69   :  { %v5794_v1 = vadd.f32 %v5793_v0, %v5715_v51  ;;  %v9840_v0 = vld [vmem:[%s11537_s4 + $0x18] sm:$0xff]  }
 0xd6e   :  { %v9332_v2 = vpop.f32.mrb[240].mxu0 }
 0xd6f   :  { %v6153_v3 = vpop.f32.mrb[241].mxu0 }
 0xd70   :  { %v9333_v4 = vpop.f32.mrb[242].mxu0 }
 0xd71   :  { %v6156_v5 = vpop.f32.mrb[243].mxu0  ;;  %v9844_v4 = vld [vmem:[%s11537_s4 + $0x38] sm:$0xff]  }
 0xd75   :  { %v9296_v6 = vpop.f32.mrb[148].mxu1 }
 0xd76   :  { %v5892_v34 = vadd.f32 %v9296_v6, %v5799_v60  ;;  %v5876_v35 = vpop.f32.mrb[149].mxu1  ;;  %v9846_v6 = vld [vmem:[%s11537_s4 + $0x48] sm:$0xff]  }
 0xd77   :  { %v5890_v36 = vadd.f32 %v5876_v35, %v5791_v62  ;;  %v9297_v38 = vpop.f32.mrb[150].mxu1  ;;  %v9838_v62 = vld [vmem:[%s11537_s4 + $0x8] sm:$0xff]   ;;  %v9848_v35 = vld [vmem:[%s11537_s4 + $0x58] sm:$0xff]  }
 0xd78   :  { %v5879_v30 = vpop.f32.mrb[151].mxu1  ;;  %v5986_v27 = vadd.f32 %v9308_v53, %v5892_v34  ;;  %v9847_v34 = vld [vmem:[%s11537_s4 + $0x50] sm:$0xff]   ;;  %v9850_v38 = vld [vmem:[%s11537_s4 + $0x68] ss:$0 sps:$4 sm:$0xff]  }
 0xd79   :  { %v5891_v29 = vadd.f32 %v5879_v30, %v5794_v1  ;;  %v5984_v31 = vadd.f32 %v5970_v55, %v5890_v36  ;;  %v9841_v1 = vld [vmem:[%s11537_s4 + $0x20] sm:$0xff]  }
 0xd7a   :  { %v9849_v36 = vld [vmem:[%s11537_s4 + $0x60] sm:$0xff]  }
 0xd7b   :  { %v5985_v33 = vadd.f32 %v5973_v58, %v5891_v29  ;;  %v9773_v30 = vld [vmem:[%s11538_s5 + $0x5c0] sm:$0xff]   ;;  %v9776_v29 = vld [vmem:[%s11538_s5 + $0x5d0] sm:$0xff]  }
 0xd7c   :  { %9402 = vmatprep.subr.bf16.mxu1 %v9773_v30 }
 0xd7d   :  { %9403 = vmatpush3.bf16.msra.mxu1 %v9773_v30 }
 0xd7e   :  { %v9356_v16 = vpop.f32.mrb[244].mxu0 }
 0xd7f   :  { %v6336_v17 = vpop.f32.mrb[245].mxu0 }
 0xd80   :  { %v9357_v18 = vpop.f32.mrb[246].mxu0 }
 0xd81   :  { %v6339_v19 = vpop.f32.mrb[247].mxu0  ;;  %v9784_v18 = vld [vmem:[%s11538_s5 + $0x610] sm:$0xff]  }
 0xd85   :  { %v9320_v20 = vpop.f32.mrb[152].mxu1 }
 0xd86   :  { %v6075_v21 = vadd.f32 %v9320_v20, %v5986_v27  ;;  %v6059_v22 = vpop.f32.mrb[153].mxu1  ;;  %v9774_v27 = vld [vmem:[%s11538_s5 + $0x5c8] sm:$0xff]   ;;  %v9789_v20 = vld [vmem:[%s11538_s5 + $0x640] sm:$0xff]  }
 0xd87   :  { %v6073_v23 = vadd.f32 %v6059_v22, %v5984_v31  ;;  %v9321_v24 = vpop.f32.mrb[154].mxu1  ;;  %9404 = vmatprep.subr.bf16.mxu1 %v9774_v27  ;;  %v9775_v31 = vld [vmem:[%s11538_s5 + $0x600] sm:$0xff]  }
 0xd88   :  { %v6169_v25 = vadd.f32 %v9332_v2, %v6075_v21  ;;  %v6062_v26 = vpop.f32.mrb[155].mxu1  ;;  %v9842_v2 = vld [vmem:[%s11537_s4 + $0x28] sm:$0xff]   ;;  %9405 = vmatpush3.bf16.msra.mxu1 %v9774_v27 }
 0xd89   :  { %v6074_v28 = vadd.f32 %v6062_v26, %v5985_v33  ;;  %v6167_v54 = vadd.f32 %v6153_v3, %v6073_v23  ;;  %v9843_v3 = vld [vmem:[%s11537_s4 + $0x30] sm:$0xff]   ;;  %9406 = vmatprep.subr.bf16.mxu1 %v9776_v29  ;;  %v9777_v33 = vld [vmem:[%s11538_s5 + $0x5d8] sm:$0xff]  }
 0xd8b   :  { %v6168_v40 = vadd.f32 %v6156_v5, %v6074_v28  ;;  %v9845_v5 = vld [vmem:[%s11537_s4 + $0x40] sm:$0xff]  }
 0xd8c   :  { %9407 = vmatpush3.bf16.msra.mxu1 %v9776_v29  ;;  %v9799_v29 = vld [vmem:[%s11538_s5 + $0x688] sm:$0xff]  }
 0xd8d   :  { %9408 = vmatprep.subr.bf16.mxu1 %v9777_v33 }
 0xd90   :  { %9409 = vmatpush3.bf16.msra.mxu1 %v9777_v33 }
 0xd95   :  { %v9344_v45 = vpop.f32.mrb[156].mxu1 }
 0xd96   :  { %v6258_v32 = vadd.f32 %v9344_v45, %v6169_v25  ;;  %v6242_v46 = vpop.f32.mrb[157].mxu1 }
 0xd97   :  { %v6256_v47 = vadd.f32 %v6242_v46, %v6167_v54  ;;  %v9345_v48 = vpop.f32.mrb[158].mxu1 }
 0xd98   :  { %v6245_v50 = vpop.f32.mrb[159].mxu1  ;;  %v6352_v52 = vadd.f32 %v9356_v16, %v6258_v32  ;;  %v9778_v16 = vld [vmem:[%s11538_s5 + $0x5a0] sm:$0xff]  }
 0xd99   :  { %v6257_v57 = vadd.f32 %v6245_v50, %v6168_v40  ;;  %v6350_v7 = vadd.f32 %v6336_v17, %v6256_v47  ;;  %9414 = vmatprep.subr.bf16.mxu1 %v9778_v16  ;;  %v9780_v17 = vld [vmem:[%s11538_s5 + $0x608] sm:$0xff]  }
 0xd9b   :  { %v6351_v49 = vadd.f32 %v6339_v19, %v6257_v57  ;;  %v9787_v19 = vld [vmem:[%s11538_s5 + $0x618] sm:$0xff]  }
 0xda5   :  { %v9368_v8 = vpop.f32.mrb[160].mxu1 }
 0xda6   :  { %v6441_v43 = vadd.f32 %v9368_v8, %v6352_v52  ;;  %v6425_v10 = vpop.f32.mrb[161].mxu1  ;;  %v9779_v52 = vld [vmem:[%s11538_s5 + $0x5a8] sm:$0xff]  }
 0xda7   :  { %v6439_v11 = vadd.f32 %v6425_v10, %v6350_v7  ;;  %v9369_v12 = vpop.f32.mrb[162].mxu1 }
 0xda8   :  { %v6428_v13 = vpop.f32.mrb[163].mxu1  ;;  %v6449_v14 = vadd.f32 %v7914_v9, %v6441_v43 }
 0xda9   :  { %v6447_v15 = vadd.f32 %v7914_v9, %v6439_v11  ;;  %v6440_v51 = vadd.f32 %v6428_v13, %v6351_v49  ;;  %v9782_v13 = vld [vmem:[%s11538_s5 + $0x5b8] sm:$0xff]  }
 0xdaa   :  { %v6452_v55 = vmax.f32 %v6449_v14, 0.0 }
 0xdab   :  { %v6448_v53 = vadd.f32 %v7914_v9, %v6440_v51  ;;  %v6450_v56 = vmax.f32 %v6447_v15, 0.0  ;;  %v9781_v9 = vld [vmem:[%s11538_s5 + $0x5b0] sm:$0xff]   ;;  %v9791_v51 = vld [vmem:[%s11538_s5 + $0x648] sm:$0xff]  }
 0xdac   :  { %v6454_v60 = vpack.c.bf16 %v6452_v55, %v6452_v55 }
 0xdad   :  { %v6451_v58 = vmax.f32 %v6448_v53, 0.0 }
 0xdae   :  { %v6456_v61 = vsel %vm368_vm5, %v6454_v60, 0 }
 0xdaf   :  { %v6453_v59 = vpack.c.bf16 %v6451_v58, %v6450_v56 }
 0xdb1   :  { %9370 = vmatprep.subr.bf16.mxu0 %v6453_v59 }
 0xdb2   :  { %9371 = vmatpush3.bf16.msra.mxu0 %v6453_v59  ;;  %v9783_v59 = vld [vmem:[%s11538_s5 + $0x5e0] sm:$0xff]  }
 0xdb3   :  { %9516 = vmatprep.subr.msk.bf16.mxu0 %vm368_vm5, %v6454_v60 }
 0xdb6   :  { %9373 = vmatpush3.bf16.msra.mxu0 %v6456_v61  ;;  %v9793_v61 = vld [vmem:[%s11538_s5 + $0x650] sm:$0xff]  }
 0xdb7   :  { %9438 = vmatprep.subr.bf16.mxu0 %v9775_v31 }
 0xdb9   :  { %9375 = vmatmul.mubr.msk.bf16.vlgmr.msra.gmra.mrb[248].mxu0 %vm1455_vm8, %v9838_v62  ;;  %v9785_v62 = vld [vmem:[%s11538_s5 + $0x5e8] sm:$0xff]  }
 0xdba   :  { %9378 = vmatprep.mubr.msk.bf16.mxu0 %vm1455_vm8, %v9839_v63  ;;  %9439 = vmatpush3.bf16.msra.mxu0 %v9775_v31 }
 0xdbb   :  { %9440 = vmatprep.subr.bf16.mxu0 %v9780_v17 }
 0xdbe   :  { %9441 = vmatpush3.bf16.msra.mxu0 %v9780_v17 }
 0xdbf   :  { %9442 = vmatprep.subr.bf16.mxu0 %v9784_v18 }
 0xdc1   :  { %9379 = vmatmul.mubr.msk.bf16.gmra.mrb[252].mxu0 %vm1455_vm8, %v9840_v0 }
 0xdc2   :  { %9382 = vmatprep.mubr.msk.bf16.mxu0 %vm1455_vm8, %v9841_v1  ;;  %9443 = vmatpush3.bf16.msra.mxu0 %v9784_v18  ;;  %v9795_v1 = vld [vmem:[%s11538_s5 + $0x658] sm:$0xff]   ;;  %v9790_v18 = vld [vmem:[%s11538_s5 + $0x620] sm:$0xff]  }
 0xdc3   :  { %9444 = vmatprep.subr.bf16.mxu0 %v9787_v19 }
 0xdc6   :  { %9445 = vmatpush3.bf16.msra.mxu0 %v9787_v19 }
 0xdc7   :  { %9462 = vmatprep.subr.bf16.mxu0 %v9789_v20 }
 0xdc9   :  { %9383 = vmatmul.mubr.msk.bf16.gmra.mrb[0].mxu0 %vm1455_vm8, %v9842_v2 }
 0xdca   :  { %9386 = vmatprep.mubr.msk.bf16.mxu0 %vm1455_vm8, %v9843_v3 }
 0xdd1   :  { %9387 = vmatmul.mubr.msk.bf16.gmra.mrb[4].mxu0 %vm1455_vm8, %v9844_v4 }
 0xdd2   :  { %9390 = vmatprep.mubr.msk.bf16.mxu0 %vm1455_vm8, %v9845_v5  ;;  %v9786_v5 = vld [vmem:[%s11538_s5 + $0x5f0] sm:$0xff]  }
 0xdd9   :  { %9391 = vmatmul.mubr.msk.bf16.gmra.mrb[8].mxu0 %vm1455_vm8, %v9846_v6 }
 0xdda   :  { %9394 = vmatprep.mubr.msk.bf16.mxu0 %vm1455_vm8, %v9847_v34 }
 0xde1   :  { %9395 = vmatmul.mubr.msk.bf16.gmra.mrb[12].mxu0 %vm1455_vm8, %v9848_v35  ;;  %v9797_v35 = vld [vmem:[%s11538_s5 + $0x680] sm:$0xff]  }
 0xde2   :  { %9398 = vmatprep.mubr.msk.bf16.mxu0 %vm1455_vm8, %v9849_v36 }
 0xde9   :  { %9399 = vmatmul.mubr.msk.bf16.gmra.mrb[16].mxu0 %vm1455_vm8, %v9850_v38  ;;  %v9788_v38 = vld [vmem:[%s11538_s5 + $0x5f8] sm:$0xff]  }
 0xe8c   :  { %v9376_v21 = vpop.f32.mrb[248].mxu0 }
 0xe8d   :  { %v6492_v22 = vpop.f32.mrb[249].mxu0 }
 0xe8e   :  { %v9377_v23 = vpop.f32.mrb[250].mxu0 }
 0xe8f   :  { %v6603_v24 = vpack.c.bf16 %v9377_v23, %v9376_v21  ;;  %v6495_v25 = vpop.f32.mrb[251].mxu0  ;;  %v9801_v21 = vld [vmem:[%s11538_s5 + $0x690] sm:$0xff]   ;;  %v9792_v23 = vld [vmem:[%s11538_s5 + $0x628] sm:$0xff]  }
 0xe90   :  { %v6602_v26 = vpack.c.bf16 %v6495_v25, %v6492_v22 }
 0xe91   :  { %v6634_v47 = vrot.slane %v6603_v24, 4 }
 0xe94   :  { %v9380_v28 = vpop.f32.mrb[252].mxu0 }
 0xe95   :  { %v6508_v54 = vpop.f32.mrb[253].mxu0 }
 0xe96   :  { %v9381_v40 = vpop.f32.mrb[254].mxu0 }
 0xe97   :  { %v6605_v45 = vpack.c.bf16 %v9381_v40, %v9380_v28  ;;  %v6511_v32 = vpop.f32.mrb[255].mxu0 }
 0xe98   :  { %v6604_v46 = vpack.c.bf16 %v6511_v32, %v6508_v54 }
 0xe9a   :  { %v6635_v48 = vrot.slane %v6604_v46, 4  ;;  %v9796_v46 = vld [vmem:[%s11538_s5 + $0x638] sm:$0xff]  }
 0xe9c   :  { %v6636_v50 = vsel %vm548_vm7, %v6634_v47, %v6635_v48  ;;  %v9384_v57 = vpop.f32.mrb[0].mxu0  ;;  %v9798_v47 = vld [vmem:[%s11538_s5 + $0x660] sm:$0xff]  }
 0xe9d   :  { %9410 = vmatprep.mubr.msk.bf16.mxu1 %vm576_vm6, %v6636_v50  ;;  %v6524_v7 = vpop.f32.mrb[1].mxu0  ;;  %v9802_v50 = vld [vmem:[%s11538_s5 + $0x670] sm:$0xff]  }
 0xe9e   :  { %9411 = vmatmul.mubr.msk.bf16.vlgmr.msra.gmra.mrb[164].mxu1 %vm576_vm6, %v6635_v48  ;;  %v9385_v49 = vpop.f32.mrb[2].mxu0  ;;  %v9800_v48 = vld [vmem:[%s11538_s5 + $0x668] sm:$0xff]  }
 0xe9f   :  { %9415 = vmatpush3.bf16.msra.mxu1 %v9778_v16  ;;  %9422 = vmatprep.mubr.msk.bf16.mxu1 %vm576_vm6, %v6602_v26  ;;  %v6607_v8 = vpack.c.bf16 %v9385_v49, %v9384_v57  ;;  %v6527_v43 = vpop.f32.mrb[3].mxu0  ;;  %v9803_v26 = vld [vmem:[%s11538_s5 + $0x698] sm:$0xff]   ;;  %v9805_v57 = vld [vmem:[%s11538_s5 + $0x6a0] sm:$0xff]   ;;  %v9807_v49 = vld [vmem:[%s11538_s5 + $0x6b0] sm:$0xff]  }
 0xea0   :  { %9416 = vmatprep.subr.bf16.mxu1 %v9779_v52  ;;  %v11400_v10 = vpack.c.bf16 %v6527_v43, %v6524_v7  ;;  %v9806_v7 = vld [vmem:[%s11538_s5 + $0x6a8] sm:$0xff]  }
 0xea1   :  { %v6893_v11 = vrot.slane %v6607_v8, 4  ;;  %v9808_v8 = vld [vmem:[%s11538_s5 + $0x6b8] sm:$0xff]  }
 0xea2   :  { %v6892_v12 = vrot.slane %v11400_v10, 4 }
 0xea3   :  { %9417 = vmatpush3.bf16.msra.mxu1 %v9779_v52  ;;  %v9804_v52 = vld [vmem:[%s11538_s5 + $0x678] sm:$0xff]  }
 0xea4   :  { %9418 = vmatprep.subr.bf16.mxu1 %v9781_v9  ;;  %v6894_v14 = vsel %vm548_vm7, %v6892_v12, %v6893_v11  ;;  %v9388_v15 = vpop.f32.mrb[4].mxu0 }
 0xea5   :  { %9446 = vmatprep.mubr.msk.bf16.mxu0 %vm576_vm6, %v6894_v14  ;;  %v11411_v53 = vpop.f32.mrb[5].mxu0 }
 0xea6   :  { %9447 = vmatmul.mubr.msk.bf16.vlgmr.msra.gmra.mrb[20].mxu0 %vm576_vm6, %v6893_v11  ;;  %v9389_v55 = vpop.f32.mrb[6].mxu0 }
 0xea7   :  { %9419 = vmatpush3.bf16.msra.mxu1 %v9781_v9  ;;  %9463 = vmatpush3.bf16.msra.mxu0 %v9789_v20  ;;  %v11414_v56 = vpack.c.bf16 %v9389_v55, %v9388_v15  ;;  %v11416_v58 = vpop.f32.mrb[7].mxu0 }
 0xea8   :  { %9420 = vmatprep.subr.bf16.mxu1 %v9782_v13  ;;  %9464 = vmatprep.subr.bf16.mxu0 %v9791_v51  ;;  %v6608_v60 = vpack.c.bf16 %v11416_v58, %v11411_v53 }
 0xea9   :  { %v7075_v6 = vrot.slane %v11414_v56, 4 }
 0xeab   :  { %9421 = vmatpush3.bf16.msra.mxu1 %v9782_v13  ;;  %9465 = vmatpush3.bf16.msra.mxu0 %v9791_v51 }
 0xeac   :  { %9426 = vmatprep.subr.bf16.mxu1 %v9783_v59  ;;  %v11429_v63 = vpop.f32.mrb[8].mxu0  ;;  %9466 = vmatprep.subr.bf16.mxu0 %v9793_v61 }
 0xead   :  { %v6556_v0 = vpop.f32.mrb[9].mxu0 }
 0xeae   :  { %9423 = vmatmul.mubr.msk.bf16.vlgmr.msra.gmra.mrb[168].mxu1 %vm576_vm6, %v6603_v24  ;;  %v11435_v2 = vpop.f32.mrb[10].mxu0 }
 0xeaf   :  { %9427 = vmatpush3.bf16.msra.mxu1 %v9783_v59  ;;  %9434 = vmatprep.mubr.msk.bf16.mxu1 %vm576_vm6, %v6605_v45  ;;  %v6611_v3 = vpack.c.bf16 %v11435_v2, %v11429_v63  ;;  %v6559_v4 = vpop.f32.mrb[11].mxu0  ;;  %v9794_v45 = vld [vmem:[%s11538_s5 + $0x630] sm:$0xff]  }
 0xeb0   :  { %9428 = vmatprep.subr.bf16.mxu1 %v9785_v62  ;;  %9467 = vmatpush3.bf16.msra.mxu0 %v9793_v61  ;;  %v6610_v34 = vpack.c.bf16 %v6559_v4, %v6556_v0 }
 0xeb1   :  { %9468 = vmatprep.subr.bf16.mxu0 %v9795_v1 }
 0xeb2   :  { %v7076_v36 = vrot.slane %v6610_v34, 4 }
 0xeb3   :  { %9429 = vmatpush3.bf16.msra.mxu1 %v9785_v62 }
 0xeb4   :  { %9430 = vmatprep.subr.bf16.mxu1 %v9786_v5  ;;  %9469 = vmatpush3.bf16.msra.mxu0 %v9795_v1  ;;  %v7077_v30 = vsel %vm548_vm7, %v7075_v6, %v7076_v36  ;;  %v9396_v27 = vpop.f32.mrb[12].mxu0 }
 0xeb5   :  { %9470 = vmatprep.mubr.msk.bf16.mxu0 %vm576_vm6, %v7077_v30  ;;  %9486 = vmatprep.subr.bf16.mxu0 %v9797_v35  ;;  %v6572_v31 = vpop.f32.mrb[13].mxu0 }
 0xeb6   :  { %v9397_v33 = vpop.f32.mrb[14].mxu0 }
 0xeb7   :  { %9431 = vmatpush3.bf16.msra.mxu1 %v9786_v5  ;;  %9471 = vmatmul.mubr.msk.bf16.vlgmr.msra.gmra.mrb[24].mxu0 %vm576_vm6, %v7076_v36  ;;  %v6613_v16 = vpack.c.bf16 %v9397_v33, %v9396_v27  ;;  %v6575_v17 = vpop.f32.mrb[15].mxu0 }
 0xeb8   :  { %9432 = vmatprep.subr.bf16.mxu1 %v9788_v38  ;;  %9487 = vmatpush3.bf16.msra.mxu0 %v9797_v35  ;;  %v6612_v19 = vpack.c.bf16 %v6575_v17, %v6572_v31 }
 0xeb9   :  { %9488 = vmatprep.subr.bf16.mxu0 %v9799_v29  ;;  %v7259_v20 = vrot.slane %v6613_v16, 4 }
 0xeba   :  { %v7258_v22 = vrot.slane %v6612_v19, 4 }
 0xebb   :  { %9433 = vmatpush3.bf16.msra.mxu1 %v9788_v38 }
 0xebc   :  { %9450 = vmatprep.subr.bf16.mxu1 %v9790_v18  ;;  %9489 = vmatpush3.bf16.msra.mxu0 %v9799_v29  ;;  %v7260_v24 = vsel %vm548_vm7, %v7258_v22, %v7259_v20  ;;  %v9400_v25 = vpop.f32.mrb[16].mxu0 }
 0xebd   :  { %9490 = vmatprep.subr.bf16.mxu0 %v9801_v21  ;;  %9494 = vmatprep.mubr.msk.bf16.mxu0 %vm576_vm6, %v7260_v24  ;;  %v6588_v28 = vpop.f32.mrb[17].mxu0  ;;  %v6615_v43 = vpack.c.bf16 %v9400_v25, %v9400_v25 }
 0xebe   :  { %9435 = vmatmul.mubr.msk.bf16.vlgmr.msra.gmra.mrb[172].mxu1 %vm576_vm6, %v11400_v10  ;;  %v9401_v54 = vpop.f32.mrb[18].mxu0 }
 0xebf   :  { %9451 = vmatpush3.bf16.msra.mxu1 %v9790_v18  ;;  %9458 = vmatprep.mubr.msk.bf16.mxu1 %vm576_vm6, %v6608_v60  ;;  %v6591_v40 = vpop.f32.mrb[19].mxu0 }
 0xec0   :  { %9452 = vmatprep.subr.bf16.mxu1 %v9792_v23  ;;  %9491 = vmatpush3.bf16.msra.mxu0 %v9801_v21  ;;  %v6614_v32 = vpack.c.bf16 %v6591_v40, %v6588_v28 }
 0xec1   :  { %9492 = vmatprep.subr.bf16.mxu0 %v9803_v26 }
 0xec3   :  { %9453 = vmatpush3.bf16.msra.mxu1 %v9792_v23 }
 0xec4   :  { %9454 = vmatprep.subr.bf16.mxu1 %v9794_v45  ;;  %9493 = vmatpush3.bf16.msra.mxu0 %v9803_v26 }
 0xec7   :  { %9455 = vmatpush3.bf16.msra.mxu1 %v9794_v45  ;;  %9495 = vmatmul.mubr.msk.bf16.vlgmr.msra.gmra.mrb[28].mxu0 %vm576_vm6, %v7259_v20 }
 0xec8   :  { %9456 = vmatprep.subr.bf16.mxu1 %v9796_v46 }
 0xecb   :  { %9457 = vmatpush3.bf16.msra.mxu1 %v9796_v46 }
 0xecc   :  { %9474 = vmatprep.subr.bf16.mxu1 %v9798_v47 }
 0xece   :  { %9459 = vmatmul.mubr.msk.bf16.vlgmr.msra.gmra.mrb[176].mxu1 %vm576_vm6, %v11414_v56 }
 0xecf   :  { %9475 = vmatpush3.bf16.msra.mxu1 %v9798_v47  ;;  %9482 = vmatprep.mubr.msk.bf16.mxu1 %vm576_vm6, %v6611_v3 }
 0xed0   :  { %9476 = vmatprep.subr.bf16.mxu1 %v9800_v48 }
 0xed3   :  { %9477 = vmatpush3.bf16.msra.mxu1 %v9800_v48 }
 0xed4   :  { %9478 = vmatprep.subr.bf16.mxu1 %v9802_v50 }
 0xed7   :  { %9479 = vmatpush3.bf16.msra.mxu1 %v9802_v50 }
 0xed8   :  { %9480 = vmatprep.subr.bf16.mxu1 %v9804_v52 }
 0xedb   :  { %9481 = vmatpush3.bf16.msra.mxu1 %v9804_v52 }
 0xedc   :  { %9498 = vmatprep.subr.bf16.mxu1 %v9805_v57 }
 0xede   :  { %9483 = vmatmul.mubr.msk.bf16.vlgmr.msra.gmra.mrb[180].mxu1 %vm576_vm6, %v6612_v19 }
 0xedf   :  { %9499 = vmatpush3.bf16.msra.mxu1 %v9805_v57  ;;  %9506 = vmatprep.mubr.msk.bf16.mxu1 %vm576_vm6, %v6614_v32  ;;  %v7983_v57 = vld [vmem:[%s11536_s6 + $0x7] ss:$0 sm:$0xff] }
 0xee0   :  { %9500 = vmatprep.subr.bf16.mxu1 %v9806_v7 }
 0xee3   :  { %9501 = vmatpush3.bf16.msra.mxu1 %v9806_v7 }
 0xee4   :  { %9502 = vmatprep.subr.bf16.mxu1 %v9807_v49 }
 0xee7   :  { %9503 = vmatpush3.bf16.msra.mxu1 %v9807_v49 }
 0xee8   :  { %9504 = vmatprep.subr.bf16.mxu1 %v9808_v8 }
 0xeeb   :  { %9505 = vmatpush3.bf16.msra.mxu1 %v9808_v8 }
 0xeee   :  { %9507 = vmatmul.mubr.msk.bf16.vlgmr.msra.gmra.mrb[184].mxu1 %vm576_vm6, %v6615_v43 }
 0xf71   :  { %v9412_v9 = vpop.f32.mrb[164].mxu1 }
 0xf72   :  { %v6701_v10 = vpop.f32.mrb[165].mxu1 }
 0xf73   :  { %v9413_v11 = vpop.f32.mrb[166].mxu1 }
 0xf74   :  { %v6704_v12 = vpop.f32.mrb[167].mxu1 }
 0xf79   :  { %v9448_v13 = vpop.f32.mrb[20].mxu0 }
 0xf7a   :  { %v6959_v14 = vpop.f32.mrb[21].mxu0 }
 0xf7b   :  { %v9449_v15 = vpop.f32.mrb[22].mxu0 }
 0xf7c   :  { %v6962_v51 = vpop.f32.mrb[23].mxu0 }
 0xf81   :  { %v9424_v53 = vpop.f32.mrb[168].mxu1 }
 0xf82   :  { %v6788_v55 = vadd.f32 %v9424_v53, %v9412_v9  ;;  %v6779_v56 = vpop.f32.mrb[169].mxu1 }
 0xf83   :  { %v6780_v58 = vadd.f32 %v6779_v56, %v6701_v10  ;;  %v9425_v59 = vpop.f32.mrb[170].mxu1 }
 0xf84   :  { %v6782_v60 = vpop.f32.mrb[171].mxu1 }
 0xf85   :  { %v6783_v61 = vadd.f32 %v6782_v60, %v6704_v12 }
 0xf8a   :  { %v9472_v62 = vpop.f32.mrb[24].mxu0 }
 0xf8b   :  { %v7142_v63 = vpop.f32.mrb[25].mxu0 }
 0xf8c   :  { %v9473_v0 = vpop.f32.mrb[26].mxu0 }
 0xf8d   :  { %v7145_v1 = vpop.f32.mrb[27].mxu0 }
 0xf91   :  { %v9436_v2 = vpop.f32.mrb[172].mxu1 }
 0xf92   :  { %v6881_v3 = vadd.f32 %v9436_v2, %v6788_v55  ;;  %v6865_v4 = vpop.f32.mrb[173].mxu1 }
 0xf93   :  { %v6879_v5 = vadd.f32 %v6865_v4, %v6780_v58  ;;  %v9437_v6 = vpop.f32.mrb[174].mxu1 }
 0xf94   :  { %v6868_v34 = vpop.f32.mrb[175].mxu1  ;;  %v6975_v35 = vadd.f32 %v9448_v13, %v6881_v3 }
 0xf95   :  { %v6880_v36 = vadd.f32 %v6868_v34, %v6783_v61  ;;  %v6973_v38 = vadd.f32 %v6959_v14, %v6879_v5 }
 0xf97   :  { %v6974_v30 = vadd.f32 %v6962_v51, %v6880_v36 }
 0xf9a   :  { %v9496_v27 = vpop.f32.mrb[28].mxu0 }
 0xf9b   :  { %v7325_v29 = vpop.f32.mrb[29].mxu0 }
 0xf9c   :  { %v9497_v31 = vpop.f32.mrb[30].mxu0 }
 0xf9d   :  { %v7328_v33 = vpop.f32.mrb[31].mxu0 }
 0xfa1   :  { %v9460_v16 = vpop.f32.mrb[176].mxu1 }
 0xfa2   :  { %v7064_v17 = vadd.f32 %v9460_v16, %v6975_v35  ;;  %v7048_v18 = vpop.f32.mrb[177].mxu1 }
 0xfa3   :  { %v7062_v19 = vadd.f32 %v7048_v18, %v6973_v38  ;;  %v9461_v20 = vpop.f32.mrb[178].mxu1 }
 0xfa4   :  { %v7158_v21 = vadd.f32 %v9472_v62, %v7064_v17  ;;  %v7051_v22 = vpop.f32.mrb[179].mxu1 }
 0xfa5   :  { %v7063_v23 = vadd.f32 %v7051_v22, %v6974_v30  ;;  %v7156_v24 = vadd.f32 %v7142_v63, %v7062_v19 }
 0xfa7   :  { %v7157_v25 = vadd.f32 %v7145_v1, %v7063_v23 }
 0xfb1   :  { %v9484_v26 = vpop.f32.mrb[180].mxu1 }
 0xfb2   :  { %v7247_v28 = vadd.f32 %v9484_v26, %v7158_v21  ;;  %v7231_v54 = vpop.f32.mrb[181].mxu1 }
 0xfb3   :  { %v7245_v40 = vadd.f32 %v7231_v54, %v7156_v24  ;;  %v9485_v45 = vpop.f32.mrb[182].mxu1 }
 0xfb4   :  { %v7234_v32 = vpop.f32.mrb[183].mxu1  ;;  %v7341_v46 = vadd.f32 %v9496_v27, %v7247_v28 }
 0xfb5   :  { %v7246_v47 = vadd.f32 %v7234_v32, %v7157_v25  ;;  %v7339_v48 = vadd.f32 %v7325_v29, %v7245_v40 }
 0xfb7   :  { %v7340_v50 = vadd.f32 %v7328_v33, %v7246_v47 }
 0xfc1   :  { %v9508_v52 = vpop.f32.mrb[184].mxu1 }
 0xfc2   :  { %v7430_v7 = vadd.f32 %v9508_v52, %v7341_v46  ;;  %v7414_v49 = vpop.f32.mrb[185].mxu1 }
 0xfc3   :  { %v7428_v8 = vadd.f32 %v7414_v49, %v7339_v48  ;;  %v9509_v43 = vpop.f32.mrb[186].mxu1 }
 0xfc4   :  { %v7438_v9 = vadd.f32 %v7983_v57, %v7430_v7  ;;  %v7417_v10 = vpop.f32.mrb[187].mxu1 }
 0xfc5   :  { %v7436_v11 = vadd.f32 %v7983_v57, %v7428_v8  ;;  %v7429_v12 = vadd.f32 %v7417_v10, %v7340_v50 }
 0xfc6   :  { %v7441_v13 = vmax.f32 %v7438_v9, 0.0 }
 0xfc7   :  { %v7439_v14 = vmax.f32 %v7436_v11, 0.0  ;;  %v7437_v15 = vadd.f32 %v7983_v57, %v7429_v12 }
 0xfc8   :  { %v7444_v51 = vadd.f32 %v7441_v13, %v11108_v41 }
 0xfc9   :  { %v7442_v53 = vadd.f32 %v7439_v14, %v5461_v42  ;;  %v7440_v55 = vmax.f32 %v7437_v15, 0.0 }
 0xfca   :  { %v7447_v56 = vmax.f32 %v7444_v51, 0.0 }
 0xfcb   :  { %v7445_v58 = vmax.f32 %v7442_v53, 0.0  ;;  %v7443_v59 = vadd.f32 %v7440_v55, %v5462_v44 }
 0xfcc   :  { %7451 = vst.msk [vmem:[%s11539_s7 + $0x10] sm:$0x3] %vm7450_vm9, %v7447_v56 }
 0xfcd   :  { %7448 = vst.msk [vmem:[%s11539_s7] sm:$0xff] %vm576_vm6, %v7445_v58  ;;  %v7446_v41 = vmax.f32 %v7443_v59, 0.0 }
 0xfcf   :  { %7449 = vst.msk [vmem:[%s11539_s7 + $0x8] sm:$0xff] %vm576_vm6, %v7446_v41 }

</bundles_post_ra>
